<compile_context>
chip_gen: v6e
topology: v6e:2x2x1
jax: 0.10.0
libtpu: 0.0.40
codegen_flags: <defaults>
</compile_context>

<pallas_src>
import math

import jax
import jax.numpy as jnp
import numpy as np
from jax.experimental import pallas as pl
from jax.experimental.pallas import tpu as pltpu

EMBED = 256            # embed_size (matches the module spec)
HEADS = 8              # heads
HEAD_DIM = EMBED // HEADS
FWD_EXP = 4            # forward_expansion
HIDDEN = FWD_EXP * EMBED
EPS = 1e-5             # nn.LayerNorm default eps


# ----------------------------------------------------------------------------
# Kernel helpers
# ----------------------------------------------------------------------------
def _layernorm(x, gamma, beta):
    mu = jnp.mean(x, axis=-1, keepdims=True)
    var = jnp.mean((x - mu) * (x - mu), axis=-1, keepdims=True)
    return (x - mu) * jax.lax.rsqrt(var + EPS) * gamma + beta


def _mm(a, b):
    """2-D MXU matmul: bf16 operands, f32 accumulation."""
    return jnp.dot(a.astype(jnp.bfloat16), b.astype(jnp.bfloat16),
                   preferred_element_type=jnp.float32)


# ----------------------------------------------------------------------------
# Fused kernel: one grid step = TB batch elements
# ----------------------------------------------------------------------------
def _fused_block_kernel(qh_ref, kh_ref, vh_ref, qres_ref, mbias_ref,
                        wq_ref, wk_ref, wv_ref, wo_ref, w1_ref, w2_ref,
                        vec_ref, b1_ref, o_ref):
    heads, tb, seq, hd = qh_ref.shape       # (H, TB, L, D)
    rows = tb * seq                         # TB*L rows per step
    bh = heads * tb                         # batch size of the attention einsums

    # ---- per-head Q/K/V projections: one (H*TB*L, D) @ (D, D) each ----------
    def project(x_ref, w_ref):
        x = x_ref[...].reshape(heads * rows, hd)
        return _mm(x, w_ref[...]).reshape(bh, seq, hd)

    qp = project(qh_ref, wq_ref)            # 1/sqrt(E) scale folded into wq
    kp = project(kh_ref, wk_ref)
    vp = project(vh_ref, wv_ref)

    # ---- attention, batched over (head, batch element) ----------------------
    energy = jnp.einsum("bqd,bkd->bqk",
                        qp.astype(jnp.bfloat16), kp.astype(jnp.bfloat16),
                        preferred_element_type=jnp.float32)      # (bh, L, L)
    e4 = energy.reshape(heads, tb, seq, seq) \
        + mbias_ref[...].reshape(1, tb, 1, seq)                  # additive mask
    m = jnp.max(e4, axis=-1, keepdims=True)
    p4 = jnp.exp(e4 - m)
    denom = jnp.sum(p4, axis=-1, keepdims=True)                  # (H, TB, L, 1)

    ctx = jnp.einsum("bqk,bkd->bqd",
                     p4.reshape(bh, seq, seq).astype(jnp.bfloat16),
                     vp.astype(jnp.bfloat16),
                     preferred_element_type=jnp.float32)         # (bh, L, D)
    # exact softmax normalization AFTER the PV matmul (L*D multiplies, not L*L)
    ctx = ctx * (1.0 / denom).reshape(bh, seq, 1)

    # ---- fc_out: head-batched einsum + 8-way add (no concat / transpose) ----
    parts = jnp.einsum("hrd,hde->hre",
                       ctx.reshape(heads, rows, hd).astype(jnp.bfloat16),
                       wo_ref[...],
                       preferred_element_type=jnp.float32)       # (H, rows, E)

    vec = vec_ref[...]                                           # (6, E) f32
    bo, ln1_g, ln1_b, b2, ln2_g, ln2_b = (vec[i:i + 1, :] for i in range(6))

    h1 = jnp.sum(parts, axis=0) + bo                             # (rows, E)

    # ---- residual + LN1 -> FFN -> residual + LN2  (dropout = identity) ------
    q_res = qres_ref[...].reshape(rows, EMBED)
    x = _layernorm(h1 + q_res, ln1_g, ln1_b)
    f1 = jnp.maximum(_mm(x, w1_ref[...]) + b1_ref[...], 0.0)     # (rows, 4E)
    f2 = _mm(f1, w2_ref[...]) + b2
    o_ref[...] = _layernorm(f2 + x, ln2_g, ln2_b).reshape(tb, seq, EMBED)


# ----------------------------------------------------------------------------
# One-time parameter preprocessing (hoisted out of the per-forward path)
# ----------------------------------------------------------------------------
def prepare_kernel_params(params):
    inv_sqrt_e = jnp.float32(1.0 / math.sqrt(EMBED))
    return {
        "wq": (params["wq_t"] * inv_sqrt_e).astype(jnp.bfloat16),   # (D, D)
        "wk": params["wk_t"].astype(jnp.bfloat16),                  # (D, D)
        "wv": params["wv_t"].astype(jnp.bfloat16),                  # (D, D)
        "wo": params["wo_t"].reshape(HEADS, HEAD_DIM, EMBED).astype(jnp.bfloat16),
        "w1": params["w1_t"].astype(jnp.bfloat16),                  # (E, 4E)
        "w2": params["w2_t"].astype(jnp.bfloat16),                  # (4E, E)
        "vec": jnp.concatenate([params["bo"], params["ln1_g"], params["ln1_b"],
                                params["b2"], params["ln2_g"], params["ln2_b"]],
                               axis=0),                             # (6, E) f32
        "b1": params["b1"],                                         # (1, 4E) f32
    }


def _choose_tile_batch(n, seq_len, target_rows=256, max_rows=1024):
    """Pick TB (dividing n) so TB*L fills the MXU's M dimension when possible."""
    divisors = [d for d in range(1, n + 1) if n % d == 0]
    for d in divisors:                        # smallest divisor reaching target
        if target_rows <= d * seq_len <= max_rows:
            return d
    fitting = [d for d in divisors if d * seq_len <= max_rows]
    return max(fitting) if fitting else 1


# ----------------------------------------------------------------------------
# Forward wrapper
# ----------------------------------------------------------------------------
@jax.jit
def transformer_block_forward(value, key, query, mask, kparams):
    N, L, E = query.shape
    assert E == EMBED
    tb = _choose_tile_batch(N, L)

    def split_heads(x):                       # (N, L, E) -> (H, N, L, D)
        return x.reshape(N, L, HEADS, HEAD_DIM).transpose(2, 0, 1, 3)

    q_heads = split_heads(query)
    k_heads = split_heads(key)
    v_heads = split_heads(value)
    # Additive key-mask bias: 0 where attended, -1e20 where masked.
    mask_bias = jnp.where(mask == 0, jnp.float32(-1e20),
                          jnp.float32(0.0)).reshape(N, 1, L)

    heads_spec = pl.BlockSpec((HEADS, tb, L, HEAD_DIM), lambda n: (0, n, 0, 0))
    flat_spec = pl.BlockSpec((tb, L, E), lambda n: (n, 0, 0))

    def full(shape):
        return pl.BlockSpec(shape, lambda n: (0,) * len(shape))

    flops = N * L * (6 * E * HEAD_DIM + 4 * L * E + 2 * E * E + 4 * E * HIDDEN)
    bytes_accessed = (5 * N * L * E * 4 + N * L * 4
                      + (3 * HEAD_DIM * HEAD_DIM + E * E + 2 * E * HIDDEN) * 2
                      + (6 * E + HIDDEN) * 4)
    cost = pl.CostEstimate(flops=flops,
                           transcendentals=N * HEADS * L * L,
                           bytes_accessed=bytes_accessed)

    return pl.pallas_call(
        _fused_block_kernel,
        out_shape=jax.ShapeDtypeStruct((N, L, E), jnp.float32),
        grid=(N // tb,),
        in_specs=[
            heads_spec, heads_spec, heads_spec,          # q, k, v (head-major)
            flat_spec,                                   # raw query (residual)
            pl.BlockSpec((tb, 1, L), lambda n: (n, 0, 0)),  # mask bias
            full((HEAD_DIM, HEAD_DIM)),                  # Wq (scale folded)
            full((HEAD_DIM, HEAD_DIM)),                  # Wk
            full((HEAD_DIM, HEAD_DIM)),                  # Wv
            full((HEADS, HEAD_DIM, E)),                  # Wo (head-split)
            full((E, HIDDEN)), full((HIDDEN, E)),        # W1, W2
            full((6, E)), full((1, HIDDEN)),             # packed vecs, b1
        ],
        out_specs=flat_spec,                             # lane-dense: last dim 256
        compiler_params=pltpu.CompilerParams(
            dimension_semantics=("parallel",),
            vmem_limit_bytes=32 * 1024 * 1024),
        cost_estimate=cost,
    )(q_heads, k_heads, v_heads, query, mask_bias,
      kparams["wq"], kparams["wk"], kparams["wv"], kparams["wo"],
      kparams["w1"], kparams["w2"], kparams["vec"], kparams["b1"])


# ----------------------------------------------------------------------------
# Pure-JAX reference (mirrors the PyTorch module, eval mode, f32)
# ----------------------------------------------------------------------------
def reference_forward(value, key, query, mask, p):
    N, L, E = query.shape

    def split(x):
        return x.reshape(N, L, HEADS, HEAD_DIM)

    v = split(value) @ p["wv_t"]
    k = split(key) @ p["wk_t"]
    q = split(query) @ p["wq_t"]
    energy = jnp.einsum("nqhd,nkhd->nhqk", q, k)
    energy = jnp.where(mask[:, None, None, :] == 0, -1e20, energy)
    att = jax.nn.softmax(energy / math.sqrt(E), axis=3)
    out = jnp.einsum("nhql,nlhd->nqhd", att, v).reshape(N, L, E)
    out = out @ p["wo_t"] + p["bo"][0]

    def ln(x, g, b):
        mu = jnp.mean(x, axis=-1, keepdims=True)
        var = jnp.mean((x - mu) ** 2, axis=-1, keepdims=True)
        return (x - mu) / jnp.sqrt(var + EPS) * g[0] + b[0]

    x = ln(out + query, p["ln1_g"], p["ln1_b"])
    ff = jnp.maximum(x @ p["w1_t"] + p["b1"][0], 0.0) @ p["w2_t"] + p["b2"][0]
    return ln(ff + x, p["ln2_g"], p["ln2_b"])


def init_params(key):
    keys = jax.random.split(key, 8)
    scale = 0.05
    return {
        "wq_t": scale * jax.random.normal(keys[0], (HEAD_DIM, HEAD_DIM), jnp.float32),
        "wk_t": scale * jax.random.normal(keys[1], (HEAD_DIM, HEAD_DIM), jnp.float32),
        "wv_t": scale * jax.random.normal(keys[2], (HEAD_DIM, HEAD_DIM), jnp.float32),
        "wo_t": scale * jax.random.normal(keys[3], (EMBED, EMBED), jnp.float32),
        "bo":   scale * jax.random.normal(keys[4], (1, EMBED), jnp.float32),
        "w1_t": scale * jax.random.normal(keys[5], (EMBED, HIDDEN), jnp.float32),
        "b1":   scale * jax.random.normal(keys[6], (1, HIDDEN), jnp.float32),
        "w2_t": scale * jax.random.normal(keys[7], (HIDDEN, EMBED), jnp.float32),
        "b2":   jnp.zeros((1, EMBED), jnp.float32),
        "ln1_g": jnp.ones((1, EMBED), jnp.float32),
        "ln1_b": jnp.zeros((1, EMBED), jnp.float32),
        "ln2_g": jnp.ones((1, EMBED), jnp.float32),
        "ln2_b": jnp.zeros((1, EMBED), jnp.float32),
    }


if __name__ == "__main__":
    N, L = 2, 8
    root = jax.random.PRNGKey(0)
    k_params, kv, kk, kq = jax.random.split(root, 4)

    params = init_params(k_params)
    kparams = prepare_kernel_params(params)     # hoisted, once per weight update

    value = jax.random.normal(kv, (N, L, EMBED), jnp.float32)
    key_in = jax.random.normal(kk, (N, L, EMBED), jnp.float32)
    query = jax.random.normal(kq, (N, L, EMBED), jnp.float32)
    # padding-style mask: batch 0 fully valid, batch 1 has last 2 positions masked
    lens = jnp.array([L, L - 2])
    mask = (jnp.arange(L)[None, :] < lens[:, None]).astype(jnp.float32)

    out = transformer_block_forward(value, key_in, query, mask, kparams)
    out = jax.block_until_ready(out)

    ref = reference_forward(value, key_in, query, mask, params)
    # Tolerance reflects bf16 MXU operands (f32 accumulation, f32 softmax/LN);
    # the softmax reciprocal itself is exact.  Post-LayerNorm values are O(1),
    # so 3e-2 leaves several-x margin over the observed/expected bf16 error.
    np.testing.assert_allclose(np.asarray(out), np.asarray(ref),
                               rtol=3e-2, atol=3e-2)
    print("KERNEL_OK")
</pallas_src>

<mosaic_0001>
module attributes {stable_mosaic.version = 11 : i64} {
  func.func @_fused_block_kernel(%arg0: i32, %arg1: memref<8x2x8x32xf32, #tpu.memory_space<vmem>>, %arg2: memref<8x2x8x32xf32, #tpu.memory_space<vmem>>, %arg3: memref<8x2x8x32xf32, #tpu.memory_space<vmem>>, %arg4: memref<2x8x256xf32, #tpu.memory_space<vmem>>, %arg5: memref<2x1x8xf32, #tpu.memory_space<vmem>>, %arg6: memref<32x32xbf16, #tpu.memory_space<vmem>>, %arg7: memref<32x32xbf16, #tpu.memory_space<vmem>>, %arg8: memref<32x32xbf16, #tpu.memory_space<vmem>>, %arg9: memref<8x32x256xbf16, #tpu.memory_space<vmem>>, %arg10: memref<256x1024xbf16, #tpu.memory_space<vmem>>, %arg11: memref<1024x256xbf16, #tpu.memory_space<vmem>>, %arg12: memref<6x256xf32, #tpu.memory_space<vmem>>, %arg13: memref<1x1024xf32, #tpu.memory_space<vmem>>, %arg14: memref<2x8x256xf32, #tpu.memory_space<vmem>>) attributes {dimension_semantics = [#tpu.dimension_semantics<parallel>], iteration_bounds = array<i64: 1>, scalar_prefetch = 0 : i64, scratch_operands = 0 : i64, tpu.core_type = #tpu.core_type<tc>, window_params = [{transform_indices = @transform_0, window_bounds = array<i64: 8, 2, 8, 32>}, {transform_indices = @transform_1, window_bounds = array<i64: 8, 2, 8, 32>}, {transform_indices = @transform_2, window_bounds = array<i64: 8, 2, 8, 32>}, {transform_indices = @transform_3, window_bounds = array<i64: 2, 8, 256>}, {transform_indices = @transform_4, window_bounds = array<i64: 2, 1, 8>}, {pipeline_mode = #tpu.pipeline_mode<synchronous>, transform_indices = @transform_5, window_bounds = array<i64: 32, 32>}, {pipeline_mode = #tpu.pipeline_mode<synchronous>, transform_indices = @transform_6, window_bounds = array<i64: 32, 32>}, {pipeline_mode = #tpu.pipeline_mode<synchronous>, transform_indices = @transform_7, window_bounds = array<i64: 32, 32>}, {pipeline_mode = #tpu.pipeline_mode<synchronous>, transform_indices = @transform_8, window_bounds = array<i64: 8, 32, 256>}, {pipeline_mode = #tpu.pipeline_mode<synchronous>, transform_indices = @transform_9, window_bounds = array<i64: 256, 1024>}, {pipeline_mode = #tpu.pipeline_mode<synchronous>, transform_indices = @transform_10, window_bounds = array<i64: 1024, 256>}, {pipeline_mode = #tpu.pipeline_mode<synchronous>, transform_indices = @transform_11, window_bounds = array<i64: 6, 256>}, {pipeline_mode = #tpu.pipeline_mode<synchronous>, transform_indices = @transform_12, window_bounds = array<i64: 1, 1024>}, {transform_indices = @transform_13, window_bounds = array<i64: 2, 8, 256>}]} {
    %c0 = arith.constant 0 : index
    %c0_0 = arith.constant 0 : index
    %c0_1 = arith.constant 0 : index
    %c0_2 = arith.constant 0 : index
    %0 = vector.load %arg1[%c0, %c0_0, %c0_1, %c0_2] : memref<8x2x8x32xf32, #tpu.memory_space<vmem>>, vector<8x2x8x32xf32>
    %1 = vector.shape_cast %0 : vector<8x2x8x32xf32> to vector<128x32xf32>
    %c0_3 = arith.constant 0 : index
    %c0_4 = arith.constant 0 : index
    %2 = vector.load %arg6[%c0_3, %c0_4] : memref<32x32xbf16, #tpu.memory_space<vmem>>, vector<32x32xbf16>
    %3 = arith.truncf %1 : vector<128x32xf32> to vector<128x32xbf16>
    %cst = arith.constant dense<0.000000e+00> : vector<128x32xf32>
    %4 = tpu.matmul %3, %2, %cst {dimension_numbers = #tpu.dot_dimension_numbers<[1], [0], [0], [1], [0, 0, 1, 1], [], []>} : vector<128x32xbf16>, vector<32x32xbf16>, vector<128x32xf32> -> vector<128x32xf32>
    %5 = vector.shape_cast %4 : vector<128x32xf32> to vector<16x8x32xf32>
    %c0_5 = arith.constant 0 : index
    %c0_6 = arith.constant 0 : index
    %c0_7 = arith.constant 0 : index
    %c0_8 = arith.constant 0 : index
    %6 = vector.load %arg2[%c0_5, %c0_6, %c0_7, %c0_8] : memref<8x2x8x32xf32, #tpu.memory_space<vmem>>, vector<8x2x8x32xf32>
    %7 = vector.shape_cast %6 : vector<8x2x8x32xf32> to vector<128x32xf32>
    %c0_9 = arith.constant 0 : index
    %c0_10 = arith.constant 0 : index
    %8 = vector.load %arg7[%c0_9, %c0_10] : memref<32x32xbf16, #tpu.memory_space<vmem>>, vector<32x32xbf16>
    %9 = arith.truncf %7 : vector<128x32xf32> to vector<128x32xbf16>
    %cst_11 = arith.constant dense<0.000000e+00> : vector<128x32xf32>
    %10 = tpu.matmul %9, %8, %cst_11 {dimension_numbers = #tpu.dot_dimension_numbers<[1], [0], [0], [1], [0, 0, 1, 1], [], []>} : vector<128x32xbf16>, vector<32x32xbf16>, vector<128x32xf32> -> vector<128x32xf32>
    %11 = vector.shape_cast %10 : vector<128x32xf32> to vector<16x8x32xf32>
    %c0_12 = arith.constant 0 : index
    %c0_13 = arith.constant 0 : index
    %c0_14 = arith.constant 0 : index
    %c0_15 = arith.constant 0 : index
    %12 = vector.load %arg3[%c0_12, %c0_13, %c0_14, %c0_15] : memref<8x2x8x32xf32, #tpu.memory_space<vmem>>, vector<8x2x8x32xf32>
    %13 = vector.shape_cast %12 : vector<8x2x8x32xf32> to vector<128x32xf32>
    %c0_16 = arith.constant 0 : index
    %c0_17 = arith.constant 0 : index
    %14 = vector.load %arg8[%c0_16, %c0_17] : memref<32x32xbf16, #tpu.memory_space<vmem>>, vector<32x32xbf16>
    %15 = arith.truncf %13 : vector<128x32xf32> to vector<128x32xbf16>
    %cst_18 = arith.constant dense<0.000000e+00> : vector<128x32xf32>
    %16 = tpu.matmul %15, %14, %cst_18 {dimension_numbers = #tpu.dot_dimension_numbers<[1], [0], [0], [1], [0, 0, 1, 1], [], []>} : vector<128x32xbf16>, vector<32x32xbf16>, vector<128x32xf32> -> vector<128x32xf32>
    %17 = vector.shape_cast %16 : vector<128x32xf32> to vector<16x8x32xf32>
    %18 = arith.truncf %5 : vector<16x8x32xf32> to vector<16x8x32xbf16>
    %19 = arith.truncf %11 : vector<16x8x32xf32> to vector<16x8x32xbf16>
    "tpu.trace_start"() <{level = 10 : i32, message = "bqd,bkd->bqk"}> : () -> ()
    %cst_19 = arith.constant dense<0.000000e+00> : vector<16x8x8xf32>
    %20 = tpu.matmul %18, %19, %cst_19 {dimension_numbers = #tpu.dot_dimension_numbers<[2], [2], [1], [1], [0, 0, 0, 1, 1, 1], [0], [0]>} : vector<16x8x32xbf16>, vector<16x8x32xbf16>, vector<16x8x8xf32> -> vector<16x8x8xf32>
    "tpu.trace_stop"() : () -> ()
    %21 = vector.shape_cast %20 : vector<16x8x8xf32> to vector<8x2x8x8xf32>
    %c0_20 = arith.constant 0 : index
    %c0_21 = arith.constant 0 : index
    %c0_22 = arith.constant 0 : index
    %22 = vector.load %arg5[%c0_20, %c0_21, %c0_22] : memref<2x1x8xf32, #tpu.memory_space<vmem>>, vector<2x1x8xf32>
    %23 = vector.shape_cast %22 : vector<2x1x8xf32> to vector<1x2x1x8xf32>
    %24 = vector.broadcast %23 : vector<1x2x1x8xf32> to vector<8x2x8x8xf32>
    %25 = arith.addf %21, %24 : vector<8x2x8x8xf32>
    %cst_23 = arith.constant dense<0xFF800000> : vector<8x2x8xf32>
    %26 = vector.multi_reduction <maximumf>, %25, %cst_23 [3] : vector<8x2x8x8xf32> to vector<8x2x8xf32>
    %27 = vector.shape_cast %26 : vector<8x2x8xf32> to vector<8x2x8x1xf32>
    %28 = vector.broadcast %27 : vector<8x2x8x1xf32> to vector<8x2x8x8xf32>
    %29 = arith.subf %25, %28 : vector<8x2x8x8xf32>
    %30 = math.exp %29 : vector<8x2x8x8xf32>
    %cst_24 = arith.constant dense<0.000000e+00> : vector<8x2x8xf32>
    %31 = vector.multi_reduction <add>, %30, %cst_24 [3] : vector<8x2x8x8xf32> to vector<8x2x8xf32>
    %32 = vector.shape_cast %31 : vector<8x2x8xf32> to vector<8x2x8x1xf32>
    %33 = vector.shape_cast %30 : vector<8x2x8x8xf32> to vector<16x8x8xf32>
    %34 = arith.truncf %33 : vector<16x8x8xf32> to vector<16x8x8xbf16>
    %35 = arith.truncf %17 : vector<16x8x32xf32> to vector<16x8x32xbf16>
    "tpu.trace_start"() <{level = 10 : i32, message = "bqk,bkd->bqd"}> : () -> ()
    %cst_25 = arith.constant dense<0.000000e+00> : vector<16x8x32xf32>
    %36 = tpu.matmul %34, %35, %cst_25 {dimension_numbers = #tpu.dot_dimension_numbers<[2], [1], [1], [2], [0, 0, 0, 1, 1, 2], [0], [0]>} : vector<16x8x8xbf16>, vector<16x8x32xbf16>, vector<16x8x32xf32> -> vector<16x8x32xf32>
    "tpu.trace_stop"() : () -> ()
    %cst_26 = arith.constant 1.000000e+00 : f32
    %37 = vector.broadcast %cst_26 : f32 to vector<8x2x8x1xf32>
    %38 = arith.divf %37, %32 : vector<8x2x8x1xf32>
    %39 = vector.shape_cast %38 : vector<8x2x8x1xf32> to vector<16x8x1xf32>
    %40 = vector.broadcast %39 : vector<16x8x1xf32> to vector<16x8x32xf32>
    %41 = arith.mulf %36, %40 : vector<16x8x32xf32>
    %42 = vector.shape_cast %41 : vector<16x8x32xf32> to vector<8x16x32xf32>
    %43 = arith.truncf %42 : vector<8x16x32xf32> to vector<8x16x32xbf16>
    %c0_27 = arith.constant 0 : index
    %c0_28 = arith.constant 0 : index
    %c0_29 = arith.constant 0 : index
    %44 = vector.load %arg9[%c0_27, %c0_28, %c0_29] : memref<8x32x256xbf16, #tpu.memory_space<vmem>>, vector<8x32x256xbf16>
    "tpu.trace_start"() <{level = 10 : i32, message = "hrd,hde->hre"}> : () -> ()
    %cst_30 = arith.constant dense<0.000000e+00> : vector<8x16x256xf32>
    %45 = tpu.matmul %43, %44, %cst_30 {dimension_numbers = #tpu.dot_dimension_numbers<[2], [1], [1], [2], [0, 0, 0, 1, 1, 2], [0], [0]>} : vector<8x16x32xbf16>, vector<8x32x256xbf16>, vector<8x16x256xf32> -> vector<8x16x256xf32>
    "tpu.trace_stop"() : () -> ()
    %c0_31 = arith.constant 0 : index
    %c0_32 = arith.constant 0 : index
    %46 = vector.load %arg12[%c0_31, %c0_32] : memref<6x256xf32, #tpu.memory_space<vmem>>, vector<6x256xf32>
    %47 = vector.extract_strided_slice %46 {offsets = [0, 0], sizes = [1, 256], strides = [1, 1]} : vector<6x256xf32> to vector<1x256xf32>
    %48 = vector.extract_strided_slice %46 {offsets = [1, 0], sizes = [1, 256], strides = [1, 1]} : vector<6x256xf32> to vector<1x256xf32>
    %49 = vector.extract_strided_slice %46 {offsets = [2, 0], sizes = [1, 256], strides = [1, 1]} : vector<6x256xf32> to vector<1x256xf32>
    %50 = vector.extract_strided_slice %46 {offsets = [3, 0], sizes = [1, 256], strides = [1, 1]} : vector<6x256xf32> to vector<1x256xf32>
    %51 = vector.extract_strided_slice %46 {offsets = [4, 0], sizes = [1, 256], strides = [1, 1]} : vector<6x256xf32> to vector<1x256xf32>
    %52 = vector.extract_strided_slice %46 {offsets = [5, 0], sizes = [1, 256], strides = [1, 1]} : vector<6x256xf32> to vector<1x256xf32>
    %cst_33 = arith.constant dense<0.000000e+00> : vector<16x256xf32>
    %53 = vector.multi_reduction <add>, %45, %cst_33 [0] : vector<8x16x256xf32> to vector<16x256xf32>
    %54 = vector.broadcast %47 : vector<1x256xf32> to vector<16x256xf32>
    %55 = arith.addf %53, %54 : vector<16x256xf32>
    %c0_34 = arith.constant 0 : index
    %c0_35 = arith.constant 0 : index
    %c0_36 = arith.constant 0 : index
    %56 = vector.load %arg4[%c0_34, %c0_35, %c0_36] : memref<2x8x256xf32, #tpu.memory_space<vmem>>, vector<2x8x256xf32>
    %57 = vector.shape_cast %56 : vector<2x8x256xf32> to vector<16x256xf32>
    %58 = arith.addf %55, %57 : vector<16x256xf32>
    %cst_37 = arith.constant dense<0.000000e+00> : vector<16xf32>
    %59 = vector.multi_reduction <add>, %58, %cst_37 [1] : vector<16x256xf32> to vector<16xf32>
    %60 = vector.shape_cast %59 : vector<16xf32> to vector<16x1xf32>
    %cst_38 = arith.constant 2.560000e+02 : f32
    %61 = vector.broadcast %cst_38 : f32 to vector<16x1xf32>
    %62 = arith.divf %60, %61 : vector<16x1xf32>
    %63 = vector.broadcast %62 : vector<16x1xf32> to vector<16x256xf32>
    %64 = arith.subf %58, %63 : vector<16x256xf32>
    %65 = vector.broadcast %62 : vector<16x1xf32> to vector<16x256xf32>
    %66 = arith.subf %58, %65 : vector<16x256xf32>
    %67 = arith.mulf %64, %66 : vector<16x256xf32>
    %cst_39 = arith.constant dense<0.000000e+00> : vector<16xf32>
    %68 = vector.multi_reduction <add>, %67, %cst_39 [1] : vector<16x256xf32> to vector<16xf32>
    %69 = vector.shape_cast %68 : vector<16xf32> to vector<16x1xf32>
    %cst_40 = arith.constant 2.560000e+02 : f32
    %70 = vector.broadcast %cst_40 : f32 to vector<16x1xf32>
    %71 = arith.divf %69, %70 : vector<16x1xf32>
    %72 = vector.broadcast %62 : vector<16x1xf32> to vector<16x256xf32>
    %73 = arith.subf %58, %72 : vector<16x256xf32>
    %cst_41 = arith.constant 9.99999974E-6 : f32
    %74 = vector.broadcast %cst_41 : f32 to vector<16x1xf32>
    %75 = arith.addf %71, %74 : vector<16x1xf32>
    %76 = math.rsqrt %75 : vector<16x1xf32>
    %77 = vector.broadcast %76 : vector<16x1xf32> to vector<16x256xf32>
    %78 = arith.mulf %73, %77 : vector<16x256xf32>
    %79 = vector.broadcast %48 : vector<1x256xf32> to vector<16x256xf32>
    %80 = arith.mulf %78, %79 : vector<16x256xf32>
    %81 = vector.broadcast %49 : vector<1x256xf32> to vector<16x256xf32>
    %82 = arith.addf %80, %81 : vector<16x256xf32>
    %c0_42 = arith.constant 0 : index
    %c0_43 = arith.constant 0 : index
    %83 = vector.load %arg10[%c0_42, %c0_43] : memref<256x1024xbf16, #tpu.memory_space<vmem>>, vector<256x1024xbf16>
    %84 = arith.truncf %82 : vector<16x256xf32> to vector<16x256xbf16>
    %cst_44 = arith.constant dense<0.000000e+00> : vector<16x1024xf32>
    %85 = tpu.matmul %84, %83, %cst_44 {dimension_numbers = #tpu.dot_dimension_numbers<[1], [0], [0], [1], [0, 0, 1, 1], [], []>} : vector<16x256xbf16>, vector<256x1024xbf16>, vector<16x1024xf32> -> vector<16x1024xf32>
    %c0_45 = arith.constant 0 : index
    %c0_46 = arith.constant 0 : index
    %86 = vector.load %arg13[%c0_45, %c0_46] : memref<1x1024xf32, #tpu.memory_space<vmem>>, vector<1x1024xf32>
    %87 = vector.broadcast %86 : vector<1x1024xf32> to vector<16x1024xf32>
    %88 = arith.addf %85, %87 : vector<16x1024xf32>
    %cst_47 = arith.constant 0.000000e+00 : f32
    %89 = vector.broadcast %cst_47 : f32 to vector<16x1024xf32>
    %90 = arith.maximumf %88, %89 : vector<16x1024xf32>
    %c0_48 = arith.constant 0 : index
    %c0_49 = arith.constant 0 : index
    %91 = vector.load %arg11[%c0_48, %c0_49] : memref<1024x256xbf16, #tpu.memory_space<vmem>>, vector<1024x256xbf16>
    %92 = arith.truncf %90 : vector<16x1024xf32> to vector<16x1024xbf16>
    %cst_50 = arith.constant dense<0.000000e+00> : vector<16x256xf32>
    %93 = tpu.matmul %92, %91, %cst_50 {dimension_numbers = #tpu.dot_dimension_numbers<[1], [0], [0], [1], [0, 0, 1, 1], [], []>} : vector<16x1024xbf16>, vector<1024x256xbf16>, vector<16x256xf32> -> vector<16x256xf32>
    %94 = vector.broadcast %50 : vector<1x256xf32> to vector<16x256xf32>
    %95 = arith.addf %93, %94 : vector<16x256xf32>
    %96 = arith.addf %95, %82 : vector<16x256xf32>
    %cst_51 = arith.constant dense<0.000000e+00> : vector<16xf32>
    %97 = vector.multi_reduction <add>, %96, %cst_51 [1] : vector<16x256xf32> to vector<16xf32>
    %98 = vector.shape_cast %97 : vector<16xf32> to vector<16x1xf32>
    %cst_52 = arith.constant 2.560000e+02 : f32
    %99 = vector.broadcast %cst_52 : f32 to vector<16x1xf32>
    %100 = arith.divf %98, %99 : vector<16x1xf32>
    %101 = vector.broadcast %100 : vector<16x1xf32> to vector<16x256xf32>
    %102 = arith.subf %96, %101 : vector<16x256xf32>
    %103 = vector.broadcast %100 : vector<16x1xf32> to vector<16x256xf32>
    %104 = arith.subf %96, %103 : vector<16x256xf32>
    %105 = arith.mulf %102, %104 : vector<16x256xf32>
    %cst_53 = arith.constant dense<0.000000e+00> : vector<16xf32>
    %106 = vector.multi_reduction <add>, %105, %cst_53 [1] : vector<16x256xf32> to vector<16xf32>
    %107 = vector.shape_cast %106 : vector<16xf32> to vector<16x1xf32>
    %cst_54 = arith.constant 2.560000e+02 : f32
    %108 = vector.broadcast %cst_54 : f32 to vector<16x1xf32>
    %109 = arith.divf %107, %108 : vector<16x1xf32>
    %110 = vector.broadcast %100 : vector<16x1xf32> to vector<16x256xf32>
    %111 = arith.subf %96, %110 : vector<16x256xf32>
    %cst_55 = arith.constant 9.99999974E-6 : f32
    %112 = vector.broadcast %cst_55 : f32 to vector<16x1xf32>
    %113 = arith.addf %109, %112 : vector<16x1xf32>
    %114 = math.rsqrt %113 : vector<16x1xf32>
    %115 = vector.broadcast %114 : vector<16x1xf32> to vector<16x256xf32>
    %116 = arith.mulf %111, %115 : vector<16x256xf32>
    %117 = vector.broadcast %51 : vector<1x256xf32> to vector<16x256xf32>
    %118 = arith.mulf %116, %117 : vector<16x256xf32>
    %119 = vector.broadcast %52 : vector<1x256xf32> to vector<16x256xf32>
    %120 = arith.addf %118, %119 : vector<16x256xf32>
    %121 = vector.shape_cast %120 : vector<16x256xf32> to vector<2x8x256xf32>
    %c0_56 = arith.constant 0 : index
    %c0_57 = arith.constant 0 : index
    %c0_58 = arith.constant 0 : index
    %122 = vector.load %arg14[%c0_56, %c0_57, %c0_58] : memref<2x8x256xf32, #tpu.memory_space<vmem>>, vector<2x8x256xf32>
    tpu.vector_store %arg14[%c0_56, %c0_57, %c0_58], %121 {strides = array<i32>} : memref<2x8x256xf32, #tpu.memory_space<vmem>>, vector<2x8x256xf32>,
    return
  }
  func.func @transform_0(%arg0: i32) -> (i32, i32, i32, i32) {
    %c0_i32 = arith.constant 0 : i32
    %c0_i32_0 = arith.constant 0 : i32
    %c0_i32_1 = arith.constant 0 : i32
    %c0_i32_2 = arith.constant 0 : i32
    return %c0_i32, %arg0, %c0_i32_0, %c0_i32_1 : i32, i32, i32, i32
  }
  func.func @transform_1(%arg0: i32) -> (i32, i32, i32, i32) {
    %c0_i32 = arith.constant 0 : i32
    %c0_i32_0 = arith.constant 0 : i32
    %c0_i32_1 = arith.constant 0 : i32
    %c0_i32_2 = arith.constant 0 : i32
    return %c0_i32, %arg0, %c0_i32_0, %c0_i32_1 : i32, i32, i32, i32
  }
  func.func @transform_2(%arg0: i32) -> (i32, i32, i32, i32) {
    %c0_i32 = arith.constant 0 : i32
    %c0_i32_0 = arith.constant 0 : i32
    %c0_i32_1 = arith.constant 0 : i32
    %c0_i32_2 = arith.constant 0 : i32
    return %c0_i32, %arg0, %c0_i32_0, %c0_i32_1 : i32, i32, i32, i32
  }
  func.func @transform_3(%arg0: i32) -> (i32, i32, i32) {
    %c0_i32 = arith.constant 0 : i32
    %c0_i32_0 = arith.constant 0 : i32
    %c0_i32_1 = arith.constant 0 : i32
    return %arg0, %c0_i32, %c0_i32_0 : i32, i32, i32
  }
  func.func @transform_4(%arg0: i32) -> (i32, i32, i32) {
    %c0_i32 = arith.constant 0 : i32
    %c0_i32_0 = arith.constant 0 : i32
    %c0_i32_1 = arith.constant 0 : i32
    return %arg0, %c0_i32, %c0_i32_0 : i32, i32, i32
  }
  func.func @transform_5(%arg0: i32) -> (i32, i32) {
    %c0_i32 = arith.constant 0 : i32
    %c0_i32_0 = arith.constant 0 : i32
    %c0_i32_1 = arith.constant 0 : i32
    return %c0_i32, %c0_i32_0 : i32, i32
  }
  func.func @transform_6(%arg0: i32) -> (i32, i32) {
    %c0_i32 = arith.constant 0 : i32
    %c0_i32_0 = arith.constant 0 : i32
    %c0_i32_1 = arith.constant 0 : i32
    return %c0_i32, %c0_i32_0 : i32, i32
  }
  func.func @transform_7(%arg0: i32) -> (i32, i32) {
    %c0_i32 = arith.constant 0 : i32
    %c0_i32_0 = arith.constant 0 : i32
    %c0_i32_1 = arith.constant 0 : i32
    return %c0_i32, %c0_i32_0 : i32, i32
  }
  func.func @transform_8(%arg0: i32) -> (i32, i32, i32) {
    %c0_i32 = arith.constant 0 : i32
    %c0_i32_0 = arith.constant 0 : i32
    %c0_i32_1 = arith.constant 0 : i32
    %c0_i32_2 = arith.constant 0 : i32
    return %c0_i32, %c0_i32_0, %c0_i32_1 : i32, i32, i32
  }
  func.func @transform_9(%arg0: i32) -> (i32, i32) {
    %c0_i32 = arith.constant 0 : i32
    %c0_i32_0 = arith.constant 0 : i32
    %c0_i32_1 = arith.constant 0 : i32
    return %c0_i32, %c0_i32_0 : i32, i32
  }
  func.func @transform_10(%arg0: i32) -> (i32, i32) {
    %c0_i32 = arith.constant 0 : i32
    %c0_i32_0 = arith.constant 0 : i32
    %c0_i32_1 = arith.constant 0 : i32
    return %c0_i32, %c0_i32_0 : i32, i32
  }
  func.func @transform_11(%arg0: i32) -> (i32, i32) {
    %c0_i32 = arith.constant 0 : i32
    %c0_i32_0 = arith.constant 0 : i32
    %c0_i32_1 = arith.constant 0 : i32
    return %c0_i32, %c0_i32_0 : i32, i32
  }
  func.func @transform_12(%arg0: i32) -> (i32, i32) {
    %c0_i32 = arith.constant 0 : i32
    %c0_i32_0 = arith.constant 0 : i32
    %c0_i32_1 = arith.constant 0 : i32
    return %c0_i32, %c0_i32_0 : i32, i32
  }
  func.func @transform_13(%arg0: i32) -> (i32, i32, i32) {
    %c0_i32 = arith.constant 0 : i32
    %c0_i32_0 = arith.constant 0 : i32
    %c0_i32_1 = arith.constant 0 : i32
    return %arg0, %c0_i32, %c0_i32_0 : i32, i32, i32
  }
}

</mosaic_0001>

<bundles_post_ra>
// kernel: transformer_block_forward.1
= control target key start
LH: loop header
LB: loop body
LE: loop exit
PB: predicated region body
PF: predicated region fallthrough
CT: control target
= control target key end

     0   :  { %18 = vsyncpa [#allocation3], 0  ;;  %s7344_s0 = inlined_call_operand.vmem [shape: f32[8,2,8,32], index: 0, kind: input, shape index: {}]   ;;  %s7345_s1 = inlined_call_operand.vmem [shape: f32[8,2,8,32], index: 1, kind: input, shape index: {}]   ;;  %s7346_s2 = inlined_call_operand.vmem [shape: f32[8,2,8,32], index: 2, kind: input, shape index: {}]   ;;  %s7347_s3 = inlined_call_operand.vmem [shape: f32[2,8,256], index: 3, kind: input, shape index: {}]   ;;  %s7348_s4 = inlined_call_operand.vmem [shape: f32[2,1,8], index: 4, kind: input, shape index: {}]   ;;  %s7349_s5 = inlined_call_operand.vmem [shape: bf16[32,32], index: 5, kind: input, shape index: {}]   ;;  %s7350_s6 = inlined_call_operand.vmem [shape: bf16[32,32], index: 6, kind: input, shape index: {}]   ;;  %s7351_s7 = inlined_call_operand.vmem [shape: bf16[32,32], index: 7, kind: input, shape index: {}]   ;;  %s7352_s8 = inlined_call_operand.hbm [shape: bf16[8,32,256], index: 8, kind: input, shape index: {}]   ;;  %s7353_s9 = inlined_call_operand.vmem [shape: bf16[256,1024], index: 9, kind: input, shape index: {}]   ;;  %s7354_s10 = inlined_call_operand.hbm [shape: bf16[1024,256], index: 10, kind: input, shape index: {}]   ;;  %s7355_s11 = inlined_call_operand.vmem [shape: f32[6,256], index: 11, kind: input, shape index: {}]   ;;  %s7356_s12 = inlined_call_operand.vmem [shape: f32[1,1024], index: 12, kind: input, shape index: {}]   ;;  %s7357_s13 = inlined_call_operand.hbm [shape: f32[2,8,256], index: 13, kind: output, shape index: {}]  }
   0x1   :  { %19 = vsyncpa [#allocation6], 0 }
   0x2   :  { %20 = vsyncpa [#allocation4], 0  ;;  %s6133_s25 = smov [#allocation2]  }
   0x3   :  { %s42_s26 = sshll.u32 %s6133_s25, 4  ;;  %s43_s26 = int_to_ptr.vmem [resolvable:$true] %s42_s26 }
   0x4   :  { %s6075_s27 = scalar_lea.vmem %s43_s26, 4096  ;;  %p6080_p1 = scmp.lt.s32.totalorder %s43_s26, %s43_s26 }
   0x5   :  { %p6076_p0 = scmp.ne.s32.totalorder %s43_s26, %s6075_s27  ;;  %p6081_p2 = scmp.lt.s32.totalorder %s6075_s27, %s6075_s27 }
   0x7   :  { %p6082_p3 = por %p6081_p2, %p6080_p1 }
   0x9   :  { %p6083_p4 = pnand %p6082_p3, %p6076_p0 }
   0xb   :  { %6086 = shalt.err (!%p6083_p4)
}
   0xc   :  { %s6134_s28 = smov 128   ;;  %s6135_s29 = smov 8  }
   0xd   :  { %48 = dma.hbm_to_vmem [thread:$0]  %s7352_s8, 4096, %s43_s26, [#allocation3], %s6134_s28, %s6134_s28, %s6135_s29  }
   0xe   :  { %s6136_s15 = smov [#allocation5]  }
   0xf   :  { %s56_s16 = sshll.u32 %s6136_s15, 4  ;;  %s57_s16 = int_to_ptr.vmem [resolvable:$true] %s56_s16 }
  0x10   :  { %s6095_s17 = scalar_lea.vmem %s57_s16, 16384  ;;  %p6100_p6 = scmp.lt.s32.totalorder %s57_s16, %s57_s16 }
  0x11   :  { %p6096_p5 = scmp.ne.s32.totalorder %s57_s16, %s6095_s17  ;;  %p6101_p7 = scmp.lt.s32.totalorder %s6095_s17, %s6095_s17 }
  0x13   :  { %p6102_p8 = por %p6101_p7, %p6100_p6 }
  0x15   :  { %p6103_p9 = pnand %p6102_p8, %p6096_p5 }
  0x17   :  { %6106 = shalt.err (!%p6103_p9)
}
  0x18   :  { %62 = dma.hbm_to_vmem [thread:$0]  %s7354_s10, 16384, %s57_s16, [#allocation6], %s6134_s28, %s6134_s28, %s6135_s29  }
  0x19   :  { %6127 = dma.done.wait [#allocation3], 4096  }
  0x1a   :  { %6128 = vsyncadd [#allocation3], 4294963200 }
  0x1b   :  { %6129 = dma.done.wait [#allocation6], 16384  }
  0x1c   :  { %6130 = vsyncadd [#allocation6], 4294950912  ;;  %v5747_v0 = vld [vmem:[%s7350_s6 + $0x8] sm:$0xff]   ;;  %v5748_v1 = vld [vmem:[%s7350_s6] sm:$0xff]   ;;  %vm114_vm0 = vcmask 261120   ;;  %vm6138_vm1 = vmmov 0  }
  0x1d   :  { %5505 = vmatprep.subr.bf16.mxu1 %v5747_v0  ;;  %v236_v2 = vld [vmem:[%s7345_s1] sm:$0xff]  ;;  %v237_v3 = vld [vmem:[%s7345_s1 + $0x8] sm:$0xff]  ;;  %v238_v6 = vld [vmem:[%s7345_s1 + $0x10] sm:$0xff]  ;;  %vm1536_vm2 = vcmask 1043456   ;;  %vm1356_vm3 = vcmask 64512  }
  0x1e   :  { %5506 = vmatpush3.bf16.msra.mxu1 %v5747_v0  ;;  %v256_v4 = vpack.c.bf16 %v237_v3, %v236_v2  ;;  %v5749_v5 = vld [vmem:[%s7349_s5 + $0x8] sm:$0xff]   ;;  %v239_v7 = vld [vmem:[%s7345_s1 + $0x18] sm:$0xff]  ;;  %v5750_v8 = vld [vmem:[%s7349_s5] sm:$0xff]  }
  0x1f   :  { %5507 = vmatprep.subr.bf16.mxu1 %v5748_v1  ;;  %5485 = vmatprep.subr.bf16.mxu0 %v5749_v5  ;;  %v74_v9 = vld [vmem:[%s7344_s0] sm:$0xff]  ;;  %v75_v10 = vld [vmem:[%s7344_s0 + $0x8] sm:$0xff]  ;;  %v257_v11 = vpack.c.bf16 %v239_v7, %v238_v6  ;;  %v76_v15 = vld [vmem:[%s7344_s0 + $0x10] sm:$0xff] }
  0x20   :  { %5509 = vmatprep.mubr.msk.bf16.mxu1 %vm114_vm0, %v256_v4  ;;  %5486 = vmatpush3.bf16.msra.mxu0 %v5749_v5  ;;  %v94_v12 = vpack.c.bf16 %v75_v10, %v74_v9  ;;  %v240_v13 = vld [vmem:[%s7345_s1 + $0x20] sm:$0xff]  ;;  %v241_v14 = vld [vmem:[%s7345_s1 + $0x28] sm:$0xff]  ;;  %v77_v17 = vld [vmem:[%s7344_s0 + $0x18] sm:$0xff] }
  0x21   :  { %5487 = vmatprep.subr.bf16.mxu0 %v5750_v8  ;;  %v258_v16 = vpack.c.bf16 %v241_v14, %v240_v13  ;;  %v78_v18 = vld [vmem:[%s7344_s0 + $0x20] sm:$0xff]  ;;  %v79_v19 = vld [vmem:[%s7344_s0 + $0x28] sm:$0xff]  ;;  %v95_v20 = vpack.c.bf16 %v77_v17, %v76_v15  ;;  %v242_v22 = vld [vmem:[%s7345_s1 + $0x30] sm:$0xff] }
  0x22   :  { %5508 = vmatpush3.bf16.msra.mxu1 %v5748_v1  ;;  %5489 = vmatprep.mubr.msk.bf16.mxu0 %vm114_vm0, %v94_v12  ;;  %v96_v21 = vpack.c.bf16 %v79_v19, %v78_v18  ;;  %v243_v23 = vld [vmem:[%s7345_s1 + $0x38] sm:$0xff]  ;;  %v244_v24 = vld [vmem:[%s7345_s1 + $0x40] sm:$0xff]  ;;  %v245_v25 = vld [vmem:[%s7345_s1 + $0x48] sm:$0xff] }
  0x23   :  { %v80_v26 = vld [vmem:[%s7344_s0 + $0x30] sm:$0xff]  ;;  %v81_v27 = vld [vmem:[%s7344_s0 + $0x38] sm:$0xff]  ;;  %v259_v28 = vpack.c.bf16 %v243_v23, %v242_v22  ;;  %v82_v29 = vld [vmem:[%s7344_s0 + $0x40] sm:$0xff]  ;;  %v260_v31 = vpack.c.bf16 %v245_v25, %v244_v24 }
  0x24   :  { %5488 = vmatpush3.bf16.msra.mxu0 %v5750_v8  ;;  %v83_v30 = vld [vmem:[%s7344_s0 + $0x48] sm:$0xff]  ;;  %v5752_v33 = vld [vmem:[%s7351_s7] sm:$0xff]   ;;  %v97_v34 = vpack.c.bf16 %v81_v27, %v80_v26  ;;  %v246_v35 = vld [vmem:[%s7345_s1 + $0x50] sm:$0xff]  ;;  %v6137_v8 = vmov 0.0  }
  0x25   :  { %5510 = vmatmul.mubr.msk.bf16.vlgmr.msra.gmra.mxu1 %vm114_vm0, %v257_v11  ;;  %v5751_v32 = vld [vmem:[%s7351_s7 + $0x8] sm:$0xff]   ;;  %v247_v36 = vld [vmem:[%s7345_s1 + $0x58] sm:$0xff]  ;;  %v98_v37 = vpack.c.bf16 %v83_v30, %v82_v29  ;;  %v248_v38 = vld [vmem:[%s7345_s1 + $0x60] sm:$0xff]  ;;  %5545 = vmatprep.subr.bf16.mxu1 %v6137_v8 }
  0x26   :  { %5513 = vmatprep.mubr.msk.bf16.mxu1 %vm114_vm0, %v258_v16  ;;  %5525 = vmatprep.subr.bf16.mxu0 %v5751_v32  ;;  %v249_v39 = vld [vmem:[%s7345_s1 + $0x68] sm:$0xff]  ;;  %v84_v40 = vld [vmem:[%s7344_s0 + $0x50] sm:$0xff]  ;;  %v85_v41 = vld [vmem:[%s7344_s0 + $0x58] sm:$0xff]  ;;  %v261_v44 = vpack.c.bf16 %v247_v36, %v246_v35 }
  0x27   :  { %5490 = vmatmul.mubr.msk.bf16.vlgmr.msra.gmra.mxu0 %vm114_vm0, %v95_v20  ;;  %v86_v42 = vld [vmem:[%s7344_s0 + $0x60] sm:$0xff]  ;;  %v87_v43 = vld [vmem:[%s7344_s0 + $0x68] sm:$0xff]  ;;  %v262_v45 = vpack.c.bf16 %v249_v39, %v248_v38  ;;  %v99_v46 = vpack.c.bf16 %v85_v41, %v84_v40  ;;  %v250_v47 = vld [vmem:[%s7345_s1 + $0x70] sm:$0xff] }
  0x28   :  { %5493 = vmatprep.mubr.msk.bf16.mxu0 %vm114_vm0, %v96_v21  ;;  %5526 = vmatpush3.bf16.msra.mxu0 %v5751_v32  ;;  %v251_v48 = vld [vmem:[%s7345_s1 + $0x78] sm:$0xff]  ;;  %v100_v49 = vpack.c.bf16 %v87_v43, %v86_v42  ;;  %v88_v50 = vld [vmem:[%s7344_s0 + $0x70] sm:$0xff]  ;;  %v397_v52 = vld [vmem:[%s7346_s2] sm:$0xff] }
  0x29   :  { %5527 = vmatprep.subr.bf16.mxu0 %v5752_v33  ;;  %v89_v51 = vld [vmem:[%s7344_s0 + $0x78] sm:$0xff]  ;;  %v398_v53 = vld [vmem:[%s7346_s2 + $0x8] sm:$0xff]  ;;  %v263_v54 = vpack.c.bf16 %v251_v48, %v250_v47  ;;  %v399_v57 = vld [vmem:[%s7346_s2 + $0x10] sm:$0xff] }
  0x2a   :  { %v101_v55 = vpack.c.bf16 %v89_v51, %v88_v50  ;;  %v417_v56 = vpack.c.bf16 %v398_v53, %v397_v52  ;;  %v400_v58 = vld [vmem:[%s7346_s2 + $0x18] sm:$0xff]  ;;  %v401_v59 = vld [vmem:[%s7346_s2 + $0x20] sm:$0xff]  ;;  %v402_v60 = vld [vmem:[%s7346_s2 + $0x28] sm:$0xff] }
  0x2b   :  { %v418_v61 = vpack.c.bf16 %v400_v58, %v399_v57  ;;  %v419_v62 = vpack.c.bf16 %v402_v60, %v401_v59  ;;  %v403_v63 = vld [vmem:[%s7346_s2 + $0x30] sm:$0xff]  ;;  %v404_v0 = vld [vmem:[%s7346_s2 + $0x38] sm:$0xff]  ;;  %v405_v2 = vld [vmem:[%s7346_s2 + $0x40] sm:$0xff] }
  0x2c   :  { %5528 = vmatpush3.bf16.msra.mxu0 %v5752_v33  ;;  %v420_v1 = vpack.c.bf16 %v404_v0, %v403_v63  ;;  %v406_v3 = vld [vmem:[%s7346_s2 + $0x48] sm:$0xff]  ;;  %v407_v5 = vld [vmem:[%s7346_s2 + $0x50] sm:$0xff]  ;;  %v408_v6 = vld [vmem:[%s7346_s2 + $0x58] sm:$0xff] }
  0x2d   :  { %5514 = vmatmul.mubr.msk.bf16.gmra.mxu1 %vm114_vm0, %v259_v28  ;;  %v421_v4 = vpack.c.bf16 %v406_v3, %v405_v2  ;;  %v422_v7 = vpack.c.bf16 %v408_v6, %v407_v5  ;;  %5569 = vmatprep.subr.bf16.mxu0 %v6137_v8  ;;  %v409_v9 = vld [vmem:[%s7346_s2 + $0x60] sm:$0xff]  ;;  %v410_v10 = vld [vmem:[%s7346_s2 + $0x68] sm:$0xff]  ;;  %v411_v12 = vld [vmem:[%s7346_s2 + $0x70] sm:$0xff] }
  0x2e   :  { %5517 = vmatprep.mubr.msk.bf16.mxu1 %vm114_vm0, %v260_v31  ;;  %v423_v11 = vpack.c.bf16 %v410_v10, %v409_v9  ;;  %v412_v13 = vld [vmem:[%s7346_s2 + $0x78] sm:$0xff] }
  0x2f   :  { %5494 = vmatmul.mubr.msk.bf16.gmra.mxu0 %vm114_vm0, %v97_v34  ;;  %v424_v14 = vpack.c.bf16 %v412_v13, %v411_v12 }
  0x30   :  { %5497 = vmatprep.mubr.msk.bf16.mxu0 %vm114_vm0, %v98_v37 }
  0x35   :  { %5518 = vmatmul.mubr.msk.bf16.gmra.mxu1 %vm114_vm0, %v261_v44 }
  0x36   :  { %5521 = vmatprep.mubr.msk.bf16.mxu1 %vm114_vm0, %v262_v45 }
  0x37   :  { %5498 = vmatmul.mubr.msk.bf16.gmra.mxu0 %vm114_vm0, %v99_v46 }
  0x38   :  { %5501 = vmatprep.mubr.msk.bf16.mxu0 %vm114_vm0, %v100_v49 }
  0x3d   :  { %5522 = vmatmul.mubr.msk.bf16.gmra.mxu1 %vm114_vm0, %v263_v54 }
  0x3e   :  { %5547 = vmatprep.mubr.msk.bf16.mxu1 %vm6138_vm1, %v6137_v8 }
  0x3f   :  { %5502 = vmatmul.mubr.msk.bf16.gmra.mxu0 %vm114_vm0, %v101_v55 }
  0x40   :  { %5529 = vmatprep.mubr.msk.bf16.mxu0 %vm114_vm0, %v417_v56 }
  0x47   :  { %5530 = vmatmul.mubr.msk.bf16.vlgmr.msra.gmra.mxu0 %vm114_vm0, %v418_v61 }
  0x48   :  { %5533 = vmatprep.mubr.msk.bf16.mxu0 %vm114_vm0, %v419_v62 }
  0x4f   :  { %5534 = vmatmul.mubr.msk.bf16.gmra.mxu0 %vm114_vm0, %v420_v1 }
  0x50   :  { %5537 = vmatprep.mubr.msk.bf16.mxu0 %vm114_vm0, %v421_v4 }
  0x57   :  { %5538 = vmatmul.mubr.msk.bf16.gmra.mxu0 %vm114_vm0, %v422_v7 }
  0x58   :  { %5541 = vmatprep.mubr.msk.bf16.mxu0 %vm114_vm0, %v423_v11 }
  0x5f   :  { %5542 = vmatmul.mubr.msk.bf16.gmra.mxu0 %vm114_vm0, %v424_v14 }
  0x60   :  { %5571 = vmatprep.mubr.msk.bf16.mxu0 %vm6138_vm1, %v6137_v8 }
  0xe5   :  { %v5511_v15 = vpop.f32.mrf.mxu1 }
  0xe6   :  { %v576_v39 = vpack.c.bf16 %v5511_v15, %v5511_v15 }
  0xe7   :  { %v334_v16 = vpop.f32.mrf.mxu1  ;;  %v5491_v18 = vpop.f32.mrf.mxu0 }
  0xe8   :  { %v574_v17 = vpack.c.bf16 %v334_v16, %v334_v16  ;;  %v686_v46 = vsel %vm114_vm0, %v576_v39, 0  ;;  %v560_v54 = vpack.c.bf16 %v5491_v18, %v5491_v18 }
  0xe9   :  { %v5512_v19 = vpop.f32.mrf.mxu1  ;;  %v173_v21 = vpop.f32.mrf.mxu0 }
  0xea   :  { %v594_v20 = vsel %vm114_vm0, %v574_v17, 0  ;;  %v558_v28 = vpack.c.bf16 %v173_v21, %v173_v21  ;;  %v577_v51 = vpack.c.bf16 %v5512_v19, %v5512_v19 }
  0xeb   :  { %v337_v22 = vpop.f32.mrf.mxu1  ;;  %5546 = vmatpush3.bf16.xpose.msra.mxu1 %v594_v20  ;;  %v6412_v23 = vpop.f32.mrf.mxu0 }
  0xec   :  { %5551 = vmatprep.subr.bf16.mxu1 %v6137_v8  ;;  %v575_v25 = vpack.c.bf16 %v337_v22, %v337_v22  ;;  %v732_v58 = vsel %vm114_vm0, %v577_v51, 0  ;;  %v561_v2 = vpack.c.bf16 %v6412_v23, %v6412_v23 }
  0xed   :  { %v5515_v24 = vpop.f32.mrf.mxu1  ;;  %v176_v26 = vpop.f32.mrf.mxu0 }
  0xee   :  { %v640_v33 = vsel %vm114_vm0, %v575_v25, 0  ;;  %v580_v36 = vpack.c.bf16 %v5515_v24, %v5515_v24  ;;  %v559_v43 = vpack.c.bf16 %v176_v26, %v176_v26 }
  0xef   :  { %v350_v27 = vpop.f32.mrf.mxu1  ;;  %v5495_v30 = vpop.f32.mrf.mxu0 }
  0xf0   :  { %v578_v29 = vpack.c.bf16 %v350_v27, %v350_v27  ;;  %v870_v42 = vsel %vm114_vm0, %v580_v36, 0  ;;  %v564_v52 = vpack.c.bf16 %v5495_v30, %v5495_v30 }
  0xf1   :  { %v6415_v31 = vpop.f32.mrf.mxu1  ;;  %v189_v34 = vpop.f32.mrf.mxu0 }
  0xf2   :  { %v778_v32 = vsel %vm114_vm0, %v578_v29, 0  ;;  %5548 = vmatmul.mubr.msk.bf16.vlgmr.msra.gmra.mxu1 %vm114_vm0, %v558_v28  ;;  %v562_v40 = vpack.c.bf16 %v189_v34, %v189_v34  ;;  %v581_v14 = vpack.c.bf16 %v6415_v31, %v6415_v31 }
  0xf3   :  { %5552 = vmatpush3.bf16.xpose.msra.mxu1 %v640_v33  ;;  %5570 = vmatpush3.bf16.xpose.msra.mxu0 %v778_v32  ;;  %v353_v35 = vpop.f32.mrf.mxu1  ;;  %v6423_v37 = vpop.f32.mrf.mxu0 }
  0xf4   :  { %5553 = vmatprep.mubr.msk.bf16.mxu1 %vm6138_vm1, %v6137_v8  ;;  %5557 = vmatprep.subr.bf16.mxu1 %v6137_v8  ;;  %v579_v63 = vpack.c.bf16 %v353_v35, %v353_v35  ;;  %v916_v22 = vsel %vm114_vm0, %v581_v14, 0  ;;  %v565_v35 = vpack.c.bf16 %v6423_v37, %v6423_v37 }
  0xf5   :  { %5581 = vmatprep.subr.bf16.mxu0 %v6137_v8  ;;  %v5519_v38 = vpop.f32.mrf.mxu1  ;;  %v6426_v41 = vpop.f32.mrf.mxu0 }
  0xf6   :  { %v584_v60 = vpack.c.bf16 %v5519_v38, %v5519_v38  ;;  %v824_v7 = vsel %vm114_vm0, %v579_v63, 0  ;;  %v563_v18 = vpack.c.bf16 %v6426_v41, %v6426_v41 }
  0xf7   :  { %v6429_v44 = vpop.f32.mrf.mxu0  ;;  %v366_v45 = vpop.f32.mrf.mxu1 }
  0xf8   :  { %v582_v48 = vpack.c.bf16 %v366_v45, %v366_v45  ;;  %v1054_v3 = vsel %vm114_vm0, %v584_v60, 0  ;;  %v568_v15 = vpack.c.bf16 %v6429_v44, %v6429_v44 }
  0xf9   :  { %v205_v47 = vpop.f32.mrf.mxu0  ;;  %v6442_v50 = vpop.f32.mrf.mxu1 }
  0xfa   :  { %5554 = vmatmul.mubr.msk.bf16.vlgmr.msra.gmra.mxu1 %vm114_vm0, %v559_v43  ;;  %5572 = vmatmul.mubr.msk.bf16.vlgmr.msra.gmra.mxu0 %vm114_vm0, %v562_v40  ;;  %v962_v55 = vsel %vm114_vm0, %v582_v48, 0  ;;  %v566_v0 = vpack.c.bf16 %v205_v47, %v205_v47  ;;  %v585_v40 = vpack.c.bf16 %v6442_v50, %v6442_v50 }
  0xfb   :  { %5558 = vmatpush3.bf16.xpose.msra.mxu1 %v686_v46  ;;  %5582 = vmatpush3.bf16.xpose.msra.mxu0 %v870_v42  ;;  %v6438_v49 = vpop.f32.mrf.mxu0  ;;  %v6449_v57 = vpop.f32.mrf.mxu1 }
  0xfc   :  { %5559 = vmatprep.mubr.msk.bf16.mxu1 %vm6138_vm1, %v6137_v8  ;;  %5583 = vmatprep.mubr.msk.bf16.mxu0 %vm6138_vm1, %v6137_v8  ;;  %v583_v30 = vpack.c.bf16 %v6449_v57, %v6449_v57  ;;  %v1100_v45 = vsel %vm114_vm0, %v585_v40, 0  ;;  %v569_v48 = vpack.c.bf16 %v6438_v49, %v6438_v49 }
  0xfd   :  { %5563 = vmatprep.subr.bf16.mxu1 %v6137_v8  ;;  %5593 = vmatprep.subr.bf16.mxu0 %v6137_v8  ;;  %v6444_v53 = vpop.f32.mrf.mxu0  ;;  %v5523_v62 = vpop.f32.mrf.mxu1 }
  0xfe   :  { %v588_v26 = vpack.c.bf16 %v5523_v62, %v5523_v62  ;;  %v1008_v39 = vsel %vm114_vm0, %v583_v30, 0  ;;  %v567_v43 = vpack.c.bf16 %v6444_v53, %v6444_v53 }
  0xff   :  { %v6447_v56 = vpop.f32.mrf.mxu0  ;;  %v382_v5 = vpop.f32.mrf.mxu1 }
 0x100   :  { %v586_v11 = vpack.c.bf16 %v382_v5, %v382_v5  ;;  %v1238_v36 = vsel %vm114_vm0, %v588_v26, 0  ;;  %v572_v41 = vpack.c.bf16 %v6447_v56, %v6447_v56 }
 0x101   :  { %v6454_v59 = vpop.f32.mrf.mxu0  ;;  %v5524_v42 = vpop.f32.mrf.mxu1 }
 0x102   :  { %5560 = vmatmul.mubr.msk.bf16.vlgmr.msra.gmra.mxu1 %vm114_vm0, %v560_v54  ;;  %5584 = vmatmul.mubr.msk.bf16.vlgmr.msra.gmra.mxu0 %vm114_vm0, %v564_v52  ;;  %v1146_v19 = vsel %vm114_vm0, %v586_v11, 0  ;;  %v570_v31 = vpack.c.bf16 %v6454_v59, %v6454_v59  ;;  %v589_v54 = vpack.c.bf16 %v5524_v42, %v5524_v42 }
 0x103   :  { %5564 = vmatpush3.bf16.xpose.msra.mxu1 %v732_v58  ;;  %5594 = vmatpush3.bf16.xpose.msra.mxu0 %v962_v55  ;;  %v6460_v61 = vpop.f32.mrf.mxu0  ;;  %v385_v46 = vpop.f32.mrf.mxu1 }
 0x104   :  { %5565 = vmatprep.mubr.msk.bf16.mxu1 %vm6138_vm1, %v6137_v8  ;;  %5595 = vmatprep.mubr.msk.bf16.mxu0 %vm6138_vm1, %v6137_v8  ;;  %v587_v47 = vpack.c.bf16 %v385_v46, %v385_v46  ;;  %v1284_v62 = vsel %vm114_vm0, %v589_v54, 0  ;;  %v573_v11 = vpack.c.bf16 %v6460_v61, %v6460_v61  ;;  %v6593_v61 = vld [vmem:[%s7348_s4] ss:$0 sm:$0xff] }
 0x105   :  { %5575 = vmatprep.subr.bf16.mxu1 %v6137_v8  ;;  %5605 = vmatprep.subr.bf16.mxu0 %v6137_v8  ;;  %v6464_v1 = vpop.f32.mrf.mxu0 }
 0x106   :  { %v1192_v50 = vsel %vm114_vm0, %v587_v47, 0  ;;  %v571_v49 = vpack.c.bf16 %v6464_v1, %v6464_v1 }
 0x107   :  { %v5531_v4 = vpop.f32.mrf.mxu0 }
 0x108   :  { %v1519_v6 = vpack.c.bf16 %v5531_v4, %v5531_v4 }
 0x109   :  { %v495_v9 = vpop.f32.mrf.mxu0 }
 0x10a   :  { %5566 = vmatmul.mubr.msk.bf16.vlgmr.msra.gmra.mxu1 %vm114_vm0, %v561_v2  ;;  %5596 = vmatmul.mubr.msk.bf16.vlgmr.msra.gmra.mxu0 %vm114_vm0, %v566_v0  ;;  %v6473_v10 = vsel %vm1536_vm2, %v1519_v6, 0  ;;  %v1517_v37 = vpack.c.bf16 %v495_v9, %v495_v9 }
 0x10b   :  { %5576 = vmatpush3.bf16.xpose.msra.mxu1 %v824_v7  ;;  %5606 = vmatpush3.bf16.xpose.msra.mxu0 %v1054_v3  ;;  %v5532_v12 = vpop.f32.mrf.mxu0 }
 0x10c   :  { %5577 = vmatprep.mubr.msk.bf16.mxu1 %vm6138_vm1, %v6137_v8  ;;  %5607 = vmatprep.mubr.msk.bf16.mxu0 %vm6138_vm1, %v6137_v8  ;;  %v1520_v13 = vpack.c.bf16 %v5532_v12, %v5532_v12  ;;  %v1538_v44 = vsel %vm1536_vm2, %v1517_v37, 0 }
 0x10d   :  { %5587 = vmatprep.subr.bf16.mxu1 %v6137_v8  ;;  %5617 = vmatprep.subr.bf16.mxu0 %v6137_v8  ;;  %v6485_v16 = vpop.f32.mrf.mxu0 }
 0x10e   :  { %v6488_v17 = vsel %vm1536_vm2, %v1520_v13, 0  ;;  %v1518_v1 = vpack.c.bf16 %v6485_v16, %v6485_v16 }
 0x10f   :  { %v5535_v20 = vpop.f32.mrf.mxu0 }
 0x110   :  { %v1523_v21 = vpack.c.bf16 %v5535_v20, %v5535_v20  ;;  %v1584_v12 = vsel %vm1536_vm2, %v1518_v1, 0 }
 0x111   :  { %v511_v23 = vpop.f32.mrf.mxu0 }
 0x112   :  { %5578 = vmatmul.mubr.msk.bf16.vlgmr.msra.gmra.mxu1 %vm114_vm0, %v563_v18  ;;  %5608 = vmatmul.mubr.msk.bf16.vlgmr.msra.gmra.mxu0 %vm114_vm0, %v568_v15  ;;  %v6497_v24 = vsel %vm1536_vm2, %v1523_v21, 0  ;;  %v1521_v25 = vpack.c.bf16 %v511_v23, %v511_v23 }
 0x113   :  { %5588 = vmatpush3.bf16.xpose.msra.mxu1 %v916_v22  ;;  %5618 = vmatpush3.bf16.xpose.msra.mxu0 %v1146_v19  ;;  %v5536_v27 = vpop.f32.mrf.mxu0 }
 0x114   :  { %5589 = vmatprep.mubr.msk.bf16.mxu1 %vm6138_vm1, %v6137_v8  ;;  %5619 = vmatprep.mubr.msk.bf16.mxu0 %vm6138_vm1, %v6137_v8  ;;  %v6506_v28 = vsel %vm1536_vm2, %v1521_v25, 0  ;;  %v1524_v29 = vpack.c.bf16 %v5536_v27, %v5536_v27  ;;  %v6605_v25 = vld [vmem:[%s7348_s4 + $0x1] ss:$0 sm:$0xff] }
 0x115   :  { %5599 = vmatprep.subr.bf16.mxu1 %v6137_v8  ;;  %5629 = vmatprep.subr.bf16.mxu0 %v6137_v8  ;;  %v514_v32 = vpop.f32.mrf.mxu0 }
 0x116   :  { %v6513_v33 = vsel %vm1536_vm2, %v1524_v29, 0  ;;  %v1522_v34 = vpack.c.bf16 %v514_v32, %v514_v32 }
 0x117   :  { %v5539_v51 = vpop.f32.mrf.mxu0 }
 0x118   :  { %v6519_v38 = vsel %vm1536_vm2, %v1522_v34, 0  ;;  %v1527_v52 = vpack.c.bf16 %v5539_v51, %v5539_v51 }
 0x119   :  { %v527_v53 = vpop.f32.mrf.mxu0 }
 0x11a   :  { %5590 = vmatmul.mubr.msk.bf16.vlgmr.msra.gmra.mxu1 %vm114_vm0, %v565_v35  ;;  %5620 = vmatmul.mubr.msk.bf16.vlgmr.msra.gmra.mxu0 %vm114_vm0, %v570_v31  ;;  %v6554_v55 = vsel %vm1536_vm2, %v1527_v52, 0  ;;  %v1525_v56 = vpack.c.bf16 %v527_v53, %v527_v53 }
 0x11b   :  { %5600 = vmatpush3.bf16.xpose.msra.mxu1 %v1008_v39  ;;  %5630 = vmatpush3.bf16.xpose.msra.mxu0 %v1238_v36  ;;  %v5540_v57 = vpop.f32.mrf.mxu0 }
 0x11c   :  { %5601 = vmatprep.mubr.msk.bf16.mxu1 %vm6138_vm1, %v6137_v8  ;;  %5631 = vmatprep.mubr.msk.bf16.mxu0 %vm6138_vm1, %v6137_v8  ;;  %v6559_v58 = vsel %vm1536_vm2, %v1525_v56, 0  ;;  %v1528_v59 = vpack.c.bf16 %v5540_v57, %v5540_v57 }
 0x11d   :  { %5611 = vmatprep.subr.bf16.mxu1 %v6137_v8  ;;  %5641 = vmatprep.subr.bf16.mxu0 %v6137_v8  ;;  %v530_v60 = vpop.f32.mrf.mxu0 }
 0x11e   :  { %v6564_v63 = vsel %vm1536_vm2, %v1528_v59, 0  ;;  %v1526_v0 = vpack.c.bf16 %v530_v60, %v530_v60 }
 0x11f   :  { %v5543_v2 = vpop.f32.mrf.mxu0 }
 0x120   :  { %v6571_v3 = vsel %vm1536_vm2, %v1526_v0, 0  ;;  %v1531_v4 = vpack.c.bf16 %v5543_v2, %v5543_v2 }
 0x121   :  { %v543_v5 = vpop.f32.mrf.mxu0 }
 0x122   :  { %5602 = vmatmul.mubr.msk.bf16.vlgmr.msra.gmra.mxu1 %vm114_vm0, %v567_v43  ;;  %5632 = vmatmul.mubr.msk.bf16.vlgmr.msra.gmra.mxu0 %vm114_vm0, %v572_v41  ;;  %v6575_v6 = vsel %vm1536_vm2, %v1531_v4, 0  ;;  %v1529_v7 = vpack.c.bf16 %v543_v5, %v543_v5 }
 0x123   :  { %5612 = vmatpush3.bf16.xpose.msra.mxu1 %v1100_v45  ;;  %5613 = vmatprep.mubr.msk.bf16.mxu1 %vm6138_vm1, %v6137_v8  ;;  %v5544_v9 = vpop.f32.mrf.mxu0 }
 0x124   :  { %5623 = vmatprep.subr.bf16.mxu1 %v6137_v8  ;;  %5642 = vmatpush3.bf16.msra.mxu0 %v1538_v44  ;;  %v6581_v13 = vsel %vm1536_vm2, %v1529_v7, 0  ;;  %v1532_v14 = vpack.c.bf16 %v5544_v9, %v5544_v9 }
 0x125   :  { %5643 = vmatprep.mubr.msk.bf16.mxu0 %vm6138_vm1, %v6137_v8  ;;  %5653 = vmatprep.subr.bf16.mxu0 %v6137_v8  ;;  %v6600_v22 = vpop.f32.mrf.mxu0 }
 0x126   :  { %v6585_v15 = vsel %vm1536_vm2, %v1532_v14, 0 }
 0x12a   :  { %5614 = vmatmul.mubr.msk.bf16.vlgmr.msra.gmra.mxu1 %vm114_vm0, %v569_v48 }
 0x12b   :  { %5624 = vmatpush3.bf16.xpose.msra.mxu1 %v1192_v50  ;;  %5625 = vmatprep.mubr.msk.bf16.mxu1 %vm6138_vm1, %v6137_v8 }
 0x12c   :  { %5635 = vmatprep.subr.bf16.mxu1 %v6137_v8 }
 0x132   :  { %5626 = vmatmul.mubr.msk.bf16.vlgmr.msra.gmra.mxu1 %vm114_vm0, %v571_v49 }
 0x133   :  { %5636 = vmatpush3.bf16.xpose.msra.mxu1 %v1284_v62  ;;  %5637 = vmatprep.mubr.msk.bf16.mxu1 %vm6138_vm1, %v6137_v8 }
 0x134   :  { %5647 = vmatprep.subr.bf16.mxu1 %v6137_v8 }
 0x13a   :  { %5638 = vmatmul.mubr.msk.bf16.vlgmr.msra.gmra.mxu1 %vm114_vm0, %v573_v11 }
 0x13b   :  { %5648 = vmatpush3.bf16.msra.mxu1 %v1584_v12  ;;  %5649 = vmatprep.mubr.msk.bf16.mxu1 %vm6138_vm1, %v6137_v8 }
 0x13c   :  { %5659 = vmatprep.subr.bf16.mxu1 %v6137_v8 }
 0x1b2   :  { %v630_v16 = vpop.f32.mrf.mxu1 }
 0x1b3   :  { %v6596_v18 = vadd.f32 %v6593_v61, %v630_v16 }
 0x1b4   :  { %v5549_v19 = vpop.f32.mrf.mxu1 }
 0x1b5   :  { %v1357_v20 = vsel %vm1356_vm3, %v6596_v18, -inf }
 0x1b6   :  { %1358 = vmax.xlane.f32.xlu0 %v1357_v20  ;;  %v633_v21 = vpop.f32.mrf.mxu1 }
 0x1b8   :  { %v5550_v23 = vpop.f32.mrf.mxu1 }
 0x1ba   :  { %v676_v26 = vpop.f32.mrf.mxu1  ;;  %v814_v27 = vpop.f32.mrf.mxu0 }
 0x1bb   :  { %v6608_v29 = vadd.f32 %v6605_v25, %v676_v26  ;;  %v6611_v30 = vadd.f32 %v6593_v61, %v814_v27 }
 0x1bc   :  { %v5555_v31 = vpop.f32.mrf.mxu1  ;;  %v5573_v32 = vpop.f32.mrf.mxu0 }
 0x1bd   :  { %v1360_v34 = vsel %vm1356_vm3, %v6608_v29, -inf  ;;  %v1369_v39 = vsel %vm1356_vm3, %v6611_v30, -inf }
 0x1be   :  { %1361 = vmax.xlane.f32.xlu0 %v1360_v34  ;;  %v679_v35 = vpop.f32.mrf.mxu1  ;;  %v817_v36 = vpop.f32.mrf.mxu0 }
 0x1c0   :  { %v5556_v37 = vpop.f32.mrf.mxu1  ;;  %v5574_v40 = vpop.f32.mrf.mxu0 }
 0x1c2   :  { %v722_v41 = vpop.f32.mrf.mxu1  ;;  %1370 = vmax.xlane.f32.xlu0 %v1369_v39  ;;  %v906_v42 = vpop.f32.mrf.mxu0 }
 0x1c3   :  { %v6618_v43 = vadd.f32 %v6593_v61, %v722_v41  ;;  %v6621_v44 = vadd.f32 %v6593_v61, %v906_v42 }
 0x1c4   :  { %v5561_v45 = vpop.f32.mrf.mxu1  ;;  %v5585_v46 = vpop.f32.mrf.mxu0 }
 0x1c5   :  { %v1363_v47 = vsel %vm1356_vm3, %v6618_v43, -inf  ;;  %v1375_v48 = vsel %vm1356_vm3, %v6621_v44, -inf }
 0x1c6   :  { %1364 = vmax.xlane.f32.xlu1 %v1363_v47  ;;  %v725_v50 = vpop.f32.mrf.mxu1  ;;  %1376 = vmax.xlane.f32.xlu0 %v1375_v48  ;;  %v909_v51 = vpop.f32.mrf.mxu0 }
 0x1c8   :  { %v5562_v52 = vpop.f32.mrf.mxu1  ;;  %v5586_v53 = vpop.f32.mrf.mxu0 }
 0x1ca   :  { %v768_v54 = vpop.f32.mrf.mxu1  ;;  %v998_v56 = vpop.f32.mrf.mxu0 }
 0x1cb   :  { %v6628_v57 = vadd.f32 %v6605_v25, %v768_v54  ;;  %v6631_v49 = vadd.f32 %v6593_v61, %v998_v56 }
 0x1cc   :  { %v5567_v59 = vpop.f32.mrf.mxu1  ;;  %v5597_v60 = vpop.f32.mrf.mxu0 }
 0x1cd   :  { %v1366_v62 = vsel %vm1356_vm3, %v6628_v57, -inf  ;;  %v1381_v0 = vsel %vm1356_vm3, %v6631_v49, -inf }
 0x1ce   :  { %1367 = vmax.xlane.f32.xlu1 %v1366_v62  ;;  %v771_v2 = vpop.f32.mrf.mxu1  ;;  %1382 = vmax.xlane.f32.xlu0 %v1381_v0  ;;  %v1001_v1 = vpop.f32.mrf.mxu0 }
 0x1d0   :  { %v5568_v4 = vpop.f32.mrf.mxu1  ;;  %v5598_v5 = vpop.f32.mrf.mxu0 }
 0x1d2   :  { %v860_v7 = vpop.f32.mrf.mxu1  ;;  %v1090_v9 = vpop.f32.mrf.mxu0 }
 0x1d3   :  { %v6638_v11 = vadd.f32 %v6605_v25, %v860_v7  ;;  %v6641_v12 = vadd.f32 %v6593_v61, %v1090_v9 }
 0x1d4   :  { %v5579_v14 = vpop.f32.mrf.mxu1  ;;  %v5609_v16 = vpop.f32.mrf.mxu0 }
 0x1d5   :  { %v1372_v19 = vsel %vm1356_vm3, %v6638_v11, -inf  ;;  %v1387_v20 = vsel %vm1356_vm3, %v6641_v12, -inf }
 0x1d6   :  { %1373 = vmax.xlane.f32.xlu1 %v1372_v19  ;;  %v863_v21 = vpop.f32.mrf.mxu1  ;;  %1388 = vmax.xlane.f32.xlu0 %v1387_v20  ;;  %v1093_v23 = vpop.f32.mrf.mxu0 }
 0x1d8   :  { %v5580_v26 = vpop.f32.mrf.mxu1  ;;  %v5610_v27 = vpop.f32.mrf.mxu0 }
 0x1da   :  { %v952_v31 = vpop.f32.mrf.mxu1  ;;  %v1182_v32 = vpop.f32.mrf.mxu0 }
 0x1db   :  { %v6648_v34 = vadd.f32 %v6605_v25, %v952_v31  ;;  %v6651_v35 = vadd.f32 %v6593_v61, %v1182_v32 }
 0x1dc   :  { %v5591_v36 = vpop.f32.mrf.mxu1  ;;  %v5621_v39 = vpop.f32.mrf.mxu0 }
 0x1dd   :  { %v1378_v37 = vsel %vm1356_vm3, %v6648_v34, -inf  ;;  %v1393_v40 = vsel %vm1356_vm3, %v6651_v35, -inf }
 0x1de   :  { %1379 = vmax.xlane.f32.xlu1 %v1378_v37  ;;  %v955_v41 = vpop.f32.mrf.mxu1  ;;  %1394 = vmax.xlane.f32.xlu0 %v1393_v40  ;;  %v1185_v42 = vpop.f32.mrf.mxu0 }
 0x1e0   :  { %v5592_v45 = vpop.f32.mrf.mxu1  ;;  %v5622_v46 = vpop.f32.mrf.mxu0 }
 0x1e2   :  { %v1044_v47 = vpop.f32.mrf.mxu1  ;;  %v1274_v48 = vpop.f32.mrf.mxu0 }
 0x1e3   :  { %v6658_v50 = vadd.f32 %v6605_v25, %v1044_v47  ;;  %v6661_v51 = vadd.f32 %v6593_v61, %v1274_v48 }
 0x1e4   :  { %v5603_v52 = vpop.f32.mrf.mxu1  ;;  %v5633_v53 = vpop.f32.mrf.mxu0 }
 0x1e5   :  { %v1384_v54 = vsel %vm1356_vm3, %v6658_v50, -inf  ;;  %v1399_v56 = vsel %vm1356_vm3, %v6661_v51, -inf }
 0x1e6   :  { %1385 = vmax.xlane.f32.xlu1 %v1384_v54  ;;  %v1047_v59 = vpop.f32.mrf.mxu1  ;;  %1400 = vmax.xlane.f32.xlu0 %v1399_v56  ;;  %v1277_v60 = vpop.f32.mrf.mxu0 }
 0x1e8   :  { %v5604_v62 = vpop.f32.mrf.mxu1  ;;  %v5634_v0 = vpop.f32.mrf.mxu0 }
 0x1ea   :  { %v1136_v2 = vpop.f32.mrf.mxu1 }
 0x1eb   :  { %v6668_v1 = vadd.f32 %v6605_v25, %v1136_v2 }
 0x1ec   :  { %v5615_v61 = vpop.f32.mrf.mxu1 }
 0x1ed   :  { %v1390_v4 = vsel %vm1356_vm3, %v6668_v1, -inf }
 0x1ee   :  { %1391 = vmax.xlane.f32.xlu1 %v1390_v4  ;;  %v1139_v5 = vpop.f32.mrf.mxu1 }
 0x1f0   :  { %v5616_v7 = vpop.f32.mrf.mxu1 }
 0x1f2   :  { %v1228_v9 = vpop.f32.mrf.mxu1 }
 0x1f3   :  { %v6673_v14 = vadd.f32 %v6605_v25, %v1228_v9 }
 0x1f4   :  { %v5627_v16 = vpop.f32.mrf.mxu1 }
 0x1f5   :  { %v1396_v19 = vsel %vm1356_vm3, %v6673_v14, -inf }
 0x1f6   :  { %1397 = vmax.xlane.f32.xlu1 %v1396_v19  ;;  %v1231_v20 = vpop.f32.mrf.mxu1 }
 0x1f8   :  { %v5628_v21 = vpop.f32.mrf.mxu1 }
 0x1fa   :  { %v1320_v23 = vpop.f32.mrf.mxu1 }
 0x1fb   :  { %v6678_v26 = vadd.f32 %v6605_v25, %v1320_v23 }
 0x1fc   :  { %v5639_v27 = vpop.f32.mrf.mxu1 }
 0x1fd   :  { %v1402_v31 = vsel %vm1356_vm3, %v6678_v26, -inf }
 0x1fe   :  { %1403 = vmax.xlane.f32.xlu1 %v1402_v31  ;;  %v1323_v32 = vpop.f32.mrf.mxu1 }
 0x200   :  { %v5640_v36 = vpop.f32.mrf.mxu1 }
 0x23f   :  { %v1359_v39 = vpop.xlane.xlu0 %1358 }
 0x240   :  { %v1405_v37 = vsub.f32 %v6596_v18, %v1359_v39 }
 0x242   :  { %v1421_v40 = vmul.f32 1.442695, %v1405_v37 }
 0x244   :  { %5993 = vpow2.f32 %v1421_v40 }
 0x247   :  { %v1362_v41 = vpop.xlane.xlu0 %1361 }
 0x248   :  { %v1406_v42 = vsub.f32 %v6608_v29, %v1362_v41 }
 0x24a   :  { %v1423_v45 = vmul.f32 1.442695, %v1406_v42 }
 0x24b   :  { %v1371_v46 = vpop.xlane.xlu0 %1370 }
 0x24c   :  { %5995 = vpow2.f32 %v1423_v45  ;;  %v1409_v25 = vsub.f32 %v6611_v30, %v1371_v46 }
 0x24e   :  { %v1429_v56 = vmul.f32 1.442695, %v1409_v25 }
 0x24f   :  { %v1365_v47 = vpop.xlane.xlu1 %1364  ;;  %v1377_v48 = vpop.xlane.xlu0 %1376 }
 0x250   :  { %v1407_v52 = vsub.f32 %v6618_v43, %v1365_v47  ;;  %v1411_v54 = vsub.f32 %v6621_v44, %v1377_v48 }
 0x251   :  { %v5994_v53 = vpop.eup %5993 }
 0x252   :  { %v1425_v59 = vmul.f32 1.442695, %v1407_v52  ;;  %v1453_v18 = vsel %vm1356_vm3, %v5994_v53, 0.0  ;;  %v1501_v60 = vpack.c.bf16 %v5994_v53, %v5994_v53  ;;  %v1433_v29 = vmul.f32 1.442695, %v1411_v54 }
 0x253   :  { %1454 = vadd.xlane.f32.xlu0 %v1453_v18 }
 0x254   :  { %5997 = vpow2.f32 %v1425_v59  ;;  %5644 = vmatmul.mubr.msk.bf16.vlgmr.msra.gmra.mxu0 %vm1356_vm3, %v1501_v60 }
 0x255   :  { %5654 = vmatpush3.bf16.msra.mxu0 %v6473_v10  ;;  %5655 = vmatprep.mubr.msk.bf16.mxu0 %vm6138_vm1, %v6137_v8  ;;  %5999 = vpow2.f32 %v1429_v56 }
 0x256   :  { %5665 = vmatprep.subr.bf16.mxu0 %v6137_v8  ;;  %6001 = vpow2.f32 %v1433_v29 }
 0x257   :  { %v1368_v30 = vpop.xlane.xlu1 %1367  ;;  %v1383_v43 = vpop.xlane.xlu0 %1382 }
 0x258   :  { %v1408_v44 = vsub.f32 %v6628_v57, %v1368_v30  ;;  %v1413_v62 = vsub.f32 %v6631_v49, %v1383_v43 }
 0x259   :  { %v5996_v0 = vpop.eup %5995 }
 0x25a   :  { %v1427_v2 = vmul.f32 1.442695, %v1408_v44  ;;  %v1437_v61 = vmul.f32 1.442695, %v1413_v62  ;;  %v1456_v4 = vsel %vm1356_vm3, %v5996_v0, 0.0  ;;  %v1502_v5 = vpack.c.bf16 %v5996_v0, %v5996_v0 }
 0x25b   :  { %1457 = vadd.xlane.f32.xlu1 %v1456_v4 }
 0x25c   :  { %6003 = vpow2.f32 %v1427_v2  ;;  %5650 = vmatmul.mubr.msk.bf16.vlgmr.msra.gmra.mxu1 %vm1356_vm3, %v1502_v5  ;;  %v1530_v5 = vpack.c.bf16 %v6600_v22, %v6600_v22 }
 0x25d   :  { %5660 = vmatpush3.bf16.msra.mxu1 %v6488_v17  ;;  %5661 = vmatprep.mubr.msk.bf16.mxu1 %vm6138_vm1, %v6137_v8  ;;  %6005 = vpow2.f32 %v1437_v61 }
 0x25e   :  { %5671 = vmatprep.subr.bf16.mxu1 %v6137_v8 }
 0x25f   :  { %v1374_v10 = vpop.xlane.xlu1 %1373  ;;  %v1389_v57 = vpop.xlane.xlu0 %1388 }
 0x260   :  { %v1410_v49 = vsub.f32 %v6638_v11, %v1374_v10  ;;  %v1415_v7 = vsub.f32 %v6641_v12, %v1389_v57 }
 0x261   :  { %v5998_v9 = vpop.eup %5997 }
 0x262   :  { %v1431_v16 = vmul.f32 1.442695, %v1410_v49  ;;  %v1441_v19 = vmul.f32 1.442695, %v1415_v7  ;;  %v1459_v20 = vsel %vm1356_vm3, %v5998_v9, 0.0  ;;  %v1503_v21 = vpack.c.bf16 %v5998_v9, %v5998_v9  ;;  %v6000_v23 = vpop.eup %5999 }
 0x263   :  { %1460 = vadd.xlane.f32.xlu0 %v1459_v20  ;;  %v6002_v17 = vpop.eup %6001  ;;  %v1465_v11 = vsel %vm1356_vm3, %v6000_v23, 0.0  ;;  %v1505_v37 = vpack.c.bf16 %v6000_v23, %v6000_v23  ;;  %v2136_v9 = vsel %vm1536_vm2, %v1530_v5, 0  ;;  %v5755_v20 = vld [vmem:[#allocation2 + $0x14] ss:$8 sps:$4 sm:$0xff]  }
 0x264   :  { %6007 = vpow2.f32 %v1431_v16  ;;  %5656 = vmatmul.mubr.msk.bf16.vlgmr.msra.gmra.mxu0 %vm1356_vm3, %v1503_v21  ;;  %v1471_v39 = vsel %vm1356_vm3, %v6002_v17, 0.0  ;;  %v1507_v59 = vpack.c.bf16 %v6002_v17, %v6002_v17 }
 0x265   :  { %6009 = vpow2.f32 %v1441_v19  ;;  %5666 = vmatpush3.bf16.msra.mxu0 %v6506_v28  ;;  %5667 = vmatprep.mubr.msk.bf16.mxu0 %vm6138_vm1, %v6137_v8 }
 0x266   :  { %5677 = vmatprep.subr.bf16.mxu0 %v6137_v8 }
 0x267   :  { %v1380_v12 = vpop.xlane.xlu1 %1379  ;;  %v1395_v27 = vpop.xlane.xlu0 %1394  ;;  %1466 = vadd.xlane.f32.xlu0 %v1465_v11  ;;  %v5758_v11 = vld [vmem:[#allocation2 + $0x4] ss:$8 sps:$4 sm:$0xff]  }
 0x268   :  { %v1412_v31 = vsub.f32 %v6648_v34, %v1380_v12  ;;  %v1417_v32 = vsub.f32 %v6651_v35, %v1395_v27  ;;  %v5756_v12 = vld [vmem:[#allocation2] ss:$8 sps:$4 sm:$0xff]   ;;  %v6139_v27 = vmov 0  }
 0x269   :  { %v6004_v36 = vpop.eup %6003 }
 0x26a   :  { %v1435_v28 = vmul.f32 1.442695, %v1412_v31  ;;  %v1445_v40 = vmul.f32 1.442695, %v1417_v32  ;;  %v1462_v41 = vsel %vm1356_vm3, %v6004_v36, 0.0  ;;  %v1504_v42 = vpack.c.bf16 %v6004_v36, %v6004_v36  ;;  %v6006_v45 = vpop.eup %6005 }
 0x26b   :  { %1463 = vadd.xlane.f32.xlu1 %v1462_v41  ;;  %1472 = vadd.xlane.f32.xlu0 %v1471_v39  ;;  %v1477_v34 = vsel %vm1356_vm3, %v6006_v45, 0.0  ;;  %v1509_v43 = vpack.c.bf16 %v6006_v45, %v6006_v45  ;;  %v5764_v31 = vld [vmem:[#allocation2 + $0x24] ss:$8 sps:$4 sm:$0xff]   ;;  %v5762_v32 = vld [vmem:[#allocation2 + $0x20] ss:$8 sps:$4 sm:$0xff]  }
 0x26c   :  { %6011 = vpow2.f32 %v1435_v28  ;;  %5662 = vmatmul.mubr.msk.bf16.vlgmr.msra.gmra.mxu1 %vm1356_vm3, %v1504_v42  ;;  %5668 = vmatmul.mubr.msk.bf16.vlgmr.msra.gmra.mxu0 %vm1356_vm3, %v1505_v37  ;;  %v5767_v36 = vld [vmem:[#allocation2 + $0x54] ss:$8 sps:$4 sm:$0xff]  }
 0x26d   :  { %6013 = vpow2.f32 %v1445_v40  ;;  %5672 = vmatpush3.bf16.msra.mxu1 %v6519_v38  ;;  %5678 = vmatpush3.bf16.msra.mxu0 %v6497_v24  ;;  %v5773_v39 = vld [vmem:[#allocation2 + $0x74] ss:$8 sps:$4 sm:$0xff]  }
 0x26e   :  { %5673 = vmatprep.mubr.msk.bf16.mxu1 %vm6138_vm1, %v6137_v8  ;;  %5679 = vmatprep.mubr.msk.bf16.mxu0 %vm6138_vm1, %v6137_v8 }
 0x26f   :  { %v1386_v35 = vpop.xlane.xlu1 %1385  ;;  %1478 = vadd.xlane.f32.xlu0 %v1477_v34  ;;  %v1401_v46 = vpop.xlane.xlu0 %1400  ;;  %5683 = vmatprep.subr.bf16.mxu1 %v6137_v8 }
 0x270   :  { %v1414_v25 = vsub.f32 %v6658_v50, %v1386_v35  ;;  %v1419_v47 = vsub.f32 %v6661_v51, %v1401_v46  ;;  %5689 = vmatprep.subr.bf16.mxu0 %v6137_v8 }
 0x271   :  { %v6008_v24 = vpop.eup %6007 }
 0x272   :  { %v6010_v38 = vpop.eup %6009  ;;  %v1439_v48 = vmul.f32 1.442695, %v1414_v25  ;;  %v1449_v52 = vmul.f32 1.442695, %v1419_v47  ;;  %v1468_v53 = vsel %vm1356_vm3, %v6008_v24, 0.0  ;;  %v1506_v54 = vpack.c.bf16 %v6008_v24, %v6008_v24 }
 0x273   :  { %1469 = vadd.xlane.f32.xlu1 %v1468_v53  ;;  %v1483_v56 = vsel %vm1356_vm3, %v6010_v38, 0.0  ;;  %v1511_v4 = vpack.c.bf16 %v6010_v38, %v6010_v38 }
 0x274   :  { %6015 = vpow2.f32 %v1439_v48  ;;  %1484 = vadd.xlane.f32.xlu0 %v1483_v56  ;;  %5674 = vmatmul.mubr.msk.bf16.vlgmr.msra.gmra.mxu1 %vm1356_vm3, %v1506_v54  ;;  %v5770_v54 = vld [vmem:[#allocation2 + $0x44] ss:$8 sps:$4 sm:$0xff]  }
 0x275   :  { %6017 = vpow2.f32 %v1449_v52  ;;  %5680 = vmatmul.mubr.msk.bf16.vlgmr.msra.gmra.mxu0 %vm1356_vm3, %v1507_v59  ;;  %5684 = vmatpush3.bf16.msra.mxu1 %v6513_v33  ;;  %v5765_v52 = vld [vmem:[#allocation2 + $0x50] ss:$8 sps:$4 sm:$0xff]  }
 0x276   :  { %5690 = vmatpush3.bf16.msra.mxu0 %v6559_v58  ;;  %5685 = vmatprep.mubr.msk.bf16.mxu1 %vm6138_vm1, %v6137_v8 }
 0x277   :  { %v1392_v50 = vpop.xlane.xlu1 %1391  ;;  %5691 = vmatprep.mubr.msk.bf16.mxu0 %vm6138_vm1, %v6137_v8  ;;  %5695 = vmatprep.subr.bf16.mxu1 %v6137_v8 }
 0x278   :  { %v1416_v51 = vsub.f32 %v6668_v1, %v1392_v50  ;;  %5701 = vmatprep.subr.bf16.mxu0 %v6137_v8  ;;  %v5768_v50 = vld [vmem:[#allocation2 + $0x40] ss:$8 sps:$4 sm:$0xff]  }
 0x279   :  { %v6012_v18 = vpop.eup %6011 }
 0x27a   :  { %v6014_v60 = vpop.eup %6013  ;;  %v1443_v29 = vmul.f32 1.442695, %v1416_v51  ;;  %v1474_v33 = vsel %vm1356_vm3, %v6012_v18, 0.0  ;;  %v1508_v30 = vpack.c.bf16 %v6012_v18, %v6012_v18  ;;  %v5779_v18 = vld [vmem:[#allocation2 + $0x94] ss:$8 sps:$4 sm:$0xff]  }
 0x27b   :  { %1475 = vadd.xlane.f32.xlu1 %v1474_v33  ;;  %v1489_v58 = vsel %vm1356_vm3, %v6014_v60, 0.0  ;;  %v1513_v7 = vpack.c.bf16 %v6014_v60, %v6014_v60 }
 0x27c   :  { %6019 = vpow2.f32 %v1443_v29  ;;  %1490 = vadd.xlane.f32.xlu0 %v1489_v58  ;;  %5686 = vmatmul.mubr.msk.bf16.vlgmr.msra.gmra.mxu1 %vm1356_vm3, %v1508_v30 }
 0x27d   :  { %5692 = vmatmul.mubr.msk.bf16.vlgmr.msra.gmra.mxu0 %vm1356_vm3, %v1509_v43  ;;  %5696 = vmatpush3.bf16.msra.mxu1 %v6571_v3 }
 0x27e   :  { %5702 = vmatpush3.bf16.msra.mxu0 %v6554_v55  ;;  %5697 = vmatprep.mubr.msk.bf16.mxu1 %vm6138_vm1, %v6137_v8 }
 0x27f   :  { %v1398_v1 = vpop.xlane.xlu1 %1397  ;;  %5703 = vmatprep.mubr.msk.bf16.mxu0 %vm6138_vm1, %v6137_v8  ;;  %5707 = vmatprep.subr.bf16.mxu1 %v6137_v8 }
 0x280   :  { %v1418_v44 = vsub.f32 %v6673_v14, %v1398_v1  ;;  %5713 = vmatprep.subr.bf16.mxu0 %v6137_v8 }
 0x281   :  { %v6016_v62 = vpop.eup %6015 }
 0x282   :  { %v6018_v0 = vpop.eup %6017  ;;  %v1447_v2 = vmul.f32 1.442695, %v1418_v44  ;;  %v1480_v3 = vsel %vm1356_vm3, %v6016_v62, 0.0  ;;  %v1510_v61 = vpack.c.bf16 %v6016_v62, %v6016_v62 }
 0x283   :  { %1481 = vadd.xlane.f32.xlu1 %v1480_v3  ;;  %v1495_v55 = vsel %vm1356_vm3, %v6018_v0, 0.0  ;;  %v1515_v19 = vpack.c.bf16 %v6018_v0, %v6018_v0 }
 0x284   :  { %6021 = vpow2.f32 %v1447_v2  ;;  %1496 = vadd.xlane.f32.xlu0 %v1495_v55  ;;  %5698 = vmatmul.mubr.msk.bf16.vlgmr.msra.gmra.mxu1 %vm1356_vm3, %v1510_v61 }
 0x285   :  { %5704 = vmatmul.mubr.msk.bf16.vlgmr.msra.gmra.mxu0 %vm1356_vm3, %v1511_v4  ;;  %5708 = vmatpush3.bf16.msra.mxu1 %v6564_v63 }
 0x286   :  { %5714 = vmatpush3.bf16.msra.mxu0 %v6581_v13  ;;  %5709 = vmatprep.mubr.msk.bf16.mxu1 %vm6138_vm1, %v6137_v8 }
 0x287   :  { %v1404_v14 = vpop.xlane.xlu1 %1403  ;;  %5715 = vmatprep.mubr.msk.bf16.mxu0 %vm6138_vm1, %v6137_v8  ;;  %5719 = vmatprep.subr.bf16.mxu1 %v6137_v8 }
 0x288   :  { %v1420_v10 = vsub.f32 %v6678_v26, %v1404_v14  ;;  %5725 = vmatprep.subr.bf16.mxu0 %v6137_v8  ;;  %v5771_v14 = vld [vmem:[#allocation2 + $0x70] ss:$8 sps:$4 sm:$0xff]  }
 0x289   :  { %v6020_v57 = vpop.eup %6019 }
 0x28a   :  { %v1451_v63 = vmul.f32 1.442695, %v1420_v10  ;;  %v1486_v13 = vsel %vm1356_vm3, %v6020_v57, 0.0  ;;  %v1512_v49 = vpack.c.bf16 %v6020_v57, %v6020_v57  ;;  %v5776_v10 = vld [vmem:[#allocation2 + $0x64] ss:$8 sps:$4 sm:$0xff]  }
 0x28b   :  { %1487 = vadd.xlane.f32.xlu1 %v1486_v13 }
 0x28c   :  { %6023 = vpow2.f32 %v1451_v63  ;;  %5710 = vmatmul.mubr.msk.bf16.vlgmr.msra.gmra.mxu1 %vm1356_vm3, %v1512_v49 }
 0x28d   :  { %5716 = vmatmul.mubr.msk.bf16.vlgmr.msra.gmra.mxu0 %vm1356_vm3, %v1513_v7  ;;  %5720 = vmatpush3.bf16.msra.mxu1 %v2136_v9  ;;  %v5774_v7 = vld [vmem:[#allocation2 + $0x60] ss:$8 sps:$4 sm:$0xff]  }
 0x28e   :  { %5726 = vmatpush3.bf16.msra.mxu0 %v6575_v6  ;;  %5721 = vmatprep.mubr.msk.bf16.mxu1 %vm6138_vm1, %v6137_v8  ;;  %v5753_v6 = vld [vmem:[#allocation2 + $0x10] ss:$8 sps:$4 sm:$0xff]  }
 0x28f   :  { %5727 = vmatprep.mubr.msk.bf16.mxu0 %vm6138_vm1, %v6137_v8  ;;  %5731 = vmatprep.subr.bf16.mxu1 %v6137_v8 }
 0x290   :  { %2393 = vmatprep.subr.bf16.mxu0 %v5755_v20 }
 0x291   :  { %v6022_v22 = vpop.eup %6021 }
 0x292   :  { %v1492_v26 = vsel %vm1356_vm3, %v6022_v22, 0.0  ;;  %v1514_v16 = vpack.c.bf16 %v6022_v22, %v6022_v22 }
 0x293   :  { %1493 = vadd.xlane.f32.xlu1 %v1492_v26  ;;  %v5785_v26 = vld [vmem:[#allocation2 + $0xb4] ss:$8 sps:$4 sm:$0xff]  }
 0x294   :  { %5722 = vmatmul.mubr.msk.bf16.vlgmr.msra.gmra.mxu1 %vm1356_vm3, %v1514_v16 }
 0x295   :  { %5728 = vmatmul.mubr.msk.bf16.vlgmr.msra.gmra.mxu0 %vm1356_vm3, %v1515_v19  ;;  %5732 = vmatpush3.bf16.msra.mxu1 %v6585_v15  ;;  %v5761_v15 = vld [vmem:[#allocation2 + $0x34] ss:$8 sps:$4 sm:$0xff]  }
 0x296   :  { %5733 = vmatprep.mubr.msk.bf16.mxu1 %vm6138_vm1, %v6137_v8  ;;  %2394 = vmatpush1.bf16.msra.mxu0 %v5753_v6  ;;  %v5759_v8 = vld [vmem:[#allocation2 + $0x30] ss:$8 sps:$4 sm:$0xff]  }
 0x297   :  { %2395 = vmatprep.subr.bf16.mxu0 %v5758_v11  ;;  %2413 = vmatprep.mubr.bf16.mxu0 %v6139_v27  ;;  %v5777_v11 = vld [vmem:[#allocation2 + $0x90] ss:$8 sps:$4 sm:$0xff]  }
 0x298   :  { %2459 = vmatprep.subr.bf16.mxu1 %v5761_v15  ;;  %v5782_v15 = vld [vmem:[#allocation2 + $0x84] ss:$8 sps:$4 sm:$0xff]  }
 0x299   :  { %v6024_v21 = vpop.eup %6023 }
 0x29a   :  { %v1498_v23 = vsel %vm1356_vm3, %v6024_v21, 0.0  ;;  %v1516_v17 = vpack.c.bf16 %v6024_v21, %v6024_v21  ;;  %2396 = vmatpush1.bf16.msra.mxu0 %v5756_v12 }
 0x29b   :  { %1499 = vadd.xlane.f32.xlu1 %v1498_v23  ;;  %2525 = vmatprep.subr.bf16.mxu0 %v5767_v36 }
 0x29c   :  { %5734 = vmatmul.mubr.msk.bf16.vlgmr.msra.gmra.mxu1 %vm1356_vm3, %v1516_v17 }
 0x29d   :  { %2479 = vmatprep.mubr.bf16.mxu1 %v6139_v27  ;;  %2460 = vmatpush1.bf16.msra.mxu1 %v5759_v8 }
 0x29e   :  { %2461 = vmatprep.subr.bf16.mxu1 %v5764_v31 }
 0x2a1   :  { %2462 = vmatpush1.bf16.msra.mxu1 %v5762_v32 }
 0x2a2   :  { %2591 = vmatprep.subr.bf16.mxu1 %v5773_v39  ;;  %v5780_v39 = vld [vmem:[#allocation2 + $0x80] ss:$8 sps:$4 sm:$0xff]  }
 0x2dc   :  { %v1455_v37 = vpop.xlane.xlu0 %1454 }
 0x2dd   :  { %6025 = vrcp.f32 %v1455_v37 }
 0x2e4   :  { %v1458_v28 = vpop.xlane.xlu1 %1457 }
 0x2e5   :  { %6027 = vrcp.f32 %v1458_v28 }
 0x2ea   :  { %v6026_v34 = vpop.eup %6025 }
 0x2ec   :  { %v1461_v35 = vpop.xlane.xlu0 %1460 }
 0x2ed   :  { %6029 = vrcp.f32 %v1461_v35 }
 0x2f0   :  { %v1467_v51 = vpop.xlane.xlu0 %1466 }
 0x2f2   :  { %v6028_v46 = vpop.eup %6027 }
 0x2f4   :  { %v1464_v25 = vpop.xlane.xlu1 %1463  ;;  %v1473_v1 = vpop.xlane.xlu0 %1472 }
 0x2f5   :  { %6031 = vrcp.f32 %v1464_v25 }
 0x2f6   :  { %6033 = vrcp.f32 %v1467_v51 }
 0x2f8   :  { %v1479_v22 = vpop.xlane.xlu0 %1478 }
 0x2fa   :  { %v6030_v43 = vpop.eup %6029 }
 0x2fc   :  { %v1470_v60 = vpop.xlane.xlu1 %1469 }
 0x2fd   :  { %6035 = vrcp.f32 %v1470_v60  ;;  %v1485_v28 = vpop.xlane.xlu0 %1484  ;;  %v5797_v60 = vld [vmem:[#allocation2 + $0xf4] ss:$8 sps:$4 sm:$0xff]  }
 0x2fe   :  { %6037 = vrcp.f32 %v1473_v1 }
 0x302   :  { %v6032_v62 = vpop.eup %6031 }
 0x303   :  { %v6034_v9 = vpop.eup %6033 }
 0x304   :  { %v1476_v44 = vpop.xlane.xlu1 %1475 }
 0x305   :  { %6039 = vrcp.f32 %v1476_v44  ;;  %v1491_v51 = vpop.xlane.xlu0 %1490 }
 0x306   :  { %6041 = vrcp.f32 %v1479_v22 }
 0x30a   :  { %v6036_v16 = vpop.eup %6035 }
 0x30b   :  { %v6038_v37 = vpop.eup %6037 }
 0x30c   :  { %v1482_v19 = vpop.xlane.xlu1 %1481 }
 0x30d   :  { %6043 = vrcp.f32 %v1482_v19 }
 0x30e   :  { %6045 = vrcp.f32 %v1485_v28 }
 0x314   :  { %v1574_v40 = vpop.f32.mrf.mxu0 }
 0x315   :  { %v2302_v24 = vmul.f32 %v6026_v34, %v1574_v40 }
 0x316   :  { %v5645_v41 = vpop.f32.mrf.mxu0 }
 0x317   :  { %v5791_v41 = vld [vmem:[#allocation2 + $0xd4] ss:$8 sps:$4 sm:$0xff]  }
 0x318   :  { %v1577_v42 = vpop.f32.mrf.mxu0 }
 0x319   :  { %v6040_v42 = vpop.eup %6039 }
 0x31a   :  { %v5646_v45 = vpop.f32.mrf.mxu0 }
 0x31b   :  { %v1488_v45 = vpop.xlane.xlu1 %1487 }
 0x31c   :  { %v1620_v47 = vpop.f32.mrf.mxu1  ;;  %6047 = vrcp.f32 %v1488_v45 }
 0x31d   :  { %v2303_v38 = vmul.f32 %v6028_v46, %v1620_v47  ;;  %6049 = vrcp.f32 %v1491_v51 }
 0x31e   :  { %v5651_v48 = vpop.f32.mrf.mxu1 }
 0x31f   :  { %v2318_v53 = vpack.c.bf16 %v2303_v38, %v2302_v24  ;;  %v5783_v24 = vld [vmem:[#allocation2 + $0xb0] ss:$8 sps:$4 sm:$0xff]  }
 0x320   :  { %v1623_v56 = vpop.f32.mrf.mxu1 }
 0x321   :  { %5099 = vmatmul.mubr.msk.bf16.vlgmr.msra.gmra.mxu0 %vm114_vm0, %v2318_v53 }
 0x322   :  { %v5652_v59 = vpop.f32.mrf.mxu1  ;;  %2526 = vmatpush1.bf16.msra.mxu0 %v5765_v52  ;;  %2545 = vmatprep.mubr.bf16.mxu0 %v6139_v27  ;;  %v5788_v52 = vld [vmem:[#allocation2 + $0xa4] ss:$8 sps:$4 sm:$0xff]  }
 0x323   :  { %2527 = vmatprep.subr.bf16.mxu0 %v5770_v54  ;;  %v5786_v59 = vld [vmem:[#allocation2 + $0xa0] ss:$8 sps:$4 sm:$0xff]  }
 0x324   :  { %v1666_v29 = vpop.f32.mrf.mxu0 }
 0x325   :  { %v2304_v3 = vmul.f32 %v6030_v43, %v1666_v29 }
 0x326   :  { %v5657_v33 = vpop.f32.mrf.mxu0  ;;  %2528 = vmatpush1.bf16.msra.mxu0 %v5768_v50  ;;  %v6042_v50 = vpop.eup %6041 }
 0x327   :  { %2657 = vmatprep.subr.bf16.mxu0 %v5779_v18  ;;  %v6044_v29 = vpop.eup %6043  ;;  %v1494_v33 = vpop.xlane.xlu1 %1493 }
 0x328   :  { %v1669_v30 = vpop.f32.mrf.mxu0  ;;  %6051 = vrcp.f32 %v1494_v33 }
 0x32a   :  { %v5658_v58 = vpop.f32.mrf.mxu0 }
 0x32c   :  { %v1712_v0 = vpop.f32.mrf.mxu1  ;;  %v1758_v2 = vpop.f32.mrf.mxu0 }
 0x32d   :  { %v2305_v61 = vmul.f32 %v6032_v62, %v1712_v0  ;;  %v2306_v20 = vmul.f32 %v6034_v9, %v1758_v2  ;;  %v5789_v62 = vld [vmem:[#allocation2 + $0xd0] ss:$8 sps:$4 sm:$0xff]  }
 0x32e   :  { %v5663_v55 = vpop.f32.mrf.mxu1  ;;  %v5669_v4 = vpop.f32.mrf.mxu0 }
 0x32f   :  { %v2319_v5 = vpack.c.bf16 %v2305_v61, %v2304_v3  ;;  %v5794_v3 = vld [vmem:[#allocation2 + $0xc4] ss:$8 sps:$4 sm:$0xff]  }
 0x330   :  { %v1715_v57 = vpop.f32.mrf.mxu1  ;;  %v1761_v63 = vpop.f32.mrf.mxu0 }
 0x331   :  { %5104 = vmatmul.mubr.msk.bf16.vlgmr.msra.gmra.mxu1 %vm114_vm0, %v2319_v5  ;;  %v6046_v5 = vpop.eup %6045 }
 0x332   :  { %v5664_v13 = vpop.f32.mrf.mxu1  ;;  %v5670_v49 = vpop.f32.mrf.mxu0  ;;  %2592 = vmatpush1.bf16.msra.mxu1 %v5771_v14  ;;  %2611 = vmatprep.mubr.bf16.mxu1 %v6139_v27  ;;  %v5792_v14 = vld [vmem:[#allocation2 + $0xc0] ss:$8 sps:$4 sm:$0xff]  }
 0x333   :  { %2593 = vmatprep.subr.bf16.mxu1 %v5776_v10  ;;  %v1497_v10 = vpop.xlane.xlu0 %1496  ;;  %v6048_v63 = vpop.eup %6047 }
 0x334   :  { %v1804_v6 = vpop.f32.mrf.mxu1  ;;  %v1500_v13 = vpop.xlane.xlu1 %1499  ;;  %6053 = vrcp.f32 %v1497_v10 }
 0x335   :  { %v2307_v21 = vmul.f32 %v6036_v16, %v1804_v6  ;;  %v1850_v23 = vpop.f32.mrf.mxu0  ;;  %v5795_v16 = vld [vmem:[#allocation2 + $0xf0] ss:$8 sps:$4 sm:$0xff]   ;;  %6055 = vrcp.f32 %v1500_v13 }
 0x336   :  { %v5675_v17 = vpop.f32.mrf.mxu1  ;;  %2594 = vmatpush1.bf16.msra.mxu1 %v5774_v7  ;;  %v2308_v35 = vmul.f32 %v6038_v37, %v1850_v23 }
 0x337   :  { %v2320_v12 = vpack.c.bf16 %v2307_v21, %v2306_v20  ;;  %v5681_v8 = vpop.f32.mrf.mxu0  ;;  %2723 = vmatprep.subr.bf16.mxu1 %v5785_v26  ;;  %v5800_v20 = vld [vmem:[#allocation2 + $0xe4] ss:$8 sps:$4 sm:$0xff]  }
 0x338   :  { %v1807_v31 = vpop.f32.mrf.mxu1 }
 0x339   :  { %v1853_v32 = vpop.f32.mrf.mxu0  ;;  %5109 = vmatmul.mubr.msk.bf16.vlgmr.msra.gmra.mxu0 %vm114_vm0, %v2320_v12  ;;  %v6050_v12 = vpop.eup %6049 }
 0x33a   :  { %v5676_v36 = vpop.f32.mrf.mxu1  ;;  %2658 = vmatpush1.bf16.msra.mxu0 %v5777_v11  ;;  %2677 = vmatprep.mubr.bf16.mxu0 %v6139_v27  ;;  %v5798_v11 = vld [vmem:[#allocation2 + $0xe0] ss:$8 sps:$4 sm:$0xff]  }
 0x33b   :  { %v5682_v40 = vpop.f32.mrf.mxu0  ;;  %2659 = vmatprep.subr.bf16.mxu0 %v5782_v15  ;;  %v6052_v15 = vpop.eup %6051 }
 0x33c   :  { %v1896_v34 = vpop.f32.mrf.mxu1 }
 0x33d   :  { %v2309_v46 = vmul.f32 %v6040_v42, %v1896_v34  ;;  %v1942_v25 = vpop.f32.mrf.mxu0 }
 0x33e   :  { %v5687_v47 = vpop.f32.mrf.mxu1  ;;  %2660 = vmatpush1.bf16.msra.mxu0 %v5780_v39  ;;  %v2310_v58 = vmul.f32 %v6042_v50, %v1942_v25 }
 0x33f   :  { %v2321_v38 = vpack.c.bf16 %v2309_v46, %v2308_v35  ;;  %v5693_v48 = vpop.f32.mrf.mxu0  ;;  %2789 = vmatprep.subr.bf16.mxu0 %v5791_v41 }
 0x340   :  { %v1899_v53 = vpop.f32.mrf.mxu1 }
 0x341   :  { %v1945_v54 = vpop.f32.mrf.mxu0  ;;  %5114 = vmatmul.mubr.msk.bf16.vlgmr.msra.gmra.mxu1 %vm114_vm0, %v2321_v38  ;;  %v6054_v34 = vpop.eup %6053 }
 0x342   :  { %v5688_v56 = vpop.f32.mrf.mxu1  ;;  %2724 = vmatpush1.bf16.msra.mxu1 %v5783_v24  ;;  %2743 = vmatprep.mubr.bf16.mxu1 %v6139_v27 }
 0x343   :  { %v5694_v18 = vpop.f32.mrf.mxu0  ;;  %2725 = vmatprep.subr.bf16.mxu1 %v5788_v52 }
 0x344   :  { %v1988_v30 = vpop.f32.mrf.mxu1 }
 0x345   :  { %v2311_v43 = vmul.f32 %v6044_v29, %v1988_v30  ;;  %v2034_v1 = vpop.f32.mrf.mxu0 }
 0x346   :  { %v5699_v44 = vpop.f32.mrf.mxu1  ;;  %2726 = vmatpush1.bf16.msra.mxu1 %v5786_v59  ;;  %v2312_v7 = vmul.f32 %v6046_v5, %v2034_v1 }
 0x347   :  { %v2322_v0 = vpack.c.bf16 %v2311_v43, %v2310_v58  ;;  %v5705_v2 = vpop.f32.mrf.mxu0  ;;  %2855 = vmatprep.subr.bf16.mxu1 %v5797_v60 }
 0x348   :  { %v1991_v61 = vpop.f32.mrf.mxu1 }
 0x349   :  { %v2037_v55 = vpop.f32.mrf.mxu0  ;;  %5119 = vmatmul.mubr.msk.bf16.vlgmr.msra.gmra.mxu0 %vm114_vm0, %v2322_v0 }
 0x34a   :  { %v5700_v4 = vpop.f32.mrf.mxu1  ;;  %2790 = vmatpush1.bf16.msra.mxu0 %v5789_v62  ;;  %2809 = vmatprep.mubr.bf16.mxu0 %v6139_v27  ;;  %v2916_v55 = vlaneseq }
 0x34b   :  { %v5706_v57 = vpop.f32.mrf.mxu0  ;;  %2791 = vmatprep.subr.bf16.mxu0 %v5794_v3 }
 0x34c   :  { %v2080_v49 = vpop.f32.mrf.mxu1  ;;  %v6802_v10 = vshrl.u32 %v2916_v55, 7 }
 0x34d   :  { %v2313_v9 = vmul.f32 %v6048_v63, %v2080_v49  ;;  %v2126_v22 = vpop.f32.mrf.mxu0 }
 0x34e   :  { %v5711_v26 = vpop.f32.mrf.mxu1  ;;  %2792 = vmatpush1.bf16.msra.mxu0 %v5792_v14  ;;  %v2314_v32 = vmul.f32 %v6050_v12, %v2126_v22 }
 0x34f   :  { %v2323_v19 = vpack.c.bf16 %v2313_v9, %v2312_v7  ;;  %v5717_v6 = vpop.f32.mrf.mxu0 }
 0x350   :  { %v2083_v21 = vpop.f32.mrf.mxu1 }
 0x351   :  { %v2129_v23 = vpop.f32.mrf.mxu0  ;;  %5124 = vmatmul.mubr.msk.bf16.vlgmr.msra.gmra.mxu1 %vm114_vm0, %v2323_v19 }
 0x352   :  { %v5712_v17 = vpop.f32.mrf.mxu1  ;;  %2856 = vmatpush1.bf16.msra.mxu1 %v5795_v16  ;;  %2875 = vmatprep.mubr.bf16.mxu1 %v6139_v27  ;;  %v6056_v27 = vpop.eup %6055  ;;  %v6805_v16 = vsub.s32 0, %v6802_v10  ;;  %v6810_v23 = vld [vmem:[%s7355_s11] sm:$0x3f] }
 0x353   :  { %v5718_v8 = vpop.f32.mrf.mxu0  ;;  %2857 = vmatprep.subr.bf16.mxu1 %v5800_v20 }
 0x354   :  { %v2172_v31 = vpop.f32.mrf.mxu1 }
 0x355   :  { %v2315_v36 = vmul.f32 %v6052_v15, %v2172_v31  ;;  %v2218_v39 = vpop.f32.mrf.mxu0  ;;  %v6815_v15 = vld [vmem:[%s7355_s11 + $0x8] sm:$0x3f] }
 0x356   :  { %v5723_v37 = vpop.f32.mrf.mxu1  ;;  %2858 = vmatpush1.bf16.msra.mxu1 %v5798_v11  ;;  %v2316_v25 = vmul.f32 %v6054_v34, %v2218_v39 }
 0x357   :  { %v2324_v28 = vpack.c.bf16 %v2315_v36, %v2314_v32  ;;  %v5729_v40 = vpop.f32.mrf.mxu0  ;;  %v2919_v36 = vrot.slane %v6810_v23, %v6805_v16 }
 0x358   :  { %v2175_v41 = vpop.f32.mrf.mxu1 }
 0x359   :  { %v2221_v42 = vpop.f32.mrf.mxu0  ;;  %5129 = vmatmul.mubr.msk.bf16.vlgmr.msra.gmra.mxu0 %vm114_vm0, %v2324_v28 }
 0x35a   :  { %v5724_v45 = vpop.f32.mrf.mxu1  ;;  %v2923_v42 = vrot.slane %v6815_v15, %v6805_v16 }
 0x35b   :  { %v5730_v35 = vpop.f32.mrf.mxu0 }
 0x35c   :  { %v2264_v46 = vpop.f32.mrf.mxu1 }
 0x35d   :  { %v2317_v47 = vmul.f32 %v6056_v27, %v2264_v46 }
 0x35e   :  { %v5735_v24 = vpop.f32.mrf.mxu1 }
 0x35f   :  { %v2325_v38 = vpack.c.bf16 %v2317_v47, %v2316_v25 }
 0x360   :  { %v2267_v48 = vpop.f32.mrf.mxu1 }
 0x361   :  { %5134 = vmatmul.mubr.msk.bf16.vlgmr.msra.gmra.mxu1 %vm114_vm0, %v2325_v38 }
 0x362   :  { %v5736_v52 = vpop.f32.mrf.mxu1 }
 0x3e1   :  { %v2415_v53 = vpop.f32.mrf.mxu0 }
 0x3e3   :  { %v2417_v54 = vpop.f32.mrf.mxu0 }
 0x3e5   :  { %v2419_v56 = vpop.f32.mrf.mxu0 }
 0x3e7   :  { %v2421_v50 = vpop.f32.mrf.mxu0 }
 0x3f1   :  { %v2481_v59 = vpop.f32.mrf.mxu1 }
 0x3f2   :  { %v2888_v4 = vadd.f32 %v2481_v59, %v2415_v53  ;;  %v2928_v53 = vld [vmem:[%s7347_s3] sm:$0xff] }
 0x3f3   :  { %v2483_v51 = vpop.f32.mrf.mxu1 }
 0x3f4   :  { %v2895_v57 = vadd.f32 %v2483_v51, %v2417_v54  ;;  %v2929_v54 = vld [vmem:[%s7347_s3 + $0x8] sm:$0xff] }
 0x3f5   :  { %v2485_v60 = vpop.f32.mrf.mxu1 }
 0x3f6   :  { %v2902_v49 = vadd.f32 %v2485_v60, %v2419_v56 }
 0x3f7   :  { %v2487_v33 = vpop.f32.mrf.mxu1 }
 0x3f8   :  { %v2909_v19 = vadd.f32 %v2487_v33, %v2421_v50 }
 0x3f9   :  { %v2547_v18 = vpop.f32.mrf.mxu0 }
 0x3fa   :  { %v2889_v63 = vadd.f32 %v2888_v4, %v2547_v18 }
 0x3fb   :  { %v2549_v29 = vpop.f32.mrf.mxu0 }
 0x3fc   :  { %v2896_v7 = vadd.f32 %v2895_v57, %v2549_v29  ;;  %v3045_v57 = vld [vmem:[%s7353_s9 + $0x1a0] sm:$0xff] }
 0x3fd   :  { %v2551_v30 = vpop.f32.mrf.mxu0 }
 0x3fe   :  { %v2903_v6 = vadd.f32 %v2902_v49, %v2551_v30  ;;  %v2930_v30 = vld [vmem:[%s7347_s3 + $0x10] sm:$0xff] }
 0x3ff   :  { %v2553_v43 = vpop.f32.mrf.mxu0 }
 0x400   :  { %v2910_v17 = vadd.f32 %v2909_v19, %v2553_v43  ;;  %v3037_v19 = vld [vmem:[%s7353_s9 + $0x160] sm:$0xff] }
 0x401   :  { %v2613_v58 = vpop.f32.mrf.mxu1 }
 0x402   :  { %v2890_v9 = vadd.f32 %v2889_v63, %v2613_v58  ;;  %v2931_v58 = vld [vmem:[%s7347_s3 + $0x18] sm:$0xff] }
 0x403   :  { %v2615_v1 = vpop.f32.mrf.mxu1 }
 0x404   :  { %v2897_v20 = vadd.f32 %v2896_v7, %v2615_v1  ;;  %v3042_v7 = vld [vmem:[%s7353_s9 + $0x188] sm:$0xff] }
 0x405   :  { %v2617_v62 = vpop.f32.mrf.mxu1 }
 0x406   :  { %v2904_v11 = vadd.f32 %v2903_v6, %v2617_v62  ;;  %v3034_v6 = vld [vmem:[%s7353_s9 + $0x148] sm:$0xff] }
 0x407   :  { %v2619_v2 = vpop.f32.mrf.mxu1 }
 0x408   :  { %v2911_v39 = vadd.f32 %v2910_v17, %v2619_v2  ;;  %v3049_v2 = vld [vmem:[%s7353_s9 + $0x1c0] sm:$0xff] }
 0x409   :  { %v2679_v44 = vpop.f32.mrf.mxu0 }
 0x40a   :  { %v2891_v21 = vadd.f32 %v2890_v9, %v2679_v44  ;;  %v3046_v9 = vld [vmem:[%s7353_s9 + $0x1a8] sm:$0xff] }
 0x40b   :  { %v2681_v0 = vpop.f32.mrf.mxu0  ;;  %v5185_v17 = vcombine.low %v3042_v7, %v3046_v9 }
 0x40c   :  { %v2898_v12 = vadd.f32 %v2897_v20, %v2681_v0  ;;  %v3038_v20 = vld [vmem:[%s7353_s9 + $0x168] sm:$0xff] }
 0x40d   :  { %v2683_v3 = vpop.f32.mrf.mxu0 }
 0x40e   :  { %v2905_v37 = vadd.f32 %v2904_v11, %v2683_v3  ;;  %v3053_v3 = vld [vmem:[%s7353_s9 + $0x1e0] sm:$0xff] }
 0x40f   :  { %v2685_v14 = vpop.f32.mrf.mxu0  ;;  %v5191_v55 = vcombine.low %v3049_v2, %v3053_v3  ;;  %v5192_v4 = vcombine.high %v3049_v2, %v3053_v3  ;;  %v2994_v2 = vld [vmem:[%s7353_s9 + $0x8] sm:$0xff] }
 0x410   :  { %v2912_v45 = vadd.f32 %v2911_v39, %v2685_v14  ;;  %v3054_v14 = vld [vmem:[%s7353_s9 + $0x1e8] sm:$0xff] }
 0x411   :  { %v2745_v61 = vpop.f32.mrf.mxu1  ;;  %3805 = vmatprep.subr.bf16.mxu0 %v5192_v4  ;;  %v2998_v3 = vld [vmem:[%s7353_s9 + $0x28] sm:$0xff] }
 0x412   :  { %v2892_v8 = vadd.f32 %v2891_v21, %v2745_v61  ;;  %v3050_v61 = vld [vmem:[%s7353_s9 + $0x1c8] sm:$0xff]  ;;  %3806 = vmatpush1.bf16.msra.mxu0 %v5191_v55 }
 0x413   :  { %v2747_v5 = vpop.f32.mrf.mxu1  ;;  %v5193_v63 = vcombine.low %v3050_v61, %v3054_v14 }
 0x414   :  { %v2899_v28 = vadd.f32 %v2898_v12, %v2747_v5  ;;  %v3041_v5 = vld [vmem:[%s7353_s9 + $0x180] sm:$0xff]  ;;  %v5178_v12 = vcombine.high %v3034_v6, %v3038_v20 }
 0x415   :  { %v2749_v22 = vpop.f32.mrf.mxu1  ;;  %v5184_v49 = vcombine.high %v3041_v5, %v3045_v57  ;;  %v5183_v21 = vcombine.low %v3041_v5, %v3045_v57  ;;  %v3113_v5 = vld [vmem:[%s7353_s9 + $0x3c0] sm:$0xff] }
 0x416   :  { %v2906_v34 = vadd.f32 %v2905_v37, %v2749_v22  ;;  %v3033_v22 = vld [vmem:[%s7353_s9 + $0x140] sm:$0xff]  ;;  %v5177_v37 = vcombine.low %v3034_v6, %v3038_v20 }
 0x417   :  { %v2751_v31 = vpop.f32.mrf.mxu1  ;;  %3807 = vmatprep.subr.bf16.mxu0 %v5184_v49  ;;  %v5176_v11 = vcombine.high %v3033_v22, %v3037_v19  ;;  %v5175_v39 = vcombine.low %v3033_v22, %v3037_v19  ;;  %v3117_v57 = vld [vmem:[%s7353_s9 + $0x3e0] sm:$0xff] }
 0x418   :  { %v2913_v47 = vadd.f32 %v2912_v45, %v2751_v31  ;;  %v3029_v31 = vld [vmem:[%s7353_s9 + $0x120] sm:$0xff]  ;;  %3808 = vmatpush1.bf16.msra.mxu0 %v5183_v21  ;;  %v3018_v45 = vld [vmem:[%s7353_s9 + $0xc8] sm:$0xff] }
 0x419   :  { %v2811_v13 = vpop.f32.mrf.mxu0  ;;  %3809 = vmatprep.subr.bf16.mxu0 %v5176_v11 }
 0x41a   :  { %v2893_v40 = vadd.f32 %v2892_v8, %v2811_v13  ;;  %v5194_v13 = vcombine.high %v3050_v61, %v3054_v14  ;;  %v3025_v8 = vld [vmem:[%s7353_s9 + $0x100] sm:$0xff]  ;;  %v5138_v14 = vcombine.high %v2994_v2, %v2998_v3 }
 0x41b   :  { %v2813_v26 = vpop.f32.mrf.mxu0 }
 0x41c   :  { %v2900_v35 = vadd.f32 %v2899_v28, %v2813_v26  ;;  %v5186_v26 = vcombine.high %v3042_v7, %v3046_v9  ;;  %3848 = vmatprep.subr.bf16.mxu1 %v5194_v13  ;;  %v5168_v28 = vcombine.high %v3025_v8, %v3029_v31  ;;  %3810 = vmatpush1.bf16.msra.mxu0 %v5175_v39  ;;  %v3118_v13 = vld [vmem:[%s7353_s9 + $0x3e8] sm:$0xff] }
 0x41d   :  { %v2815_v32 = vpop.f32.mrf.mxu0  ;;  %3849 = vmatpush1.bf16.msra.mxu1 %v5193_v63  ;;  %v3114_v63 = vld [vmem:[%s7353_s9 + $0x3c8] sm:$0xff]  ;;  %v5137_v7 = vcombine.low %v2994_v2, %v2998_v3  ;;  %v5256_v9 = vcombine.high %v3113_v5, %v3117_v57  ;;  %v3073_v2 = vld [vmem:[%s7353_s9 + $0x280] sm:$0xff] }
 0x41e   :  { %v2907_v24 = vadd.f32 %v2906_v34, %v2815_v32  ;;  %3850 = vmatprep.subr.bf16.mxu1 %v5186_v26  ;;  %v3026_v32 = vld [vmem:[%s7353_s9 + $0x108] sm:$0xff]  ;;  %3811 = vmatprep.subr.bf16.mxu0 %v5168_v28  ;;  %v5258_v22 = vcombine.high %v3114_v63, %v3118_v13  ;;  %v5255_v26 = vcombine.low %v3113_v5, %v3117_v57  ;;  %v3105_v28 = vld [vmem:[%s7353_s9 + $0x380] sm:$0xff] }
 0x41f   :  { %v2817_v46 = vpop.f32.mrf.mxu0  ;;  %v3022_v34 = vld [vmem:[%s7353_s9 + $0xe8] sm:$0xff]  ;;  %v5257_v19 = vcombine.low %v3114_v63, %v3118_v13  ;;  %v3077_v3 = vld [vmem:[%s7353_s9 + $0x2a0] sm:$0xff] }
 0x420   :  { %v2914_v56 = vadd.f32 %v2913_v47, %v2817_v46  ;;  %v3009_v47 = vld [vmem:[%s7353_s9 + $0x80] sm:$0xff]  ;;  %v5216_v5 = vcombine.high %v3073_v2, %v3077_v3 }
 0x421   :  { %v2877_v41 = vpop.f32.mrf.mxu1  ;;  %3851 = vmatpush1.bf16.msra.mxu1 %v5185_v17  ;;  %v3065_v63 = vld [vmem:[%s7353_s9 + $0x240] sm:$0xff] }
 0x422   :  { %v2894_v27 = vadd.f32 %v2893_v40, %v2877_v41  ;;  %3852 = vmatprep.subr.bf16.mxu1 %v5178_v12  ;;  %v3017_v41 = vld [vmem:[%s7353_s9 + $0xc0] sm:$0xff] }
 0x423   :  { %v2879_v25 = vpop.f32.mrf.mxu1  ;;  %v3069_v13 = vld [vmem:[%s7353_s9 + $0x260] sm:$0xff] }
 0x424   :  { %v2924_v38 = vadd.f32 %v2919_v36, %v2894_v27  ;;  %v2901_v48 = vadd.f32 %v2900_v35, %v2879_v25  ;;  %v5167_v35 = vcombine.low %v3025_v8, %v3029_v31  ;;  %v5162_v25 = vcombine.high %v3018_v45, %v3022_v34 }
 0x425   :  { %v2881_v52 = vpop.f32.mrf.mxu1  ;;  %3853 = vmatpush1.bf16.msra.mxu1 %v5177_v37 }
 0x426   :  { %v2925_v59 = vadd.f32 %v2923_v42, %v2901_v48  ;;  %v2908_v50 = vadd.f32 %v2907_v24, %v2881_v52  ;;  %v6827_v29 = vadd.f32 %v2928_v53, %v2924_v38  ;;  %v3013_v24 = vld [vmem:[%s7353_s9 + $0xa0] sm:$0xff]  ;;  %v3010_v38 = vld [vmem:[%s7353_s9 + $0x88] sm:$0xff]  ;;  %3812 = vmatpush1.bf16.msra.mxu0 %v5167_v35  ;;  %v5161_v53 = vcombine.low %v3018_v45, %v3022_v34 }
 0x427   :  { %v2883_v51 = vpop.f32.mrf.mxu1  ;;  %v3014_v48 = vld [vmem:[%s7353_s9 + $0xa8] sm:$0xff]  ;;  %v3097_v35 = vld [vmem:[%s7353_s9 + $0x340] sm:$0xff] }
 0x428   :  { %v2926_v18 = vadd.f32 %v2919_v36, %v2908_v50  ;;  %v2915_v60 = vadd.f32 %v2914_v56, %v2883_v51  ;;  %v6829_v33 = vadd.f32 %v2929_v54, %v2925_v59  ;;  %v3030_v36 = vld [vmem:[%s7353_s9 + $0x128] sm:$0xff]  ;;  %v5152_v54 = vcombine.high %v3009_v47, %v3013_v24  ;;  %v3001_v59 = vld [vmem:[%s7353_s9 + $0x40] sm:$0xff] }
 0x429   :  { %v5170_v40 = vcombine.high %v3026_v32, %v3030_v36  ;;  %v5169_v27 = vcombine.low %v3026_v32, %v3030_v36  ;;  %v5154_v56 = vcombine.high %v3010_v38, %v3014_v48  ;;  %v3005_v50 = vld [vmem:[%s7353_s9 + $0x60] sm:$0xff]  ;;  %v3002_v51 = vld [vmem:[%s7353_s9 + $0x48] sm:$0xff] }
 0x42a   :  { %v2927_v43 = vadd.f32 %v2923_v42, %v2915_v60  ;;  %v2936_v1 = vadd.f32 %v6829_v33, %v6827_v29  ;;  %v6839_v44 = vadd.f32 %v2930_v30, %v2926_v18  ;;  %v3021_v42 = vld [vmem:[%s7353_s9 + $0xe0] sm:$0xff]  ;;  %v3006_v18 = vld [vmem:[%s7353_s9 + $0x68] sm:$0xff]  ;;  %v5151_v60 = vcombine.low %v3009_v47, %v3013_v24 }
 0x42b   :  { %v5160_v46 = vcombine.high %v3017_v41, %v3021_v42  ;;  %3854 = vmatprep.subr.bf16.mxu1 %v5170_v40  ;;  %v5159_v52 = vcombine.low %v3017_v41, %v3021_v42  ;;  %v5153_v30 = vcombine.low %v3010_v38, %v3014_v48  ;;  %v5143_v61 = vcombine.low %v3001_v59, %v3005_v50  ;;  %v3110_v41 = vld [vmem:[%s7353_s9 + $0x3a8] sm:$0xff] }
 0x42c   :  { %2937 = vadd.xlane.f32.xlu0 %v2936_v1  ;;  %v6841_v62 = vadd.f32 %v2931_v58, %v2927_v43  ;;  %3855 = vmatpush1.bf16.msra.mxu1 %v5169_v27  ;;  %v5144_v58 = vcombine.high %v3001_v59, %v3005_v50  ;;  %v5146_v43 = vcombine.high %v3002_v51, %v3006_v18  ;;  %v2993_v1 = vld [vmem:[%s7353_s9] sm:$0xff]  ;;  %v3102_v47 = vld [vmem:[%s7353_s9 + $0x368] sm:$0xff] }
 0x42d   :  { %3813 = vmatprep.subr.bf16.mxu0 %v5160_v46  ;;  %3856 = vmatprep.subr.bf16.mxu1 %v5162_v25  ;;  %v5145_v55 = vcombine.low %v3002_v51, %v3006_v18  ;;  %v3101_v27 = vld [vmem:[%s7353_s9 + $0x360] sm:$0xff]  ;;  %v3098_v46 = vld [vmem:[%s7353_s9 + $0x348] sm:$0xff] }
 0x42e   :  { %v2939_v0 = vadd.f32 %v6841_v62, %v6839_v44  ;;  %3814 = vmatpush1.bf16.msra.mxu0 %v5159_v52  ;;  %v5240_v25 = vcombine.high %v3097_v35, %v3101_v27  ;;  %v5239_v24 = vcombine.low %v3097_v35, %v3101_v27  ;;  %v5241_v38 = vcombine.low %v3098_v46, %v3102_v47  ;;  %v3089_v52 = vld [vmem:[%s7353_s9 + $0x300] sm:$0xff]  ;;  %v3094_v50 = vld [vmem:[%s7353_s9 + $0x328] sm:$0xff] }
 0x42f   :  { %3815 = vmatprep.subr.bf16.mxu0 %v5152_v54  ;;  %v5242_v48 = vcombine.high %v3098_v46, %v3102_v47  ;;  %v3090_v54 = vld [vmem:[%s7353_s9 + $0x308] sm:$0xff]  ;;  %v3081_v51 = vld [vmem:[%s7353_s9 + $0x2c0] sm:$0xff] }
 0x430   :  { %2940 = vadd.xlane.f32.xlu1 %v2939_v0  ;;  %3857 = vmatpush1.bf16.msra.mxu1 %v5161_v53  ;;  %v2997_v0 = vld [vmem:[%s7353_s9 + $0x20] sm:$0xff] }
 0x431   :  { %3858 = vmatprep.subr.bf16.mxu1 %v5154_v56  ;;  %v5136_v4 = vcombine.high %v2993_v1, %v2997_v0  ;;  %v5135_v49 = vcombine.low %v2993_v1, %v2997_v0  ;;  %v3093_v53 = vld [vmem:[%s7353_s9 + $0x320] sm:$0xff]  ;;  %v3086_v1 = vld [vmem:[%s7353_s9 + $0x2e8] sm:$0xff] }
 0x432   :  { %3816 = vmatpush1.bf16.msra.mxu0 %v5151_v60  ;;  %v5231_v56 = vcombine.low %v3089_v52, %v3093_v53  ;;  %v5232_v59 = vcombine.high %v3089_v52, %v3093_v53  ;;  %v3085_v18 = vld [vmem:[%s7353_s9 + $0x2e0] sm:$0xff]  ;;  %v5233_v60 = vcombine.low %v3090_v54, %v3094_v50  ;;  %v7073_v52 = vsub.s32 2, %v6802_v10 }
 0x433   :  { %3817 = vmatprep.subr.bf16.mxu0 %v5144_v58  ;;  %v5224_v58 = vcombine.high %v3081_v51, %v3085_v18 }
 0x434   :  { %3859 = vmatpush1.bf16.msra.mxu1 %v5153_v30  ;;  %v5234_v30 = vcombine.high %v3090_v54, %v3094_v50 }
 0x435   :  { %3860 = vmatprep.subr.bf16.mxu1 %v5146_v43  ;;  %v3082_v43 = vld [vmem:[%s7353_s9 + $0x2c8] sm:$0xff] }
 0x436   :  { %3818 = vmatpush1.bf16.msra.mxu0 %v5143_v61  ;;  %v5226_v0 = vcombine.high %v3082_v43, %v3086_v1  ;;  %v3074_v61 = vld [vmem:[%s7353_s9 + $0x288] sm:$0xff] }
 0x437   :  { %3819 = vmatprep.subr.bf16.mxu0 %v5136_v4  ;;  %v5223_v4 = vcombine.low %v3081_v51, %v3085_v18  ;;  %v2988_v51 = vrot.slane %v6815_v15, %v7073_v52  ;;  %v2984_v18 = vrot.slane %v6810_v23, %v7073_v52 }
 0x438   :  { %3861 = vmatpush1.bf16.msra.mxu1 %v5145_v55  ;;  %v3078_v55 = vld [vmem:[%s7353_s9 + $0x2a8] sm:$0xff] }
 0x439   :  { %3862 = vmatprep.subr.bf16.mxu1 %v5138_v14  ;;  %v5225_v14 = vcombine.low %v3082_v43, %v3086_v1  ;;  %v5218_v57 = vcombine.high %v3074_v61, %v3078_v55 }
 0x43a   :  { %3820 = vmatpush1.bf16.msra.mxu0 %v5135_v49  ;;  %v3066_v49 = vld [vmem:[%s7353_s9 + $0x248] sm:$0xff] }
 0x43b   :  { %3821 = vmatprep.subr.bf16.mxu0 %v5256_v9  ;;  %v5215_v9 = vcombine.low %v3073_v2, %v3077_v3 }
 0x43c   :  { %3863 = vmatpush1.bf16.msra.mxu1 %v5137_v7  ;;  %v3070_v7 = vld [vmem:[%s7353_s9 + $0x268] sm:$0xff] }
 0x43d   :  { %3864 = vmatprep.subr.bf16.mxu1 %v5258_v22  ;;  %v5217_v22 = vcombine.low %v3074_v61, %v3078_v55 }
 0x43e   :  { %3822 = vmatpush2.bf16.msra.mxu0 %v5255_v26  ;;  %v5208_v26 = vcombine.high %v3065_v63, %v3069_v13 }
 0x440   :  { %3865 = vmatpush2.bf16.msra.mxu1 %v5257_v19  ;;  %v5210_v19 = vcombine.high %v3066_v49, %v3070_v7 }
 0x4b5   :  { %v2938_v6 = vpop.xlane.xlu0 %2937 }
 0x4b6   :  { %v2943_v20 = vmul.f32 0.00390625, %v2938_v6  ;;  %v3057_v6 = vld [vmem:[%s7353_s9 + $0x200] sm:$0xff] }
 0x4b8   :  { %v6954_v21 = vsub.f32 %v6827_v29, %v2943_v20  ;;  %v6957_v17 = vsub.f32 %v6829_v33, %v2943_v20  ;;  %v3061_v20 = vld [vmem:[%s7353_s9 + $0x220] sm:$0xff] }
 0x4b9   :  { %v2941_v11 = vpop.xlane.xlu1 %2940 }
 0x4ba   :  { %v2944_v12 = vmul.f32 0.00390625, %v2941_v11  ;;  %v2949_v8 = vmul.f32 %v6954_v21, %v6954_v21  ;;  %v2950_v31 = vmul.f32 %v6957_v17, %v6957_v17  ;;  %v3058_v11 = vld [vmem:[%s7353_s9 + $0x208] sm:$0xff] }
 0x4bc   :  { %v6964_v32 = vsub.f32 %v6839_v44, %v2944_v12  ;;  %v6967_v36 = vsub.f32 %v6841_v62, %v2944_v12  ;;  %v2953_v39 = vadd.f32 %v2950_v31, %v2949_v8  ;;  %v3109_v44 = vld [vmem:[%s7353_s9 + $0x3a0] sm:$0xff]  ;;  %v3106_v62 = vld [vmem:[%s7353_s9 + $0x388] sm:$0xff]  ;;  %v5207_v8 = vcombine.low %v3065_v63, %v3069_v13  ;;  %v3036_v63 = vld [vmem:[%s7353_s9 + $0x158] sm:$0xff] }
 0x4bd   :  { %v5248_v40 = vcombine.high %v3105_v28, %v3109_v44  ;;  %v5247_v42 = vcombine.low %v3105_v28, %v3109_v44  ;;  %v5249_v45 = vcombine.low %v3106_v62, %v3110_v41  ;;  %v5250_v34 = vcombine.high %v3106_v62, %v3110_v41  ;;  %v3062_v12 = vld [vmem:[%s7353_s9 + $0x228] sm:$0xff]  ;;  %v3051_v28 = vld [vmem:[%s7353_s9 + $0x1d0] sm:$0xff]  ;;  %v3052_v62 = vld [vmem:[%s7353_s9 + $0x1d8] sm:$0xff] }
 0x4be   :  { %2954 = vadd.xlane.f32.xlu0 %v2953_v39  ;;  %v2951_v29 = vmul.f32 %v6964_v32, %v6964_v32  ;;  %v2952_v33 = vmul.f32 %v6967_v36, %v6967_v36  ;;  %v5209_v31 = vcombine.low %v3066_v49, %v3070_v7  ;;  %v5200_v39 = vcombine.high %v3057_v6, %v3061_v20  ;;  %v3055_v44 = vld [vmem:[%s7353_s9 + $0x1f0] sm:$0xff]  ;;  %v3040_v13 = vld [vmem:[%s7353_s9 + $0x178] sm:$0xff] }
 0x4bf   :  { %3823 = vmatprep.subr.bf16.mxu0 %v5248_v40  ;;  %3866 = vmatprep.subr.bf16.mxu1 %v5250_v34  ;;  %v5195_v40 = vcombine.low %v3051_v28, %v3055_v44  ;;  %v5196_v41 = vcombine.high %v3051_v28, %v3055_v44 }
 0x4c0   :  { %v2956_v37 = vadd.f32 %v2952_v33, %v2951_v29  ;;  %3824 = vmatpush2.bf16.msra.mxu0 %v5247_v42  ;;  %3867 = vmatpush2.bf16.msra.mxu1 %v5249_v45  ;;  %v5202_v29 = vcombine.high %v3058_v11, %v3062_v12  ;;  %v5199_v33 = vcombine.low %v3057_v6, %v3061_v20  ;;  %v3056_v42 = vld [vmem:[%s7353_s9 + $0x1f8] sm:$0xff] }
 0x4c1   :  { %3825 = vmatprep.subr.bf16.mxu0 %v5240_v25  ;;  %3868 = vmatprep.subr.bf16.mxu1 %v5242_v48  ;;  %v5197_v45 = vcombine.low %v3052_v62, %v3056_v42  ;;  %v5198_v34 = vcombine.high %v3052_v62, %v3056_v42  ;;  %v3028_v6 = vld [vmem:[%s7353_s9 + $0x118] sm:$0xff]  ;;  %v3015_v42 = vld [vmem:[%s7353_s9 + $0xb0] sm:$0xff] }
 0x4c2   :  { %2957 = vadd.xlane.f32.xlu1 %v2956_v37  ;;  %v5201_v37 = vcombine.low %v3058_v11, %v3062_v12  ;;  %v3032_v20 = vld [vmem:[%s7353_s9 + $0x138] sm:$0xff]  ;;  %v5181_v12 = vcombine.low %v3036_v63, %v3040_v13 }
 0x4c3   :  { %v5173_v44 = vcombine.low %v3028_v6, %v3032_v20 }
 0x4c4   :  { %3826 = vmatpush2.bf16.msra.mxu0 %v5239_v24  ;;  %3869 = vmatpush2.bf16.msra.mxu1 %v5241_v38  ;;  %v7070_v38 = vsub.s32 1, %v6802_v10 }
 0x4c5   :  { %3827 = vmatprep.subr.bf16.mxu0 %v5232_v59  ;;  %3870 = vmatprep.subr.bf16.mxu1 %v5234_v30 }
 0x4c6   :  { %v2976_v54 = vrot.slane %v6815_v15, %v7070_v38  ;;  %v2972_v59 = vrot.slane %v6810_v23, %v7070_v38  ;;  %v3043_v23 = vld [vmem:[%s7353_s9 + $0x190] sm:$0xff] }
 0x4c7   :  { %v3047_v15 = vld [vmem:[%s7353_s9 + $0x1b0] sm:$0xff] }
 0x4c8   :  { %3828 = vmatpush2.bf16.msra.mxu0 %v5231_v56  ;;  %3871 = vmatpush2.bf16.msra.mxu1 %v5233_v60  ;;  %v5187_v49 = vcombine.low %v3043_v23, %v3047_v15 }
 0x4c9   :  { %3829 = vmatprep.subr.bf16.mxu0 %v5224_v58  ;;  %3872 = vmatprep.subr.bf16.mxu1 %v5226_v0 }
 0x4cc   :  { %3830 = vmatpush2.bf16.msra.mxu0 %v5223_v4  ;;  %3873 = vmatpush2.bf16.msra.mxu1 %v5225_v14  ;;  %v3035_v4 = vld [vmem:[%s7353_s9 + $0x150] sm:$0xff]  ;;  %v5188_v14 = vcombine.high %v3043_v23, %v3047_v15 }
 0x4cd   :  { %3831 = vmatprep.subr.bf16.mxu0 %v5216_v5  ;;  %3874 = vmatprep.subr.bf16.mxu1 %v5218_v57  ;;  %v3039_v57 = vld [vmem:[%s7353_s9 + $0x170] sm:$0xff] }
 0x4ce   :  { %v5179_v11 = vcombine.low %v3035_v4, %v3039_v57  ;;  %v3115_v23 = vld [vmem:[%s7353_s9 + $0x3d0] sm:$0xff] }
 0x4cf   :  { %v3119_v15 = vld [vmem:[%s7353_s9 + $0x3f0] sm:$0xff] }
 0x4d0   :  { %3832 = vmatpush2.bf16.msra.mxu0 %v5215_v9  ;;  %3875 = vmatpush2.bf16.msra.mxu1 %v5217_v22  ;;  %v5180_v9 = vcombine.high %v3035_v4, %v3039_v57  ;;  %v5182_v22 = vcombine.high %v3036_v63, %v3040_v13  ;;  %v3107_v57 = vld [vmem:[%s7353_s9 + $0x390] sm:$0xff]  ;;  %v3108_v13 = vld [vmem:[%s7353_s9 + $0x398] sm:$0xff] }
 0x4d1   :  { %3833 = vmatprep.subr.bf16.mxu0 %v5208_v26  ;;  %3876 = vmatprep.subr.bf16.mxu1 %v5210_v19  ;;  %v3027_v26 = vld [vmem:[%s7353_s9 + $0x110] sm:$0xff] }
 0x4d2   :  { %v3031_v19 = vld [vmem:[%s7353_s9 + $0x130] sm:$0xff] }
 0x4d3   :  { %v5171_v28 = vcombine.low %v3027_v26, %v3031_v19  ;;  %v3111_v63 = vld [vmem:[%s7353_s9 + $0x3b0] sm:$0xff] }
 0x4d4   :  { %3834 = vmatpush2.bf16.msra.mxu0 %v5207_v8  ;;  %3877 = vmatpush2.bf16.msra.mxu1 %v5209_v31  ;;  %v5172_v8 = vcombine.high %v3027_v26, %v3031_v19  ;;  %v5174_v31 = vcombine.high %v3028_v6, %v3032_v20  ;;  %v3099_v19 = vld [vmem:[%s7353_s9 + $0x350] sm:$0xff]  ;;  %v3100_v20 = vld [vmem:[%s7353_s9 + $0x358] sm:$0xff] }
 0x4d5   :  { %3835 = vmatprep.subr.bf16.mxu0 %v5200_v39  ;;  %3878 = vmatprep.subr.bf16.mxu1 %v5202_v29  ;;  %v3019_v39 = vld [vmem:[%s7353_s9 + $0xd0] sm:$0xff] }
 0x4d6   :  { %v3023_v29 = vld [vmem:[%s7353_s9 + $0xf0] sm:$0xff] }
 0x4d7   :  { %v5164_v62 = vcombine.high %v3019_v39, %v3023_v29  ;;  %v3103_v6 = vld [vmem:[%s7353_s9 + $0x370] sm:$0xff] }
 0x4d8   :  { %3836 = vmatpush2.bf16.msra.mxu0 %v5199_v33  ;;  %3879 = vmatpush2.bf16.msra.mxu1 %v5201_v37  ;;  %v3020_v33 = vld [vmem:[%s7353_s9 + $0xd8] sm:$0xff] }
 0x4d9   :  { %3891 = vmatprep.subr.bf16.mxu0 %v5196_v41  ;;  %3934 = vmatprep.subr.bf16.mxu1 %v5198_v34  ;;  %v3024_v37 = vld [vmem:[%s7353_s9 + $0xf8] sm:$0xff]  ;;  %v3011_v41 = vld [vmem:[%s7353_s9 + $0x90] sm:$0xff] }
 0x4da   :  { %v3016_v34 = vld [vmem:[%s7353_s9 + $0xb8] sm:$0xff] }
 0x547   :  { %v2955_v35 = vpop.xlane.xlu0 %2954 }
 0x548   :  { %v2959_v27 = vmul.f32 0.00390625, %v2955_v35  ;;  %v5163_v35 = vcombine.low %v3019_v39, %v3023_v29  ;;  %v3091_v29 = vld [vmem:[%s7353_s9 + $0x310] sm:$0xff] }
 0x54a   :  { %v2961_v46 = vadd.f32 1e-05, %v2959_v27  ;;  %v5165_v27 = vcombine.low %v3020_v33, %v3024_v37 }
 0x54b   :  { %v2958_v25 = vpop.xlane.xlu1 %2957 }
 0x54c   :  { %6057 = vrsqrt.f32 %v2961_v46  ;;  %v2960_v47 = vmul.f32 0.00390625, %v2958_v25  ;;  %v5156_v46 = vcombine.high %v3011_v41, %v3015_v42 }
 0x54e   :  { %v2962_v24 = vadd.f32 1e-05, %v2960_v47  ;;  %v3003_v47 = vld [vmem:[%s7353_s9 + $0x50] sm:$0xff] }
 0x550   :  { %6059 = vrsqrt.f32 %v2962_v24  ;;  %v3007_v24 = vld [vmem:[%s7353_s9 + $0x70] sm:$0xff] }
 0x559   :  { %v6058_v48 = vpop.eup %6057 }
 0x55a   :  { %v2966_v53 = vmul.f32 %v6058_v48, %v6957_v17  ;;  %v2965_v56 = vmul.f32 %v6058_v48, %v6954_v21  ;;  %v3004_v48 = vld [vmem:[%s7353_s9 + $0x58] sm:$0xff] }
 0x55c   :  { %v2978_v30 = vmul.f32 %v2976_v54, %v2966_v53  ;;  %v2977_v58 = vmul.f32 %v2972_v59, %v2965_v56  ;;  %v3008_v53 = vld [vmem:[%s7353_s9 + $0x78] sm:$0xff] }
 0x55d   :  { %v6060_v50 = vpop.eup %6059 }
 0x55e   :  { %v2968_v60 = vmul.f32 %v6060_v50, %v6967_v36  ;;  %v2967_v17 = vmul.f32 %v6060_v50, %v6964_v32  ;;  %v7087_v0 = vadd.f32 %v2988_v51, %v2978_v30  ;;  %v7091_v2 = vadd.f32 %v2984_v18, %v2977_v58  ;;  %v3044_v32 = vld [vmem:[%s7353_s9 + $0x198] sm:$0xff] }
 0x55f   :  { %v3048_v36 = vld [vmem:[%s7353_s9 + $0x1b8] sm:$0xff]  ;;  %v5150_v50 = vcombine.high %v3004_v48, %v3008_v53  ;;  %v5149_v58 = vcombine.low %v3004_v48, %v3008_v53  ;;  %v3079_v48 = vld [vmem:[%s7353_s9 + $0x2b0] sm:$0xff] }
 0x560   :  { %v2980_v43 = vmul.f32 %v2976_v54, %v2968_v60  ;;  %v2979_v1 = vmul.f32 %v2972_v59, %v2967_v17  ;;  %v5190_v5 = vcombine.high %v3044_v32, %v3048_v36  ;;  %v5189_v7 = vcombine.low %v3044_v32, %v3048_v36  ;;  %v2996_v60 = vld [vmem:[%s7353_s9 + $0x18] sm:$0xff] }
 0x561   :  { %v5155_v54 = vcombine.low %v3011_v41, %v3015_v42  ;;  %v5148_v59 = vcombine.high %v3003_v47, %v3007_v24  ;;  %v3000_v30 = vld [vmem:[%s7353_s9 + $0x38] sm:$0xff]  ;;  %v5147_v17 = vcombine.low %v3003_v47, %v3007_v24  ;;  %v3083_v42 = vld [vmem:[%s7353_s9 + $0x2d0] sm:$0xff] }
 0x562   :  { %v7089_v21 = vadd.f32 %v2988_v51, %v2980_v43  ;;  %v7093_v3 = vadd.f32 %v2984_v18, %v2979_v1  ;;  %v2995_v51 = vld [vmem:[%s7353_s9 + $0x10] sm:$0xff]  ;;  %v5142_v1 = vcombine.high %v2996_v60, %v3000_v30  ;;  %v3116_v32 = vld [vmem:[%s7353_s9 + $0x3d8] sm:$0xff]  ;;  %v5141_v4 = vcombine.low %v2996_v60, %v3000_v30 }
 0x563   :  { %v2999_v18 = vld [vmem:[%s7353_s9 + $0x30] sm:$0xff]  ;;  %v3120_v36 = vld [vmem:[%s7353_s9 + $0x3f8] sm:$0xff] }
 0x564   :  { %v3122_v61 = vpack.c.bf16 %v7089_v21, %v7087_v0  ;;  %v7111_v55 = vpack.c.bf16 %v7093_v3, %v7091_v2  ;;  %v5140_v43 = vcombine.high %v2995_v51, %v2999_v18  ;;  %v3075_v24 = vld [vmem:[%s7353_s9 + $0x290] sm:$0xff]  ;;  %v3076_v53 = vld [vmem:[%s7353_s9 + $0x298] sm:$0xff] }
 0x565   :  { %v3071_v60 = vld [vmem:[%s7353_s9 + $0x270] sm:$0xff]  ;;  %v3068_v30 = vld [vmem:[%s7353_s9 + $0x258] sm:$0xff] }
 0x566   :  { %3837 = vmatprep.mubr.bf16.mxu0 %v3122_v61  ;;  %3880 = vmatprep.mubr.bf16.mxu1 %v3122_v61 }
 0x567   :  { %3838 = vmatmul.mubr.bf16.vlgmr.msra.gmra.mxu0 %v7111_v55  ;;  %3881 = vmatmul.mubr.bf16.vlgmr.msra.gmra.mxu1 %v7111_v55 }
 0x568   :  { %3892 = vmatpush1.bf16.msra.mxu0 %v5195_v40  ;;  %3935 = vmatpush1.bf16.msra.mxu1 %v5197_v45  ;;  %v5166_v40 = vcombine.high %v3020_v33, %v3024_v37  ;;  %v3012_v45 = vld [vmem:[%s7353_s9 + $0x98] sm:$0xff]  ;;  %v3095_v33 = vld [vmem:[%s7353_s9 + $0x330] sm:$0xff] }
 0x569   :  { %3923 = vmatprep.mubr.bf16.mxu0 %v3122_v61  ;;  %3966 = vmatprep.mubr.bf16.mxu1 %v3122_v61  ;;  %v5158_v25 = vcombine.high %v3012_v45, %v3016_v34  ;;  %v5157_v56 = vcombine.low %v3012_v45, %v3016_v34  ;;  %v5139_v61 = vcombine.low %v2995_v51, %v2999_v18  ;;  %v3092_v37 = vld [vmem:[%s7353_s9 + $0x318] sm:$0xff]  ;;  %v3087_v45 = vld [vmem:[%s7353_s9 + $0x2f0] sm:$0xff] }
 0x56a   :  { %3893 = vmatprep.subr.bf16.mxu0 %v5188_v14  ;;  %3936 = vmatprep.subr.bf16.mxu1 %v5190_v5  ;;  %v5260_v14 = vcombine.high %v3115_v23, %v3119_v15  ;;  %v5262_v5 = vcombine.high %v3116_v32, %v3120_v36  ;;  %v3084_v34 = vld [vmem:[%s7353_s9 + $0x2d8] sm:$0xff]  ;;  %v3067_v18 = vld [vmem:[%s7353_s9 + $0x250] sm:$0xff] }
 0x56c   :  { %3894 = vmatpush1.bf16.msra.mxu0 %v5187_v49  ;;  %3937 = vmatpush1.bf16.msra.mxu1 %v5189_v7  ;;  %v3112_v49 = vld [vmem:[%s7353_s9 + $0x3b8] sm:$0xff]  ;;  %v5259_v7 = vcombine.low %v3115_v23, %v3119_v15  ;;  %v3059_v15 = vld [vmem:[%s7353_s9 + $0x210] sm:$0xff] }
 0x56d   :  { %3895 = vmatprep.subr.bf16.mxu0 %v5180_v9  ;;  %3938 = vmatprep.subr.bf16.mxu1 %v5182_v22  ;;  %v5261_v9 = vcombine.low %v3116_v32, %v3120_v36  ;;  %v5252_v22 = vcombine.high %v3107_v57, %v3111_v63  ;;  %v5254_v26 = vcombine.high %v3108_v13, %v3112_v49  ;;  %v3063_v32 = vld [vmem:[%s7353_s9 + $0x230] sm:$0xff]  ;;  %v3060_v36 = vld [vmem:[%s7353_s9 + $0x218] sm:$0xff] }
 0x570   :  { %3896 = vmatpush1.bf16.msra.mxu0 %v5179_v11  ;;  %3939 = vmatpush1.bf16.msra.mxu1 %v5181_v12  ;;  %v3104_v11 = vld [vmem:[%s7353_s9 + $0x378] sm:$0xff]  ;;  %v5251_v12 = vcombine.low %v3107_v57, %v3111_v63  ;;  %v5203_v63 = vcombine.low %v3059_v15, %v3063_v32 }
 0x571   :  { %3897 = vmatprep.subr.bf16.mxu0 %v5172_v8  ;;  %3940 = vmatprep.subr.bf16.mxu1 %v5174_v31  ;;  %v5253_v8 = vcombine.low %v3108_v13, %v3112_v49  ;;  %v5244_v31 = vcombine.high %v3099_v19, %v3103_v6  ;;  %v5246_v39 = vcombine.high %v3100_v20, %v3104_v11  ;;  %v5803_v49 = vld [vmem:[#allocation5 + $0x74] ss:$8 sps:$4 sm:$0xff]  }
 0x574   :  { %3898 = vmatpush1.bf16.msra.mxu0 %v5171_v28  ;;  %3941 = vmatpush1.bf16.msra.mxu1 %v5173_v44  ;;  %v3096_v28 = vld [vmem:[%s7353_s9 + $0x338] sm:$0xff]  ;;  %v5243_v44 = vcombine.low %v3099_v19, %v3103_v6  ;;  %v5812_v19 = vld [vmem:[#allocation5 + $0x164] ss:$8 sps:$4 sm:$0xff]   ;;  %v5807_v6 = vld [vmem:[#allocation5 + $0x60] ss:$8 sps:$4 sm:$0xff]  }
 0x575   :  { %3899 = vmatprep.subr.bf16.mxu0 %v5164_v62  ;;  %3942 = vmatprep.subr.bf16.mxu1 %v5166_v40  ;;  %v5245_v62 = vcombine.low %v3100_v20, %v3104_v11  ;;  %v5236_v40 = vcombine.high %v3091_v29, %v3095_v33  ;;  %v5238_v41 = vcombine.high %v3092_v37, %v3096_v28  ;;  %v5810_v20 = vld [vmem:[#allocation5 + $0x160] ss:$8 sps:$4 sm:$0xff]   ;;  %v5815_v11 = vld [vmem:[#allocation5 + $0x54] ss:$8 sps:$4 sm:$0xff]  }
 0x578   :  { %3900 = vmatpush1.bf16.msra.mxu0 %v5163_v35  ;;  %3943 = vmatpush1.bf16.msra.mxu1 %v5165_v27  ;;  %v3088_v35 = vld [vmem:[%s7353_s9 + $0x2f8] sm:$0xff]  ;;  %v5235_v27 = vcombine.low %v3091_v29, %v3095_v33  ;;  %v5824_v29 = vld [vmem:[#allocation5 + $0x144] ss:$8 sps:$4 sm:$0xff]   ;;  %v5819_v33 = vld [vmem:[#allocation5 + $0x40] ss:$8 sps:$4 sm:$0xff]  }
 0x579   :  { %3901 = vmatprep.subr.bf16.mxu0 %v5156_v46  ;;  %3944 = vmatprep.subr.bf16.mxu1 %v5158_v25  ;;  %v5237_v46 = vcombine.low %v3092_v37, %v3096_v28  ;;  %v5228_v25 = vcombine.high %v3083_v42, %v3087_v45  ;;  %v5230_v47 = vcombine.high %v3084_v34, %v3088_v35  ;;  %v5827_v37 = vld [vmem:[#allocation5 + $0x34] ss:$8 sps:$4 sm:$0xff]  }
 0x57a   :  { %v5830_v28 = vld [vmem:[#allocation5 + $0x134] ss:$8 sps:$4 sm:$0xff]  }
 0x57c   :  { %3902 = vmatpush1.bf16.msra.mxu0 %v5155_v54  ;;  %3945 = vmatpush1.bf16.msra.mxu1 %v5157_v56  ;;  %v3080_v54 = vld [vmem:[%s7353_s9 + $0x2b8] sm:$0xff]  ;;  %v5227_v56 = vcombine.low %v3083_v42, %v3087_v45  ;;  %v5831_v42 = vld [vmem:[#allocation5 + $0x20] ss:$8 sps:$4 sm:$0xff]  }
 0x57d   :  { %3903 = vmatprep.subr.bf16.mxu0 %v5148_v59  ;;  %3946 = vmatprep.subr.bf16.mxu1 %v5150_v50  ;;  %v5229_v59 = vcombine.low %v3084_v34, %v3088_v35  ;;  %v5220_v50 = vcombine.high %v3075_v24, %v3079_v48  ;;  %v5222_v51 = vcombine.high %v3076_v53, %v3080_v54  ;;  %v5834_v45 = vld [vmem:[#allocation5 + $0x120] ss:$8 sps:$4 sm:$0xff]   ;;  %v5839_v34 = vld [vmem:[#allocation5 + $0x14] ss:$8 sps:$4 sm:$0xff]  }
 0x57e   :  { %v5842_v35 = vld [vmem:[#allocation5 + $0x114] ss:$8 sps:$4 sm:$0xff]  }
 0x580   :  { %3904 = vmatpush1.bf16.msra.mxu0 %v5147_v17  ;;  %3947 = vmatpush1.bf16.msra.mxu1 %v5149_v58  ;;  %v3072_v17 = vld [vmem:[%s7353_s9 + $0x278] sm:$0xff]  ;;  %v5219_v58 = vcombine.low %v3075_v24, %v3079_v48  ;;  %v5843_v24 = vld [vmem:[#allocation5] ss:$8 sps:$4 sm:$0xff]  }
 0x581   :  { %3905 = vmatprep.subr.bf16.mxu0 %v5140_v43  ;;  %3948 = vmatprep.subr.bf16.mxu1 %v5142_v1  ;;  %v5221_v43 = vcombine.low %v3076_v53, %v3080_v54  ;;  %v5212_v1 = vcombine.high %v3067_v18, %v3071_v60  ;;  %v5214_v23 = vcombine.high %v3068_v30, %v3072_v17  ;;  %v5846_v48 = vld [vmem:[#allocation5 + $0x100] ss:$8 sps:$4 sm:$0xff]   ;;  %v5851_v53 = vld [vmem:[#allocation5 + $0xf4] ss:$8 sps:$4 sm:$0xff]  }
 0x582   :  { %v5854_v54 = vld [vmem:[#allocation5 + $0x1f4] ss:$8 sps:$4 sm:$0xff]  }
 0x584   :  { %3906 = vmatpush1.bf16.msra.mxu0 %v5139_v61  ;;  %3949 = vmatpush1.bf16.msra.mxu1 %v5141_v4  ;;  %v3064_v61 = vld [vmem:[%s7353_s9 + $0x238] sm:$0xff]  ;;  %v5211_v4 = vcombine.low %v3067_v18, %v3071_v60  ;;  %v5855_v18 = vld [vmem:[#allocation5 + $0xe0] ss:$8 sps:$4 sm:$0xff]  }
 0x585   :  { %3907 = vmatprep.subr.bf16.mxu0 %v5260_v14  ;;  %3950 = vmatprep.subr.bf16.mxu1 %v5262_v5  ;;  %v5213_v14 = vcombine.low %v3068_v30, %v3072_v17  ;;  %v5204_v5 = vcombine.high %v3059_v15, %v3063_v32  ;;  %v5206_v57 = vcombine.high %v3060_v36, %v3064_v61  ;;  %v5858_v60 = vld [vmem:[#allocation5 + $0x1e0] ss:$8 sps:$4 sm:$0xff]   ;;  %v5863_v30 = vld [vmem:[#allocation5 + $0xd4] ss:$8 sps:$4 sm:$0xff]  }
 0x586   :  { %v5205_v13 = vcombine.low %v3060_v36, %v3064_v61  ;;  %v5866_v17 = vld [vmem:[#allocation5 + $0x1d4] ss:$8 sps:$4 sm:$0xff]   ;;  %v5867_v15 = vld [vmem:[#allocation5 + $0xc0] ss:$8 sps:$4 sm:$0xff]  }
 0x587   :  { %v5870_v32 = vld [vmem:[#allocation5 + $0x1c0] ss:$8 sps:$4 sm:$0xff]   ;;  %v5875_v36 = vld [vmem:[#allocation5 + $0xb4] ss:$8 sps:$4 sm:$0xff]  }
 0x588   :  { %3908 = vmatpush2.bf16.msra.mxu0 %v5259_v7  ;;  %3951 = vmatpush2.bf16.msra.mxu1 %v5261_v9  ;;  %v5806_v7 = vld [vmem:[#allocation5 + $0x174] ss:$8 sps:$4 sm:$0xff]   ;;  %v5801_v9 = vld [vmem:[#allocation5 + $0x70] ss:$8 sps:$4 sm:$0xff]  }
 0x589   :  { %3909 = vmatprep.subr.bf16.mxu0 %v5252_v22  ;;  %3952 = vmatprep.subr.bf16.mxu1 %v5254_v26  ;;  %v5804_v22 = vld [vmem:[#allocation5 + $0x170] ss:$8 sps:$4 sm:$0xff]   ;;  %v5809_v26 = vld [vmem:[#allocation5 + $0x64] ss:$8 sps:$4 sm:$0xff]   ;;  %v5878_v61 = vld [vmem:[#allocation5 + $0x1b4] ss:$8 sps:$4 sm:$0xff]  }
 0x58c   :  { %3910 = vmatpush2.bf16.msra.mxu0 %v5251_v12  ;;  %3953 = vmatpush2.bf16.msra.mxu1 %v5253_v8  ;;  %v5818_v12 = vld [vmem:[#allocation5 + $0x154] ss:$8 sps:$4 sm:$0xff]   ;;  %v5813_v8 = vld [vmem:[#allocation5 + $0x50] ss:$8 sps:$4 sm:$0xff]  }
 0x58d   :  { %3911 = vmatprep.subr.bf16.mxu0 %v5244_v31  ;;  %3954 = vmatprep.subr.bf16.mxu1 %v5246_v39  ;;  %v5816_v31 = vld [vmem:[#allocation5 + $0x150] ss:$8 sps:$4 sm:$0xff]   ;;  %v5821_v39 = vld [vmem:[#allocation5 + $0x44] ss:$8 sps:$4 sm:$0xff]  }
 0x590   :  { %3912 = vmatpush2.bf16.msra.mxu0 %v5243_v44  ;;  %3955 = vmatpush2.bf16.msra.mxu1 %v5245_v62  ;;  %v5825_v44 = vld [vmem:[#allocation5 + $0x30] ss:$8 sps:$4 sm:$0xff]  }
 0x591   :  { %3913 = vmatprep.subr.bf16.mxu0 %v5236_v40  ;;  %3956 = vmatprep.subr.bf16.mxu1 %v5238_v41  ;;  %v5828_v62 = vld [vmem:[#allocation5 + $0x130] ss:$8 sps:$4 sm:$0xff]   ;;  %v5833_v40 = vld [vmem:[#allocation5 + $0x24] ss:$8 sps:$4 sm:$0xff]  }
 0x592   :  { %v5836_v41 = vld [vmem:[#allocation5 + $0x124] ss:$8 sps:$4 sm:$0xff]  }
 0x594   :  { %3914 = vmatpush2.bf16.msra.mxu0 %v5235_v27  ;;  %3957 = vmatpush2.bf16.msra.mxu1 %v5237_v46  ;;  %v5837_v27 = vld [vmem:[#allocation5 + $0x10] ss:$8 sps:$4 sm:$0xff]  }
 0x595   :  { %3915 = vmatprep.subr.bf16.mxu0 %v5228_v25  ;;  %3958 = vmatprep.subr.bf16.mxu1 %v5230_v47  ;;  %v5840_v46 = vld [vmem:[#allocation5 + $0x110] ss:$8 sps:$4 sm:$0xff]   ;;  %v5845_v25 = vld [vmem:[#allocation5 + $0x4] ss:$8 sps:$4 sm:$0xff]  }
 0x596   :  { %v5848_v47 = vld [vmem:[#allocation5 + $0x104] ss:$8 sps:$4 sm:$0xff]  }
 0x598   :  { %3916 = vmatpush2.bf16.msra.mxu0 %v5227_v56  ;;  %3959 = vmatpush2.bf16.msra.mxu1 %v5229_v59  ;;  %v5849_v56 = vld [vmem:[#allocation5 + $0xf0] ss:$8 sps:$4 sm:$0xff]  }
 0x599   :  { %3917 = vmatprep.subr.bf16.mxu0 %v5220_v50  ;;  %3960 = vmatprep.subr.bf16.mxu1 %v5222_v51  ;;  %v5852_v59 = vld [vmem:[#allocation5 + $0x1f0] ss:$8 sps:$4 sm:$0xff]   ;;  %v5857_v50 = vld [vmem:[#allocation5 + $0xe4] ss:$8 sps:$4 sm:$0xff]  }
 0x59a   :  { %v5860_v51 = vld [vmem:[#allocation5 + $0x1e4] ss:$8 sps:$4 sm:$0xff]  }
 0x59c   :  { %3918 = vmatpush2.bf16.msra.mxu0 %v5219_v58  ;;  %3961 = vmatpush2.bf16.msra.mxu1 %v5221_v43  ;;  %v5861_v58 = vld [vmem:[#allocation5 + $0xd0] ss:$8 sps:$4 sm:$0xff]  }
 0x59d   :  { %3919 = vmatprep.subr.bf16.mxu0 %v5212_v1  ;;  %3962 = vmatprep.subr.bf16.mxu1 %v5214_v23  ;;  %v5864_v43 = vld [vmem:[#allocation5 + $0x1d0] ss:$8 sps:$4 sm:$0xff]   ;;  %v5869_v1 = vld [vmem:[#allocation5 + $0xc4] ss:$8 sps:$4 sm:$0xff]  }
 0x59e   :  { %v5872_v23 = vld [vmem:[#allocation5 + $0x1c4] ss:$8 sps:$4 sm:$0xff]  }
 0x5a0   :  { %3920 = vmatpush2.bf16.msra.mxu0 %v5211_v4  ;;  %3963 = vmatpush2.bf16.msra.mxu1 %v5213_v14  ;;  %v5873_v4 = vld [vmem:[#allocation5 + $0xb0] ss:$8 sps:$4 sm:$0xff]  }
 0x5a1   :  { %3921 = vmatprep.subr.bf16.mxu0 %v5204_v5  ;;  %3964 = vmatprep.subr.bf16.mxu1 %v5206_v57  ;;  %v5876_v14 = vld [vmem:[#allocation5 + $0x1b0] ss:$8 sps:$4 sm:$0xff]   ;;  %v5881_v5 = vld [vmem:[#allocation5 + $0xa4] ss:$8 sps:$4 sm:$0xff]  }
 0x5a2   :  { %v5884_v57 = vld [vmem:[#allocation5 + $0x1a4] ss:$8 sps:$4 sm:$0xff]  }
 0x5a4   :  { %3922 = vmatpush2.bf16.msra.mxu0 %v5203_v63  ;;  %3965 = vmatpush2.bf16.msra.mxu1 %v5205_v13  ;;  %v5879_v63 = vld [vmem:[#allocation5 + $0xa0] ss:$8 sps:$4 sm:$0xff]  }
 0x5a5   :  { %4777 = vmatprep.subr.bf16.mxu0 %v5803_v49  ;;  %4820 = vmatprep.subr.bf16.mxu1 %v5806_v7  ;;  %v5882_v13 = vld [vmem:[#allocation5 + $0x1a0] ss:$8 sps:$4 sm:$0xff]   ;;  %v5887_v49 = vld [vmem:[#allocation5 + $0x94] ss:$8 sps:$4 sm:$0xff]  }
 0x5a6   :  { %v5890_v7 = vld [vmem:[#allocation5 + $0x194] ss:$8 sps:$4 sm:$0xff]  }
 0x5a7   :  { %3924 = vmatmul.mubr.bf16.vlgmr.msra.gmra.mxu0 %v7111_v55  ;;  %3967 = vmatmul.mubr.bf16.vlgmr.msra.gmra.mxu1 %v7111_v55  ;;  %v5822_v55 = vld [vmem:[#allocation5 + $0x140] ss:$8 sps:$4 sm:$0xff]  }
 0x5a8   :  { %4778 = vmatpush1.bf16.msra.mxu0 %v5801_v9  ;;  %4821 = vmatpush1.bf16.msra.mxu1 %v5804_v22  ;;  %v5885_v9 = vld [vmem:[#allocation5 + $0x90] ss:$8 sps:$4 sm:$0xff]  }
 0x5a9   :  { %4779 = vmatprep.subr.bf16.mxu0 %v5809_v26  ;;  %4822 = vmatprep.subr.bf16.mxu1 %v5812_v19  ;;  %v5888_v22 = vld [vmem:[#allocation5 + $0x190] ss:$8 sps:$4 sm:$0xff]   ;;  %v5893_v26 = vld [vmem:[#allocation5 + $0x84] ss:$8 sps:$4 sm:$0xff]  }
 0x5aa   :  { %v5896_v19 = vld [vmem:[#allocation5 + $0x184] ss:$8 sps:$4 sm:$0xff]  }
 0x5ac   :  { %4780 = vmatpush1.bf16.msra.mxu0 %v5807_v6  ;;  %4823 = vmatpush1.bf16.msra.mxu1 %v5810_v20  ;;  %v5891_v6 = vld [vmem:[#allocation5 + $0x80] ss:$8 sps:$4 sm:$0xff]  }
 0x5ad   :  { %4781 = vmatprep.subr.bf16.mxu0 %v5815_v11  ;;  %4824 = vmatprep.subr.bf16.mxu1 %v5818_v12  ;;  %v5894_v20 = vld [vmem:[#allocation5 + $0x180] ss:$8 sps:$4 sm:$0xff]   ;;  %v5899_v11 = vld [vmem:[#allocation5 + $0x274] ss:$8 sps:$4 sm:$0xff]  }
 0x5ae   :  { %v5902_v12 = vld [vmem:[#allocation5 + $0x374] ss:$8 sps:$4 sm:$0xff]  }
 0x5b0   :  { %4782 = vmatpush1.bf16.msra.mxu0 %v5813_v8  ;;  %4825 = vmatpush1.bf16.msra.mxu1 %v5816_v31  ;;  %v7286_v8 = vsub.s32 3, %v6802_v10  ;;  %v7291_v31 = vld [vmem:[%s7356_s12] sm:$0xff] }
 0x5b1   :  { %4783 = vmatprep.subr.bf16.mxu0 %v5821_v39  ;;  %4826 = vmatprep.subr.bf16.mxu1 %v5824_v29 }
 0x5b4   :  { %4784 = vmatpush1.bf16.msra.mxu0 %v5819_v33  ;;  %4827 = vmatpush1.bf16.msra.mxu1 %v5822_v55  ;;  %v3132_v33 = vrot.slane %v7291_v31, %v7070_v38  ;;  %v3140_v55 = vrot.slane %v7291_v31, %v7286_v8 }
 0x5b5   :  { %4785 = vmatprep.subr.bf16.mxu0 %v5827_v37  ;;  %4828 = vmatprep.subr.bf16.mxu1 %v5830_v28  ;;  %v3128_v37 = vrot.slane %v7291_v31, %v6805_v16  ;;  %v3136_v28 = vrot.slane %v7291_v31, %v7073_v52 }
 0x5b8   :  { %4786 = vmatpush1.bf16.msra.mxu0 %v5825_v44  ;;  %4829 = vmatpush1.bf16.msra.mxu1 %v5828_v62 }
 0x5b9   :  { %4787 = vmatprep.subr.bf16.mxu0 %v5833_v40  ;;  %4830 = vmatprep.subr.bf16.mxu1 %v5836_v41 }
 0x5bc   :  { %4788 = vmatpush1.bf16.msra.mxu0 %v5831_v42  ;;  %4831 = vmatpush1.bf16.msra.mxu1 %v5834_v45 }
 0x5bd   :  { %4789 = vmatprep.subr.bf16.mxu0 %v5839_v34  ;;  %4832 = vmatprep.subr.bf16.mxu1 %v5842_v35 }
 0x5c0   :  { %4790 = vmatpush1.bf16.msra.mxu0 %v5837_v27  ;;  %4833 = vmatpush1.bf16.msra.mxu1 %v5840_v46 }
 0x5c1   :  { %4791 = vmatprep.subr.bf16.mxu0 %v5845_v25  ;;  %4834 = vmatprep.subr.bf16.mxu1 %v5848_v47 }
 0x5c4   :  { %4792 = vmatpush1.bf16.msra.mxu0 %v5843_v24  ;;  %4835 = vmatpush1.bf16.msra.mxu1 %v5846_v48 }
 0x5c5   :  { %4793 = vmatprep.subr.bf16.mxu0 %v5851_v53  ;;  %4836 = vmatprep.subr.bf16.mxu1 %v5854_v54 }
 0x5c8   :  { %4794 = vmatpush2.bf16.msra.mxu0 %v5849_v56  ;;  %4837 = vmatpush2.bf16.msra.mxu1 %v5852_v59 }
 0x5c9   :  { %4795 = vmatprep.subr.bf16.mxu0 %v5857_v50  ;;  %4838 = vmatprep.subr.bf16.mxu1 %v5860_v51 }
 0x5cc   :  { %4796 = vmatpush2.bf16.msra.mxu0 %v5855_v18  ;;  %4839 = vmatpush2.bf16.msra.mxu1 %v5858_v60  ;;  %v5897_v60 = vld [vmem:[#allocation5 + $0x270] ss:$8 sps:$4 sm:$0xff]  }
 0x5cd   :  { %4797 = vmatprep.subr.bf16.mxu0 %v5863_v30  ;;  %4840 = vmatprep.subr.bf16.mxu1 %v5866_v17  ;;  %v5900_v30 = vld [vmem:[#allocation5 + $0x370] ss:$8 sps:$4 sm:$0xff]  }
 0x5d0   :  { %4798 = vmatpush2.bf16.msra.mxu0 %v5861_v58  ;;  %4841 = vmatpush2.bf16.msra.mxu1 %v5864_v43  ;;  %v5905_v43 = vld [vmem:[#allocation5 + $0x264] ss:$8 sps:$4 sm:$0xff]  }
 0x5d1   :  { %4799 = vmatprep.subr.bf16.mxu0 %v5869_v1  ;;  %4842 = vmatprep.subr.bf16.mxu1 %v5872_v23  ;;  %v5908_v1 = vld [vmem:[#allocation5 + $0x364] ss:$8 sps:$4 sm:$0xff]   ;;  %v5903_v23 = vld [vmem:[#allocation5 + $0x260] ss:$8 sps:$4 sm:$0xff]  }
 0x5d4   :  { %4800 = vmatpush2.bf16.msra.mxu0 %v5867_v15  ;;  %4843 = vmatpush2.bf16.msra.mxu1 %v5870_v32  ;;  %v5906_v15 = vld [vmem:[#allocation5 + $0x360] ss:$8 sps:$4 sm:$0xff]   ;;  %v5911_v32 = vld [vmem:[#allocation5 + $0x254] ss:$8 sps:$4 sm:$0xff]  }
 0x5d5   :  { %4801 = vmatprep.subr.bf16.mxu0 %v5875_v36  ;;  %4844 = vmatprep.subr.bf16.mxu1 %v5878_v61  ;;  %v5914_v36 = vld [vmem:[#allocation5 + $0x354] ss:$8 sps:$4 sm:$0xff]   ;;  %v5909_v61 = vld [vmem:[#allocation5 + $0x250] ss:$8 sps:$4 sm:$0xff]  }
 0x5d8   :  { %4802 = vmatpush2.bf16.msra.mxu0 %v5873_v4  ;;  %4845 = vmatpush2.bf16.msra.mxu1 %v5876_v14  ;;  %v5912_v4 = vld [vmem:[#allocation5 + $0x350] ss:$8 sps:$4 sm:$0xff]   ;;  %v5917_v14 = vld [vmem:[#allocation5 + $0x244] ss:$8 sps:$4 sm:$0xff]  }
 0x5d9   :  { %4803 = vmatprep.subr.bf16.mxu0 %v5881_v5  ;;  %4846 = vmatprep.subr.bf16.mxu1 %v5884_v57  ;;  %v5920_v5 = vld [vmem:[#allocation5 + $0x344] ss:$8 sps:$4 sm:$0xff]   ;;  %v5915_v57 = vld [vmem:[#allocation5 + $0x240] ss:$8 sps:$4 sm:$0xff]  }
 0x5dc   :  { %4804 = vmatpush2.bf16.msra.mxu0 %v5879_v63  ;;  %4847 = vmatpush2.bf16.msra.mxu1 %v5882_v13  ;;  %v5918_v63 = vld [vmem:[#allocation5 + $0x340] ss:$8 sps:$4 sm:$0xff]   ;;  %v5923_v13 = vld [vmem:[#allocation5 + $0x234] ss:$8 sps:$4 sm:$0xff]  }
 0x5dd   :  { %4805 = vmatprep.subr.bf16.mxu0 %v5887_v49  ;;  %4848 = vmatprep.subr.bf16.mxu1 %v5890_v7  ;;  %v5926_v49 = vld [vmem:[#allocation5 + $0x334] ss:$8 sps:$4 sm:$0xff]   ;;  %v5921_v7 = vld [vmem:[#allocation5 + $0x230] ss:$8 sps:$4 sm:$0xff]  }
 0x5e0   :  { %4806 = vmatpush2.bf16.msra.mxu0 %v5885_v9  ;;  %4849 = vmatpush2.bf16.msra.mxu1 %v5888_v22  ;;  %v5924_v9 = vld [vmem:[#allocation5 + $0x330] ss:$8 sps:$4 sm:$0xff]   ;;  %v5929_v22 = vld [vmem:[#allocation5 + $0x224] ss:$8 sps:$4 sm:$0xff]  }
 0x5e1   :  { %4807 = vmatprep.subr.bf16.mxu0 %v5893_v26  ;;  %4850 = vmatprep.subr.bf16.mxu1 %v5896_v19  ;;  %v5932_v26 = vld [vmem:[#allocation5 + $0x324] ss:$8 sps:$4 sm:$0xff]   ;;  %v5927_v19 = vld [vmem:[#allocation5 + $0x220] ss:$8 sps:$4 sm:$0xff]  }
 0x5e4   :  { %4808 = vmatpush2.bf16.msra.mxu0 %v5891_v6  ;;  %4851 = vmatpush2.bf16.msra.mxu1 %v5894_v20  ;;  %v5930_v6 = vld [vmem:[#allocation5 + $0x320] ss:$8 sps:$4 sm:$0xff]   ;;  %v5935_v20 = vld [vmem:[#allocation5 + $0x214] ss:$8 sps:$4 sm:$0xff]  }
 0x5e5   :  { %4863 = vmatprep.subr.bf16.mxu0 %v5899_v11  ;;  %4906 = vmatprep.subr.bf16.mxu1 %v5902_v12  ;;  %v5938_v11 = vld [vmem:[#allocation5 + $0x314] ss:$8 sps:$4 sm:$0xff]   ;;  %v5933_v12 = vld [vmem:[#allocation5 + $0x210] ss:$8 sps:$4 sm:$0xff]  }
 0x627   :  { %v3839_v39 = vpop.f32.mrf.mxu0  ;;  %v3882_v29 = vpop.f32.mrf.mxu1 }
 0x628   :  { %v3840_v27 = vadd.f32 %v3839_v39, %v3128_v37  ;;  %v3883_v46 = vadd.f32 %v3882_v29, %v3136_v28  ;;  %v5936_v39 = vld [vmem:[#allocation5 + $0x310] ss:$8 sps:$4 sm:$0xff]   ;;  %v5941_v29 = vld [vmem:[#allocation5 + $0x204] ss:$8 sps:$4 sm:$0xff]  }
 0x629   :  { %v3841_v44 = vpop.f32.mrf.mxu0  ;;  %v3884_v62 = vpop.f32.mrf.mxu1 }
 0x62a   :  { %v3842_v42 = vadd.f32 %v3841_v44, %v3132_v33  ;;  %v3885_v45 = vadd.f32 %v3884_v62, %v3140_v55  ;;  %v3977_v59 = vmax.f32 %v3840_v27, 0.0  ;;  %v3979_v50 = vmax.f32 %v3883_v46, 0.0  ;;  %v5950_v44 = vld [vmem:[#allocation5 + $0x3f4] ss:$8 sps:$4 sm:$0xff]   ;;  %v5945_v62 = vld [vmem:[#allocation5 + $0x2f0] ss:$8 sps:$4 sm:$0xff]  }
 0x62b   :  { %v3843_v40 = vpop.f32.mrf.mxu0  ;;  %v3886_v41 = vpop.f32.mrf.mxu1  ;;  %v5962_v27 = vld [vmem:[#allocation5 + $0x3d4] ss:$8 sps:$4 sm:$0xff]   ;;  %v5957_v46 = vld [vmem:[#allocation5 + $0x2d0] ss:$8 sps:$4 sm:$0xff]  }
 0x62c   :  { %v3844_v34 = vadd.f32 %v3843_v40, %v3128_v37  ;;  %v3887_v35 = vadd.f32 %v3886_v41, %v3136_v28  ;;  %v3978_v16 = vmax.f32 %v3842_v42, 0.0  ;;  %v3980_v54 = vmax.f32 %v3885_v45, 0.0  ;;  %v5942_v37 = vld [vmem:[#allocation5 + $0x300] ss:$8 sps:$4 sm:$0xff]   ;;  %v5947_v28 = vld [vmem:[#allocation5 + $0x2f4] ss:$8 sps:$4 sm:$0xff]  }
 0x62d   :  { %v3845_v38 = vpop.f32.mrf.mxu0  ;;  %v3888_v25 = vpop.f32.mrf.mxu1  ;;  %v5948_v40 = vld [vmem:[#allocation5 + $0x3f0] ss:$8 sps:$4 sm:$0xff]   ;;  %v5953_v41 = vld [vmem:[#allocation5 + $0x2e4] ss:$8 sps:$4 sm:$0xff]   ;;  %v5951_v45 = vld [vmem:[#allocation5 + $0x2e0] ss:$8 sps:$4 sm:$0xff]  }
 0x62e   :  { %v3846_v47 = vadd.f32 %v3845_v38, %v3132_v33  ;;  %v3889_v24 = vadd.f32 %v3888_v25, %v3140_v55  ;;  %v3985_v48 = vmax.f32 %v3844_v34, 0.0  ;;  %v3987_v53 = vmax.f32 %v3887_v35, 0.0  ;;  %v5944_v33 = vld [vmem:[#allocation5 + $0x304] ss:$8 sps:$4 sm:$0xff]   ;;  %v5939_v55 = vld [vmem:[#allocation5 + $0x200] ss:$8 sps:$4 sm:$0xff]  }
 0x62f   :  { %v5956_v42 = vld [vmem:[#allocation5 + $0x3e4] ss:$8 sps:$4 sm:$0xff]   ;;  %v5954_v34 = vld [vmem:[#allocation5 + $0x3e0] ss:$8 sps:$4 sm:$0xff]   ;;  %v5959_v35 = vld [vmem:[#allocation5 + $0x2d4] ss:$8 sps:$4 sm:$0xff]  }
 0x630   :  { %v3986_v56 = vmax.f32 %v3846_v47, 0.0  ;;  %v3988_v52 = vmax.f32 %v3889_v24, 0.0  ;;  %v4121_v17 = vpack.c.bf16 %v3985_v48, %v3977_v59  ;;  %v4123_v58 = vpack.c.bf16 %v3987_v53, %v3979_v50  ;;  %v5960_v38 = vld [vmem:[#allocation5 + $0x3d0] ss:$8 sps:$4 sm:$0xff]   ;;  %v5965_v25 = vld [vmem:[#allocation5 + $0x2c4] ss:$8 sps:$4 sm:$0xff]  }
 0x631   :  { %v5968_v47 = vld [vmem:[#allocation5 + $0x3c4] ss:$8 sps:$4 sm:$0xff]   ;;  %v5963_v24 = vld [vmem:[#allocation5 + $0x2c0] ss:$8 sps:$4 sm:$0xff]   ;;  %v5971_v53 = vld [vmem:[#allocation5 + $0x2b4] ss:$8 sps:$4 sm:$0xff]  }
 0x632   :  { %v4122_v51 = vpack.c.bf16 %v3986_v56, %v3978_v16  ;;  %v4124_v18 = vpack.c.bf16 %v3988_v52, %v3980_v54  ;;  %v5966_v48 = vld [vmem:[#allocation5 + $0x3c0] ss:$8 sps:$4 sm:$0xff]   ;;  %v5974_v16 = vld [vmem:[#allocation5 + $0x3b4] ss:$8 sps:$4 sm:$0xff]   ;;  %v5969_v54 = vld [vmem:[#allocation5 + $0x2b0] ss:$8 sps:$4 sm:$0xff]  }
 0x633   :  { %v5972_v56 = vld [vmem:[#allocation5 + $0x3b0] ss:$8 sps:$4 sm:$0xff]   ;;  %v5977_v52 = vld [vmem:[#allocation5 + $0x2a4] ss:$8 sps:$4 sm:$0xff]   ;;  %v7302_v50 = vsub.s32 5, %v6802_v10 }
 0x634   :  { %4809 = vmatprep.mubr.bf16.mxu0 %v4122_v51  ;;  %4852 = vmatprep.mubr.bf16.mxu1 %v4124_v18  ;;  %v5980_v59 = vld [vmem:[#allocation5 + $0x3a4] ss:$8 sps:$4 sm:$0xff]   ;;  %v3155_v51 = vsub.s32 7, %v6802_v10  ;;  %v7306_v18 = vsub.s32 4, %v6802_v10 }
 0x635   :  { %4810 = vmatmul.mubr.bf16.vlgmr.msra.gmra.mxu0 %v4121_v17  ;;  %4853 = vmatmul.mubr.bf16.vlgmr.msra.gmra.mxu1 %v4123_v58  ;;  %v5978_v17 = vld [vmem:[#allocation5 + $0x3a0] ss:$8 sps:$4 sm:$0xff]  }
 0x636   :  { %4864 = vmatpush1.bf16.msra.mxu0 %v5897_v60  ;;  %4907 = vmatpush1.bf16.msra.mxu1 %v5900_v30  ;;  %v3151_v60 = vsub.s32 6, %v6802_v10  ;;  %v5975_v30 = vld [vmem:[#allocation5 + $0x2a0] ss:$8 sps:$4 sm:$0xff]  }
 0x637   :  { %4865 = vmatprep.subr.bf16.mxu0 %v5905_v43  ;;  %4908 = vmatprep.subr.bf16.mxu1 %v5908_v1  ;;  %v5983_v1 = vld [vmem:[#allocation5 + $0x294] ss:$8 sps:$4 sm:$0xff]  }
 0x638   :  { %v3152_v10 = vrot.slane %v7291_v31, %v3151_v60 }
 0x63a   :  { %4866 = vmatpush1.bf16.msra.mxu0 %v5903_v23  ;;  %4909 = vmatpush1.bf16.msra.mxu1 %v5906_v15  ;;  %v5986_v23 = vld [vmem:[#allocation5 + $0x394] ss:$8 sps:$4 sm:$0xff]   ;;  %v3148_v15 = vrot.slane %v7291_v31, %v7302_v50 }
 0x63b   :  { %4867 = vmatprep.subr.bf16.mxu0 %v5911_v32  ;;  %4910 = vmatprep.subr.bf16.mxu1 %v5914_v36  ;;  %v3156_v32 = vrot.slane %v7291_v31, %v3155_v51  ;;  %v3144_v36 = vrot.slane %v7291_v31, %v7306_v18 }
 0x63e   :  { %4868 = vmatpush1.bf16.msra.mxu0 %v5909_v61  ;;  %4911 = vmatpush1.bf16.msra.mxu1 %v5912_v4 }
 0x63f   :  { %4869 = vmatprep.subr.bf16.mxu0 %v5917_v14  ;;  %4912 = vmatprep.subr.bf16.mxu1 %v5920_v5  ;;  %v5981_v14 = vld [vmem:[#allocation5 + $0x290] ss:$8 sps:$4 sm:$0xff]  }
 0x640   :  { %v5984_v5 = vld [vmem:[#allocation5 + $0x390] ss:$8 sps:$4 sm:$0xff]  }
 0x642   :  { %4870 = vmatpush1.bf16.msra.mxu0 %v5915_v57  ;;  %4913 = vmatpush1.bf16.msra.mxu1 %v5918_v63 }
 0x643   :  { %4871 = vmatprep.subr.bf16.mxu0 %v5923_v13  ;;  %4914 = vmatprep.subr.bf16.mxu1 %v5926_v49  ;;  %v5989_v13 = vld [vmem:[#allocation5 + $0x284] ss:$8 sps:$4 sm:$0xff]  }
 0x644   :  { %v5992_v49 = vld [vmem:[#allocation5 + $0x384] ss:$8 sps:$4 sm:$0xff]  }
 0x646   :  { %4872 = vmatpush1.bf16.msra.mxu0 %v5921_v7  ;;  %4915 = vmatpush1.bf16.msra.mxu1 %v5924_v9 }
 0x647   :  { %4873 = vmatprep.subr.bf16.mxu0 %v5929_v22  ;;  %4916 = vmatprep.subr.bf16.mxu1 %v5932_v26 }
 0x64a   :  { %4874 = vmatpush1.bf16.msra.mxu0 %v5927_v19  ;;  %4917 = vmatpush1.bf16.msra.mxu1 %v5930_v6 }
 0x64b   :  { %4875 = vmatprep.subr.bf16.mxu0 %v5935_v20  ;;  %4918 = vmatprep.subr.bf16.mxu1 %v5938_v11 }
 0x64e   :  { %4876 = vmatpush1.bf16.msra.mxu0 %v5933_v12  ;;  %4919 = vmatpush1.bf16.msra.mxu1 %v5936_v39  ;;  %v5987_v39 = vld [vmem:[#allocation5 + $0x280] ss:$8 sps:$4 sm:$0xff]  }
 0x64f   :  { %4877 = vmatprep.subr.bf16.mxu0 %v5941_v29  ;;  %4920 = vmatprep.subr.bf16.mxu1 %v5944_v33  ;;  %v5990_v29 = vld [vmem:[#allocation5 + $0x380] ss:$8 sps:$4 sm:$0xff]  }
 0x652   :  { %4878 = vmatpush1.bf16.msra.mxu0 %v5939_v55  ;;  %4921 = vmatpush1.bf16.msra.mxu1 %v5942_v37 }
 0x653   :  { %4879 = vmatprep.subr.bf16.mxu0 %v5947_v28  ;;  %4922 = vmatprep.subr.bf16.mxu1 %v5950_v44 }
 0x656   :  { %4880 = vmatpush2.bf16.msra.mxu0 %v5945_v62  ;;  %4923 = vmatpush2.bf16.msra.mxu1 %v5948_v40 }
 0x657   :  { %4881 = vmatprep.subr.bf16.mxu0 %v5953_v41  ;;  %4924 = vmatprep.subr.bf16.mxu1 %v5956_v42 }
 0x65a   :  { %4882 = vmatpush2.bf16.msra.mxu0 %v5951_v45  ;;  %4925 = vmatpush2.bf16.msra.mxu1 %v5954_v34 }
 0x65b   :  { %4883 = vmatprep.subr.bf16.mxu0 %v5959_v35  ;;  %4926 = vmatprep.subr.bf16.mxu1 %v5962_v27 }
 0x65e   :  { %4884 = vmatpush2.bf16.msra.mxu0 %v5957_v46  ;;  %4927 = vmatpush2.bf16.msra.mxu1 %v5960_v38 }
 0x65f   :  { %4885 = vmatprep.subr.bf16.mxu0 %v5965_v25  ;;  %4928 = vmatprep.subr.bf16.mxu1 %v5968_v47  ;;  %v7318_v47 = vld [vmem:[%s7355_s11] sm:$0x3f] }
 0x662   :  { %4886 = vmatpush2.bf16.msra.mxu0 %v5963_v24  ;;  %4929 = vmatpush2.bf16.msra.mxu1 %v5966_v48  ;;  %v4132_v24 = vrot.slane %v7318_v47, %v7286_v8  ;;  %v7325_v48 = vld [vmem:[%s7355_s11 + $0x8] sm:$0x3f]  ;;  %s6140_s11 = smov [#allocation7]  }
 0x663   :  { %4887 = vmatprep.subr.bf16.mxu0 %v5971_v53  ;;  %4930 = vmatprep.subr.bf16.mxu1 %v5974_v16  ;;  %v4136_v53 = vrot.slane %v7325_v48, %v7286_v8  ;;  %s5018_s8 = sshll.u32 %s6140_s11, 4  ;;  %s5019_s8 = int_to_ptr.vmem [resolvable:$true] %s5018_s8 }
 0x664   :  { %s6107_s21 = scalar_lea.vmem %s5019_s8, 512  ;;  %p6112_p11 = scmp.lt.s32.totalorder %s5019_s8, %s5019_s8 }
 0x665   :  { %p6108_p10 = scmp.ne.s32.totalorder %s5019_s8, %s6107_s21  ;;  %p6113_p12 = scmp.lt.s32.totalorder %s6107_s21, %s6107_s21 }
 0x666   :  { %4888 = vmatpush2.bf16.msra.mxu0 %v5969_v54  ;;  %4931 = vmatpush2.bf16.msra.mxu1 %v5972_v56 }
 0x667   :  { %v3925_v58 = vpop.f32.mrf.mxu0  ;;  %v3968_v43 = vpop.f32.mrf.mxu1  ;;  %4889 = vmatprep.subr.bf16.mxu0 %v5977_v52  ;;  %4932 = vmatprep.subr.bf16.mxu1 %v5980_v59  ;;  %p6114_p13 = por %p6113_p12, %p6112_p11 }
 0x668   :  { %v3926_v19 = vadd.f32 %v3925_v58, %v3144_v36  ;;  %v3969_v6 = vadd.f32 %v3968_v43, %v3152_v10 }
 0x669   :  { %v3927_v61 = vpop.f32.mrf.mxu0  ;;  %v3970_v4 = vpop.f32.mrf.mxu1  ;;  %p6115_p0 = pnand %p6114_p13, %p6108_p10 }
 0x66a   :  { %4890 = vmatpush2.bf16.msra.mxu0 %v5975_v30  ;;  %4933 = vmatpush2.bf16.msra.mxu1 %v5978_v17  ;;  %v3928_v7 = vadd.f32 %v3927_v61, %v3148_v15  ;;  %v3971_v9 = vadd.f32 %v3970_v4, %v3156_v32  ;;  %v3981_v40 = vmax.f32 %v3926_v19, 0.0  ;;  %v3983_v41 = vmax.f32 %v3969_v6, 0.0 }
 0x66b   :  { %v3929_v57 = vpop.f32.mrf.mxu0  ;;  %v3972_v63 = vpop.f32.mrf.mxu1  ;;  %4891 = vmatprep.subr.bf16.mxu0 %v5983_v1  ;;  %4934 = vmatprep.subr.bf16.mxu1 %v5986_v23 }
 0x66c   :  { %v3930_v22 = vadd.f32 %v3929_v57, %v3144_v36  ;;  %v3973_v26 = vadd.f32 %v3972_v63, %v3152_v10  ;;  %v3982_v37 = vmax.f32 %v3928_v7, 0.0  ;;  %v3984_v28 = vmax.f32 %v3971_v9, 0.0 }
 0x66d   :  { %v3931_v20 = vpop.f32.mrf.mxu0  ;;  %v3974_v31 = vpop.f32.mrf.mxu1 }
 0x66e   :  { %v3932_v11 = vadd.f32 %v3931_v20, %v3148_v15  ;;  %v3975_v12 = vadd.f32 %v3974_v31, %v3156_v32  ;;  %4892 = vmatpush2.bf16.msra.mxu0 %v5981_v14  ;;  %4935 = vmatpush2.bf16.msra.mxu1 %v5984_v5  ;;  %v3989_v33 = vmax.f32 %v3930_v22, 0.0  ;;  %v3991_v55 = vmax.f32 %v3973_v26, 0.0 }
 0x66f   :  { %4893 = vmatprep.subr.bf16.mxu0 %v5989_v13  ;;  %4936 = vmatprep.subr.bf16.mxu1 %v5992_v49 }
 0x670   :  { %v3990_v44 = vmax.f32 %v3932_v11, 0.0  ;;  %v3992_v62 = vmax.f32 %v3975_v12, 0.0  ;;  %v4125_v34 = vpack.c.bf16 %v3989_v33, %v3981_v40  ;;  %v4127_v35 = vpack.c.bf16 %v3991_v55, %v3983_v41 }
 0x672   :  { %v4126_v42 = vpack.c.bf16 %v3990_v44, %v3982_v37  ;;  %v4128_v45 = vpack.c.bf16 %v3992_v62, %v3984_v28  ;;  %4894 = vmatpush2.bf16.msra.mxu0 %v5987_v39  ;;  %4937 = vmatpush2.bf16.msra.mxu1 %v5990_v29 }
 0x674   :  { %4895 = vmatprep.mubr.bf16.mxu0 %v4126_v42  ;;  %4938 = vmatprep.mubr.bf16.mxu1 %v4128_v45 }
 0x675   :  { %4896 = vmatmul.mubr.bf16.vlgmr.msra.gmra.mxu0 %v4125_v34  ;;  %4939 = vmatmul.mubr.bf16.vlgmr.msra.gmra.mxu1 %v4127_v35 }
 0x6f5   :  { %v4811_v27 = vpop.f32.mrf.mxu0  ;;  %v4854_v46 = vpop.f32.mrf.mxu1 }
 0x6f6   :  { %v4812_v56 = vadd.f32 %v4811_v27, %v4132_v24  ;;  %v4988_v27 = vrot.slane %v7318_v47, %v7306_v18 }
 0x6f7   :  { %v4813_v38 = vpop.f32.mrf.mxu0  ;;  %v4856_v25 = vpop.f32.mrf.mxu1 }
 0x6f8   :  { %v4814_v52 = vadd.f32 %v4813_v38, %v4136_v53  ;;  %v4855_v60 = vadd.f32 %v4854_v46, %v4812_v56  ;;  %v4992_v46 = vrot.slane %v7325_v48, %v7306_v18 }
 0x6f9   :  { %v4815_v16 = vpop.f32.mrf.mxu0  ;;  %v4858_v54 = vpop.f32.mrf.mxu1 }
 0x6fa   :  { %v4816_v30 = vadd.f32 %v4815_v16, %v4132_v24  ;;  %v4857_v43 = vadd.f32 %v4856_v25, %v4814_v52  ;;  %v5000_v25 = vrot.slane %v7318_v47, %v7302_v50  ;;  %v5004_v24 = vrot.slane %v7325_v48, %v7302_v50 }
 0x6fb   :  { %v4817_v59 = vpop.f32.mrf.mxu0  ;;  %v4860_v51 = vpop.f32.mrf.mxu1 }
 0x6fc   :  { %v4818_v1 = vadd.f32 %v4817_v59, %v4136_v53  ;;  %v4859_v36 = vadd.f32 %v4858_v54, %v4816_v30 }
 0x6fe   :  { %v4861_v14 = vadd.f32 %v4860_v51, %v4818_v1 }
 0x735   :  { %v4897_v17 = vpop.f32.mrf.mxu0  ;;  %v4940_v58 = vpop.f32.mrf.mxu1 }
 0x736   :  { %v4898_v23 = vadd.f32 %v4897_v17, %v4855_v60 }
 0x737   :  { %v4899_v15 = vpop.f32.mrf.mxu0  ;;  %v4942_v32 = vpop.f32.mrf.mxu1 }
 0x738   :  { %v4941_v10 = vadd.f32 %v4940_v58, %v4898_v23  ;;  %v4900_v61 = vadd.f32 %v4899_v15, %v4857_v43 }
 0x739   :  { %v4901_v4 = vpop.f32.mrf.mxu0  ;;  %v4944_v8 = vpop.f32.mrf.mxu1 }
 0x73a   :  { %v4943_v5 = vadd.f32 %v4942_v32, %v4900_v61  ;;  %v4902_v57 = vadd.f32 %v4901_v4, %v4859_v36  ;;  %v4949_v13 = vadd.f32 %v4941_v10, %v7091_v2 }
 0x73b   :  { %v4903_v63 = vpop.f32.mrf.mxu0  ;;  %v4946_v22 = vpop.f32.mrf.mxu1 }
 0x73c   :  { %v4950_v49 = vadd.f32 %v4943_v5, %v7087_v0  ;;  %v4945_v7 = vadd.f32 %v4944_v8, %v4902_v57  ;;  %v4904_v9 = vadd.f32 %v4903_v63, %v4861_v14 }
 0x73e   :  { %v4947_v26 = vadd.f32 %v4946_v22, %v4904_v9  ;;  %v4953_v19 = vadd.f32 %v4950_v49, %v4949_v13  ;;  %v4951_v6 = vadd.f32 %v4945_v7, %v7093_v3 }
 0x740   :  { %v4952_v20 = vadd.f32 %v4947_v26, %v7089_v21  ;;  %4954 = vadd.xlane.f32.xlu0 %v4953_v19 }
 0x742   :  { %v4956_v31 = vadd.f32 %v4952_v20, %v4951_v6 }
 0x744   :  { %4957 = vadd.xlane.f32.xlu1 %v4956_v31 }
 0x7c9   :  { %v4955_v11 = vpop.xlane.xlu0 %4954 }
 0x7ca   :  { %v4959_v12 = vmul.f32 0.00390625, %v4955_v11 }
 0x7cc   :  { %v4961_v39 = vsub.f32 %v4949_v13, %v4959_v12  ;;  %v4962_v29 = vsub.f32 %v4950_v49, %v4959_v12 }
 0x7cd   :  { %v4958_v33 = vpop.xlane.xlu1 %4957 }
 0x7ce   :  { %v4960_v2 = vmul.f32 0.00390625, %v4958_v33  ;;  %v4965_v55 = vmul.f32 %v4961_v39, %v4961_v39  ;;  %v4966_v0 = vmul.f32 %v4962_v29, %v4962_v29 }
 0x7d0   :  { %v4963_v37 = vsub.f32 %v4951_v6, %v4960_v2  ;;  %v4964_v28 = vsub.f32 %v4952_v20, %v4960_v2  ;;  %v4969_v44 = vadd.f32 %v4966_v0, %v4965_v55 }
 0x7d2   :  { %4970 = vadd.xlane.f32.xlu0 %v4969_v44  ;;  %v4967_v62 = vmul.f32 %v4963_v37, %v4963_v37  ;;  %v4968_v40 = vmul.f32 %v4964_v28, %v4964_v28 }
 0x7d4   :  { %v4972_v3 = vadd.f32 %v4968_v40, %v4967_v62 }
 0x7d6   :  { %4973 = vadd.xlane.f32.xlu1 %v4972_v3 }
 0x85b   :  { %v4971_v21 = vpop.xlane.xlu0 %4970 }
 0x85c   :  { %v4975_v41 = vmul.f32 0.00390625, %v4971_v21 }
 0x85e   :  { %v4977_v42 = vadd.f32 1e-05, %v4975_v41 }
 0x85f   :  { %v4974_v45 = vpop.xlane.xlu1 %4973 }
 0x860   :  { %6061 = vrsqrt.f32 %v4977_v42  ;;  %v4976_v34 = vmul.f32 0.00390625, %v4974_v45 }
 0x862   :  { %v4978_v35 = vadd.f32 1e-05, %v4976_v34 }
 0x864   :  { %6063 = vrsqrt.f32 %v4978_v35 }
 0x86d   :  { %v6062_v38 = vpop.eup %6061 }
 0x86e   :  { %v4981_v53 = vmul.f32 %v6062_v38, %v4961_v39  ;;  %v4982_v16 = vmul.f32 %v6062_v38, %v4962_v29 }
 0x870   :  { %v4993_v54 = vmul.f32 %v4988_v27, %v4981_v53  ;;  %v4994_v56 = vmul.f32 %v4992_v46, %v4982_v16 }
 0x871   :  { %v6064_v52 = vpop.eup %6063 }
 0x872   :  { %v4983_v59 = vmul.f32 %v6064_v52, %v4963_v37  ;;  %v4984_v51 = vmul.f32 %v6064_v52, %v4964_v28  ;;  %v5005_v60 = vadd.f32 %v5000_v25, %v4993_v54  ;;  %v5006_v30 = vadd.f32 %v5004_v24, %v4994_v56 }
 0x874   :  { %v4995_v17 = vmul.f32 %v4988_v27, %v4983_v59  ;;  %v4996_v18 = vmul.f32 %v4992_v46, %v4984_v51  ;;  %5009 = vst [vmem:[#allocation7] sm:$0xff] %v5005_v60  ;;  %5010 = vst [vmem:[#allocation7 + $0x8] sm:$0xff] %v5006_v30 }
 0x876   :  { %v5007_v58 = vadd.f32 %v5000_v25, %v4995_v17  ;;  %v5008_v47 = vadd.f32 %v5004_v24, %v4996_v18 }
 0x878   :  { %5011 = vst [vmem:[#allocation7 + $0x10] sm:$0xff] %v5007_v58  ;;  %5012 = vst [vmem:[#allocation7 + $0x18] sm:$0xff] %v5008_v47 }
 0x879   :  { %6118 = shalt.err (!%p6115_p0)
}
 0x87a   :  { %s6141_s22 = smov 256   ;;  %s6142_s5 = smov 16  }
 0x87b   :  { %5024 = dma.vmem_to_hbm [thread:$0]  %s5019_s8, 512, %s7357_s13, [#allocation4], %s6141_s22, %s6141_s22, %s6142_s5  }
 0x87c   :  { %6131 = dma.done.wait [#allocation4], 512  }
 0x87d   :  { %6132 = vsyncadd [#allocation4], 4294966784 }
 0x87e   :  { %5028 = vsyncpa [#allocation3], 1 }
 0x87f   :  { %5029 = vsyncpa [#allocation6], 1 }
 0x880   :  { %5030 = vsyncpa [#allocation4], 1 }

</bundles_post_ra>
